<compile_context>
chip_gen: v7x
topology: tpu7x:2x2x1
jax: 0.10.0
libtpu: 0.0.40
codegen_flags: <defaults>
</compile_context>

<pallas_src>
import jax
import jax.numpy as jnp
from jax.experimental import pallas as pl
from jax.experimental.pallas import tpu as pltpu

# ----------------------------- model dims (from nn.Module) ------------------
D_IN = 10
D_HID = 1000
D_OUT = 10


def _pad_to(n, m):
    return ((n + m - 1) // m) * m


D_IN_P = _pad_to(D_IN, 16)       # 16
D_HID_P = _pad_to(D_HID, 128)    # 1024
D_OUT_P = _pad_to(D_OUT, 128)    # 128

_MAX_TM = 256                    # batch tile (multiple of 8)


# ----------------------------- Pallas kernel --------------------------------
def _mlp_kernel(x_ref, w1_ref, b1_ref, w2_ref, b2_ref,
                w3_ref, b3_ref, w4_ref, b4_ref, o_ref):
    # Weights are bf16-resident in VMEM; activations cast to bf16 per dot,
    # accumulation + bias + ReLU in f32.
    h = x_ref[...].astype(jnp.bfloat16)

    h = jnp.dot(h, w1_ref[...], preferred_element_type=jnp.float32) + b1_ref[...]
    h = jnp.maximum(h, 0.0).astype(jnp.bfloat16)

    h = jnp.dot(h, w2_ref[...], preferred_element_type=jnp.float32) + b2_ref[...]
    h = jnp.maximum(h, 0.0).astype(jnp.bfloat16)

    h = jnp.dot(h, w3_ref[...], preferred_element_type=jnp.float32) + b3_ref[...]
    h = jnp.maximum(h, 0.0).astype(jnp.bfloat16)

    o_ref[...] = jnp.dot(h, w4_ref[...], preferred_element_type=jnp.float32) + b4_ref[...]


@jax.jit
def large_net_forward(x, params):
    """x: (B, 10) float32. params: dict of padded bf16 weights / f32 biases. Returns (B, 10)."""
    B = x.shape[0]
    B8 = _pad_to(max(B, 8), 8)
    TM = min(_MAX_TM, B8)                 # batch tile (multiple of 8)
    B_P = _pad_to(B8, TM)

    x_p = jnp.zeros((B_P, D_IN_P), jnp.float32).at[:B, :D_IN].set(x)

    # batch-tiled blocks for activations, resident (constant index_map) blocks for params
    tiled = lambda shape: pl.BlockSpec(shape, lambda i: (i, 0))
    resident = lambda shape: pl.BlockSpec(shape, lambda i: (0, 0))

    out_p = pl.pallas_call(
        _mlp_kernel,
        out_shape=jax.ShapeDtypeStruct((B_P, D_OUT_P), jnp.float32),
        grid=(B_P // TM,),
        in_specs=[
            tiled((TM, D_IN_P)),
            resident((D_IN_P, D_HID_P)), resident((1, D_HID_P)),
            resident((D_HID_P, D_HID_P)), resident((1, D_HID_P)),
            resident((D_HID_P, D_HID_P)), resident((1, D_HID_P)),
            resident((D_HID_P, D_OUT_P)), resident((1, D_OUT_P)),
        ],
        out_specs=tiled((TM, D_OUT_P)),
        compiler_params=pltpu.CompilerParams(
            dimension_semantics=("parallel",),
            vmem_limit_bytes=32 << 20,
        ),
    )(x_p,
      params["w1"], params["b1"],
      params["w2"], params["b2"],
      params["w3"], params["b3"],
      params["w4"], params["b4"])

    return out_p[:B, :D_OUT]


# ----------------------------- parameter init -------------------------------
def init_params(key):
    """Deterministic init mimicking nn.Linear's default U(-1/sqrt(fan_in), 1/sqrt(fan_in)).
    Weights stored transposed (in, out), zero-padded to TPU tile sizes, cast to bf16.
    Biases kept in f32 (tiny)."""
    dims = [(D_IN, D_HID), (D_HID, D_HID), (D_HID, D_HID), (D_HID, D_OUT)]
    pdims = [(D_IN_P, D_HID_P), (D_HID_P, D_HID_P), (D_HID_P, D_HID_P), (D_HID_P, D_OUT_P)]
    params = {}
    keys = jax.random.split(key, 2 * len(dims))
    for i, ((fin, fout), (fin_p, fout_p)) in enumerate(zip(dims, pdims)):
        bound = 1.0 / jnp.sqrt(fin)
        w = jax.random.uniform(keys[2 * i], (fin, fout), jnp.float32, -bound, bound)
        b = jax.random.uniform(keys[2 * i + 1], (fout,), jnp.float32, -bound, bound)
        w_p = jnp.zeros((fin_p, fout_p), jnp.float32).at[:fin, :fout].set(w)
        b_p = jnp.zeros((1, fout_p), jnp.float32).at[0, :fout].set(b)
        params[f"w{i+1}"] = w_p.astype(jnp.bfloat16)
        params[f"b{i+1}"] = b_p
    return params


def reference_forward(x, params):
    """Plain-JAX reference doing the same bf16-input / f32-accumulate math as the kernel."""
    def layer(h, w, b, relu):
        y = jnp.dot(h.astype(jnp.bfloat16), w, preferred_element_type=jnp.float32) + b
        return jnp.maximum(y, 0.0) if relu else y

    h = jnp.zeros((x.shape[0], D_IN_P), jnp.float32).at[:, :D_IN].set(x)
    h = layer(h, params["w1"], params["b1"], True)
    h = layer(h, params["w2"], params["b2"], True)
    h = layer(h, params["w3"], params["b3"], True)
    h = layer(h, params["w4"], params["b4"], False)
    return h[:, :D_OUT]


if __name__ == "__main__":
    key = jax.random.PRNGKey(0)
    pkey, xkey, xkey2 = jax.random.split(key, 3)
    params = init_params(pkey)

    # small batch (single tile)
    B = 8
    x = jax.random.normal(xkey, (B, D_IN), jnp.float32)
    out = jax.block_until_ready(large_net_forward(x, params))
    ref = reference_forward(x, params)
    assert out.shape == (B, D_OUT), out.shape
    assert jnp.allclose(out, ref, atol=1e-3, rtol=1e-3), float(jnp.max(jnp.abs(out - ref)))

    # larger batch exercising the batch-tiled grid (2 tiles of 256)
    B2 = 512
    x2 = jax.random.normal(xkey2, (B2, D_IN), jnp.float32)
    out2 = jax.block_until_ready(large_net_forward(x2, params))
    ref2 = reference_forward(x2, params)
    assert out2.shape == (B2, D_OUT), out2.shape
    assert jnp.allclose(out2, ref2, atol=1e-3, rtol=1e-3), float(jnp.max(jnp.abs(out2 - ref2)))

    print("KERNEL_OK")
</pallas_src>

<mosaic_0001>
module attributes {stable_mosaic.version = 11 : i64} {
  func.func @_mlp_kernel(%arg0: i32, %arg1: memref<8x16xf32, #tpu.memory_space<vmem>>, %arg2: memref<16x1024xbf16, #tpu.memory_space<vmem>>, %arg3: memref<1x1024xf32, #tpu.memory_space<vmem>>, %arg4: memref<1024x1024xbf16, #tpu.memory_space<vmem>>, %arg5: memref<1x1024xf32, #tpu.memory_space<vmem>>, %arg6: memref<1024x1024xbf16, #tpu.memory_space<vmem>>, %arg7: memref<1x1024xf32, #tpu.memory_space<vmem>>, %arg8: memref<1024x128xbf16, #tpu.memory_space<vmem>>, %arg9: memref<1x128xf32, #tpu.memory_space<vmem>>, %arg10: memref<8x128xf32, #tpu.memory_space<vmem>>) attributes {dimension_semantics = [#tpu.dimension_semantics<parallel>], iteration_bounds = array<i64: 1>, scalar_prefetch = 0 : i64, scratch_operands = 0 : i64, tpu.core_type = #tpu.core_type<tc>, window_params = [{transform_indices = @transform_0, window_bounds = array<i64: 8, 16>}, {pipeline_mode = #tpu.pipeline_mode<synchronous>, transform_indices = @transform_1, window_bounds = array<i64: 16, 1024>}, {pipeline_mode = #tpu.pipeline_mode<synchronous>, transform_indices = @transform_2, window_bounds = array<i64: 1, 1024>}, {pipeline_mode = #tpu.pipeline_mode<synchronous>, transform_indices = @transform_3, window_bounds = array<i64: 1024, 1024>}, {pipeline_mode = #tpu.pipeline_mode<synchronous>, transform_indices = @transform_4, window_bounds = array<i64: 1, 1024>}, {pipeline_mode = #tpu.pipeline_mode<synchronous>, transform_indices = @transform_5, window_bounds = array<i64: 1024, 1024>}, {pipeline_mode = #tpu.pipeline_mode<synchronous>, transform_indices = @transform_6, window_bounds = array<i64: 1, 1024>}, {pipeline_mode = #tpu.pipeline_mode<synchronous>, transform_indices = @transform_7, window_bounds = array<i64: 1024, 128>}, {pipeline_mode = #tpu.pipeline_mode<synchronous>, transform_indices = @transform_8, window_bounds = array<i64: 1, 128>}, {transform_indices = @transform_9, window_bounds = array<i64: 8, 128>}]} {
    %c0 = arith.constant 0 : index
    %c0_0 = arith.constant 0 : index
    %0 = vector.load %arg1[%c0, %c0_0] : memref<8x16xf32, #tpu.memory_space<vmem>>, vector<8x16xf32>
    %1 = arith.truncf %0 : vector<8x16xf32> to vector<8x16xbf16>
    %c0_1 = arith.constant 0 : index
    %c0_2 = arith.constant 0 : index
    %2 = vector.load %arg2[%c0_1, %c0_2] : memref<16x1024xbf16, #tpu.memory_space<vmem>>, vector<16x1024xbf16>
    %cst = arith.constant dense<0.000000e+00> : vector<8x1024xf32>
    %3 = tpu.matmul %1, %2, %cst {dimension_numbers = #tpu.dot_dimension_numbers<[1], [0], [0], [1], [0, 0, 1, 1], [], []>} : vector<8x16xbf16>, vector<16x1024xbf16>, vector<8x1024xf32> -> vector<8x1024xf32>
    %c0_3 = arith.constant 0 : index
    %c0_4 = arith.constant 0 : index
    %4 = vector.load %arg3[%c0_3, %c0_4] : memref<1x1024xf32, #tpu.memory_space<vmem>>, vector<1x1024xf32>
    %5 = vector.broadcast %4 : vector<1x1024xf32> to vector<8x1024xf32>
    %6 = arith.addf %3, %5 : vector<8x1024xf32>
    %cst_5 = arith.constant 0.000000e+00 : f32
    %7 = vector.broadcast %cst_5 : f32 to vector<8x1024xf32>
    %8 = arith.maximumf %6, %7 : vector<8x1024xf32>
    %9 = arith.truncf %8 : vector<8x1024xf32> to vector<8x1024xbf16>
    %c0_6 = arith.constant 0 : index
    %c0_7 = arith.constant 0 : index
    %10 = vector.load %arg4[%c0_6, %c0_7] : memref<1024x1024xbf16, #tpu.memory_space<vmem>>, vector<1024x1024xbf16>
    %cst_8 = arith.constant dense<0.000000e+00> : vector<8x1024xf32>
    %11 = tpu.matmul %9, %10, %cst_8 {dimension_numbers = #tpu.dot_dimension_numbers<[1], [0], [0], [1], [0, 0, 1, 1], [], []>} : vector<8x1024xbf16>, vector<1024x1024xbf16>, vector<8x1024xf32> -> vector<8x1024xf32>
    %c0_9 = arith.constant 0 : index
    %c0_10 = arith.constant 0 : index
    %12 = vector.load %arg5[%c0_9, %c0_10] : memref<1x1024xf32, #tpu.memory_space<vmem>>, vector<1x1024xf32>
    %13 = vector.broadcast %12 : vector<1x1024xf32> to vector<8x1024xf32>
    %14 = arith.addf %11, %13 : vector<8x1024xf32>
    %cst_11 = arith.constant 0.000000e+00 : f32
    %15 = vector.broadcast %cst_11 : f32 to vector<8x1024xf32>
    %16 = arith.maximumf %14, %15 : vector<8x1024xf32>
    %17 = arith.truncf %16 : vector<8x1024xf32> to vector<8x1024xbf16>
    %c0_12 = arith.constant 0 : index
    %c0_13 = arith.constant 0 : index
    %18 = vector.load %arg6[%c0_12, %c0_13] : memref<1024x1024xbf16, #tpu.memory_space<vmem>>, vector<1024x1024xbf16>
    %cst_14 = arith.constant dense<0.000000e+00> : vector<8x1024xf32>
    %19 = tpu.matmul %17, %18, %cst_14 {dimension_numbers = #tpu.dot_dimension_numbers<[1], [0], [0], [1], [0, 0, 1, 1], [], []>} : vector<8x1024xbf16>, vector<1024x1024xbf16>, vector<8x1024xf32> -> vector<8x1024xf32>
    %c0_15 = arith.constant 0 : index
    %c0_16 = arith.constant 0 : index
    %20 = vector.load %arg7[%c0_15, %c0_16] : memref<1x1024xf32, #tpu.memory_space<vmem>>, vector<1x1024xf32>
    %21 = vector.broadcast %20 : vector<1x1024xf32> to vector<8x1024xf32>
    %22 = arith.addf %19, %21 : vector<8x1024xf32>
    %cst_17 = arith.constant 0.000000e+00 : f32
    %23 = vector.broadcast %cst_17 : f32 to vector<8x1024xf32>
    %24 = arith.maximumf %22, %23 : vector<8x1024xf32>
    %25 = arith.truncf %24 : vector<8x1024xf32> to vector<8x1024xbf16>
    %c0_18 = arith.constant 0 : index
    %c0_19 = arith.constant 0 : index
    %26 = vector.load %arg8[%c0_18, %c0_19] : memref<1024x128xbf16, #tpu.memory_space<vmem>>, vector<1024x128xbf16>
    %cst_20 = arith.constant dense<0.000000e+00> : vector<8x128xf32>
    %27 = tpu.matmul %25, %26, %cst_20 {dimension_numbers = #tpu.dot_dimension_numbers<[1], [0], [0], [1], [0, 0, 1, 1], [], []>} : vector<8x1024xbf16>, vector<1024x128xbf16>, vector<8x128xf32> -> vector<8x128xf32>
    %c0_21 = arith.constant 0 : index
    %c0_22 = arith.constant 0 : index
    %28 = vector.load %arg9[%c0_21, %c0_22] : memref<1x128xf32, #tpu.memory_space<vmem>>, vector<1x128xf32>
    %29 = vector.broadcast %28 : vector<1x128xf32> to vector<8x128xf32>
    %30 = arith.addf %27, %29 : vector<8x128xf32>
    %c0_23 = arith.constant 0 : index
    %c0_24 = arith.constant 0 : index
    %31 = vector.load %arg10[%c0_23, %c0_24] : memref<8x128xf32, #tpu.memory_space<vmem>>, vector<8x128xf32>
    tpu.vector_store %arg10[%c0_23, %c0_24], %30 {strides = array<i32>} : memref<8x128xf32, #tpu.memory_space<vmem>>, vector<8x128xf32>,
    return
  }
  func.func @transform_0(%arg0: i32) -> (i32, i32) {
    %c0_i32 = arith.constant 0 : i32
    %c0_i32_0 = arith.constant 0 : i32
    return %arg0, %c0_i32 : i32, i32
  }
  func.func @transform_1(%arg0: i32) -> (i32, i32) {
    %c0_i32 = arith.constant 0 : i32
    %c0_i32_0 = arith.constant 0 : i32
    %c0_i32_1 = arith.constant 0 : i32
    return %c0_i32, %c0_i32_0 : i32, i32
  }
  func.func @transform_2(%arg0: i32) -> (i32, i32) {
    %c0_i32 = arith.constant 0 : i32
    %c0_i32_0 = arith.constant 0 : i32
    %c0_i32_1 = arith.constant 0 : i32
    return %c0_i32, %c0_i32_0 : i32, i32
  }
  func.func @transform_3(%arg0: i32) -> (i32, i32) {
    %c0_i32 = arith.constant 0 : i32
    %c0_i32_0 = arith.constant 0 : i32
    %c0_i32_1 = arith.constant 0 : i32
    return %c0_i32, %c0_i32_0 : i32, i32
  }
  func.func @transform_4(%arg0: i32) -> (i32, i32) {
    %c0_i32 = arith.constant 0 : i32
    %c0_i32_0 = arith.constant 0 : i32
    %c0_i32_1 = arith.constant 0 : i32
    return %c0_i32, %c0_i32_0 : i32, i32
  }
  func.func @transform_5(%arg0: i32) -> (i32, i32) {
    %c0_i32 = arith.constant 0 : i32
    %c0_i32_0 = arith.constant 0 : i32
    %c0_i32_1 = arith.constant 0 : i32
    return %c0_i32, %c0_i32_0 : i32, i32
  }
  func.func @transform_6(%arg0: i32) -> (i32, i32) {
    %c0_i32 = arith.constant 0 : i32
    %c0_i32_0 = arith.constant 0 : i32
    %c0_i32_1 = arith.constant 0 : i32
    return %c0_i32, %c0_i32_0 : i32, i32
  }
  func.func @transform_7(%arg0: i32) -> (i32, i32) {
    %c0_i32 = arith.constant 0 : i32
    %c0_i32_0 = arith.constant 0 : i32
    %c0_i32_1 = arith.constant 0 : i32
    return %c0_i32, %c0_i32_0 : i32, i32
  }
  func.func @transform_8(%arg0: i32) -> (i32, i32) {
    %c0_i32 = arith.constant 0 : i32
    %c0_i32_0 = arith.constant 0 : i32
    %c0_i32_1 = arith.constant 0 : i32
    return %c0_i32, %c0_i32_0 : i32, i32
  }
  func.func @transform_9(%arg0: i32) -> (i32, i32) {
    %c0_i32 = arith.constant 0 : i32
    %c0_i32_0 = arith.constant 0 : i32
    return %arg0, %c0_i32 : i32, i32
  }
}

</mosaic_0001>

<bundles_post_ra>
// kernel: large_net_forward.1
= control target key start
LH: loop header
LB: loop body
LE: loop exit
PB: predicated region body
PF: predicated region fallthrough
CT: control target
= control target key end

     0   :  { %14 = vsyncpa [#allocation3], 0  ;;  %s10694_s0 = inlined_call_operand.vmem [shape: f32[8,16], index: 0, kind: input, shape index: {}]   ;;  %s10695_s1 = inlined_call_operand.hbm [shape: bf16[16,1024], index: 1, kind: input, shape index: {}]   ;;  %s10696_s2 = inlined_call_operand.hbm [shape: f32[1,1024], index: 2, kind: input, shape index: {}]   ;;  %s10697_s3 = inlined_call_operand.hbm [shape: bf16[1024,1024], index: 3, kind: input, shape index: {}]   ;;  %s10698_s4 = inlined_call_operand.hbm [shape: f32[1,1024], index: 4, kind: input, shape index: {}]   ;;  %s10699_s5 = inlined_call_operand.hbm [shape: bf16[1024,1024], index: 5, kind: input, shape index: {}]   ;;  %s10700_s6 = inlined_call_operand.hbm [shape: f32[1,1024], index: 6, kind: input, shape index: {}]   ;;  %s10701_s7 = inlined_call_operand.hbm [shape: bf16[1024,128], index: 7, kind: input, shape index: {}]   ;;  %s10702_s8 = inlined_call_operand.hbm [shape: f32[1,128], index: 8, kind: input, shape index: {}]   ;;  %s10703_s9 = inlined_call_operand.hbm [shape: f32[8,128], index: 9, kind: output, shape index: {}]  }
   0x1   :  { %15 = vsyncpa [#allocation6], 0 }
   0x2   :  { %16 = vsyncpa [#allocation9], 0 }
   0x3   :  { %17 = vsyncpa [#allocation12], 0 }
   0x4   :  { %18 = vsyncpa [#allocation15], 0 }
   0x5   :  { %19 = vsyncpa [#allocation4], 0  ;;  %s10273_s30 = smov [#allocation5]   ;;  %s10274_s11 = smov [#allocation8]  }
   0x6   :  { %s40_s10 = sshll.u32 %s10273_s30, 4  ;;  %s62_s12 = sshll.u32 %s10274_s11, 4  ;;  %s41_s10 = int_to_ptr.vmem [resolvable:$true] %s40_s10  ;;  %s63_s12 = int_to_ptr.vmem [resolvable:$true] %s62_s12 }
   0x7   :  { %s10063_s15 = scalar_lea.hbm %s10696_s2, 128 }
   0x8   :  { %p10064_p0 = scmp.ne.s32.totalorder %s10696_s2, %s10063_s15  ;;  %p10067_p1 = scmp.lt.u32.totalorder %s10063_s15, %s10696_s2 }
   0xa   :  { %p10069_p2 = pnand %p10067_p1, %p10064_p0 }
   0xc   :  { %10072 = shalt.err (!%p10069_p2)
}
   0xd   :  { %s10073_s20 = scalar_lea.vmem %s41_s10, 128  ;;  %p10078_p4 = scmp.lt.s32.totalorder %s41_s10, %s41_s10 }
   0xe   :  { %p10074_p3 = scmp.ne.s32.totalorder %s41_s10, %s10073_s20  ;;  %p10079_p5 = scmp.lt.s32.totalorder %s10073_s20, %s10073_s20 }
  0x10   :  { %p10080_p6 = por %p10079_p5, %p10078_p4 }
  0x12   :  { %p10081_p7 = pnand %p10080_p6, %p10074_p3 }
  0x14   :  { %10084 = shalt.err (!%p10081_p7)
}
  0x15   :  { %43 = dma.hbm_to_vmem [thread:$0]  %s10696_s2, 128, %s41_s10, [#allocation6]  }
  0x16   :  { %s10085_s25 = scalar_lea.hbm %s10698_s4, 128 }
  0x17   :  { %p10086_p8 = scmp.ne.s32.totalorder %s10698_s4, %s10085_s25  ;;  %p10089_p9 = scmp.lt.u32.totalorder %s10085_s25, %s10698_s4 }
  0x19   :  { %p10091_p10 = pnand %p10089_p9, %p10086_p8 }
  0x1b   :  { %10094 = shalt.err (!%p10091_p10)
}
  0x1c   :  { %s10095_s30 = scalar_lea.vmem %s63_s12, 128  ;;  %p10100_p12 = scmp.lt.s32.totalorder %s63_s12, %s63_s12 }
  0x1d   :  { %p10096_p11 = scmp.ne.s32.totalorder %s63_s12, %s10095_s30  ;;  %p10101_p13 = scmp.lt.s32.totalorder %s10095_s30, %s10095_s30 }
  0x1f   :  { %p10102_p0 = por %p10101_p13, %p10100_p12 }
  0x21   :  { %p10103_p1 = pnand %p10102_p0, %p10096_p11 }
  0x23   :  { %10106 = shalt.err (!%p10103_p1)
}
  0x24   :  { %65 = dma.hbm_to_vmem [thread:$0]  %s10698_s4, 128, %s63_s12, [#allocation9]  }
  0x25   :  { %s10275_s11 = smov [#allocation11]   ;;  %s10276_s14 = smov [#allocation2]  }
  0x26   :  { %s84_s13 = sshll.u32 %s10275_s11, 4  ;;  %s27_s15 = sshll.u32 %s10276_s14, 4  ;;  %s85_s13 = int_to_ptr.vmem [resolvable:$true] %s84_s13  ;;  %s10361_s15 = int_to_ptr.vmem [resolvable:$true] %s27_s15 }
  0x27   :  { %s10107_s18 = scalar_lea.hbm %s10700_s6, 128 }
  0x28   :  { %p10108_p2 = scmp.ne.s32.totalorder %s10700_s6, %s10107_s18  ;;  %p10111_p3 = scmp.lt.u32.totalorder %s10107_s18, %s10700_s6 }
  0x2a   :  { %p10113_p4 = pnand %p10111_p3, %p10108_p2 }
  0x2c   :  { %10116 = shalt.err (!%p10113_p4)
}
  0x2d   :  { %s10117_s4 = scalar_lea.vmem %s85_s13, 128  ;;  %p10122_p6 = scmp.lt.s32.totalorder %s85_s13, %s85_s13 }
  0x2e   :  { %p10118_p5 = scmp.ne.s32.totalorder %s85_s13, %s10117_s4  ;;  %p10123_p7 = scmp.lt.s32.totalorder %s10117_s4, %s10117_s4 }
  0x30   :  { %p10124_p8 = por %p10123_p7, %p10122_p6 }
  0x32   :  { %p10125_p9 = pnand %p10124_p8, %p10118_p5 }
  0x34   :  { %10128 = shalt.err (!%p10125_p9)
}
  0x35   :  { %87 = dma.hbm_to_vmem [thread:$0]  %s10700_s6, 128, %s85_s13, [#allocation12]  }
  0x36   :  { %s10129_s26 = scalar_lea.hbm %s10695_s1, 1024 }
  0x37   :  { %p10130_p10 = scmp.ne.s32.totalorder %s10695_s1, %s10129_s26  ;;  %p10133_p11 = scmp.lt.u32.totalorder %s10129_s26, %s10695_s1 }
  0x39   :  { %p10135_p12 = pnand %p10133_p11, %p10130_p10 }
  0x3b   :  { %10138 = shalt.err (!%p10135_p12)
}
  0x3c   :  { %s10139_s2 = scalar_lea.vmem %s10361_s15, 1024  ;;  %p10144_p0 = scmp.lt.s32.totalorder %s10361_s15, %s10361_s15 }
  0x3d   :  { %p10140_p13 = scmp.ne.s32.totalorder %s10361_s15, %s10139_s2  ;;  %p10145_p1 = scmp.lt.s32.totalorder %s10139_s2, %s10139_s2 }
  0x3f   :  { %p10146_p2 = por %p10145_p1, %p10144_p0 }
  0x41   :  { %p10147_p3 = pnand %p10146_p2, %p10140_p13 }
  0x43   :  { %10150 = shalt.err (!%p10147_p3)
}
  0x44   :  { %s10277_s6 = smov 512   ;;  %s10278_s10 = smov 32  }
  0x45   :  { %33 = dma.hbm_to_vmem [thread:$0]  %s10695_s1, 1024, %s10361_s15, [#allocation3], %s10277_s6, %s10277_s6, %s10278_s10  }
  0x46   :  { %s10279_s14 = smov [#allocation7]   ;;  %s10280_s17 = smov [#allocation10]  }
  0x47   :  { %s49_s16 = sshll.u32 %s10279_s14, 4  ;;  %s71_s18 = sshll.u32 %s10280_s17, 4  ;;  %s50_s16 = int_to_ptr.vmem [resolvable:$true] %s49_s16  ;;  %s10395_s18 = int_to_ptr.vmem [resolvable:$true] %s71_s18 }
  0x48   :  { %s10151_s21 = scalar_lea.hbm %s10697_s3, 65536 }
  0x49   :  { %p10152_p4 = scmp.ne.s32.totalorder %s10697_s3, %s10151_s21  ;;  %p10155_p5 = scmp.lt.u32.totalorder %s10151_s21, %s10697_s3 }
  0x4b   :  { %p10157_p6 = pnand %p10155_p5, %p10152_p4 }
  0x4d   :  { %10160 = shalt.err (!%p10157_p6)
}
  0x4e   :  { %s10161_s1 = scalar_lea.vmem %s50_s16, 65536  ;;  %p10166_p8 = scmp.lt.s32.totalorder %s50_s16, %s50_s16 }
  0x4f   :  { %p10162_p7 = scmp.ne.s32.totalorder %s50_s16, %s10161_s1  ;;  %p10167_p9 = scmp.lt.s32.totalorder %s10161_s1, %s10161_s1 }
  0x51   :  { %p10168_p10 = por %p10167_p9, %p10166_p8 }
  0x53   :  { %p10169_p11 = pnand %p10168_p10, %p10162_p7 }
  0x55   :  { %10172 = shalt.err (!%p10169_p11)
}
  0x56   :  { %55 = dma.hbm_to_vmem [thread:$0]  %s10697_s3, 65536, %s50_s16, [#allocation6], %s10277_s6, %s10277_s6, %s10278_s10  }
  0x57   :  { %s10173_s27 = scalar_lea.hbm %s10699_s5, 65536 }
  0x58   :  { %p10174_p12 = scmp.ne.s32.totalorder %s10699_s5, %s10173_s27  ;;  %p10177_p13 = scmp.lt.u32.totalorder %s10173_s27, %s10699_s5 }
  0x5a   :  { %p10179_p0 = pnand %p10177_p13, %p10174_p12 }
  0x5c   :  { %10182 = shalt.err (!%p10179_p0)
}
  0x5d   :  { %s10183_s11 = scalar_lea.vmem %s10395_s18, 65536  ;;  %p10188_p2 = scmp.lt.s32.totalorder %s10395_s18, %s10395_s18 }
  0x5e   :  { %p10184_p1 = scmp.ne.s32.totalorder %s10395_s18, %s10183_s11  ;;  %p10189_p3 = scmp.lt.s32.totalorder %s10183_s11, %s10183_s11 }
  0x60   :  { %p10190_p4 = por %p10189_p3, %p10188_p2 }
  0x62   :  { %p10191_p5 = pnand %p10190_p4, %p10184_p1 }
  0x64   :  { %10194 = shalt.err (!%p10191_p5)
}
  0x65   :  { %77 = dma.hbm_to_vmem [thread:$0]  %s10699_s5, 65536, %s10395_s18, [#allocation9], %s10277_s6, %s10277_s6, %s10278_s10  }
  0x66   :  { %s10281_s14 = smov [#allocation13]   ;;  %s10195_s20 = scalar_lea.hbm %s10701_s7, 8192 }
  0x67   :  { %s93_s16 = sshll.u32 %s10281_s14, 4  ;;  %p10196_p6 = scmp.ne.s32.totalorder %s10701_s7, %s10195_s20  ;;  %s94_s16 = int_to_ptr.vmem [resolvable:$true] %s93_s16 }
  0x68   :  { %p10199_p7 = scmp.lt.u32.totalorder %s10195_s20, %s10701_s7 }
  0x6a   :  { %p10201_p8 = pnand %p10199_p7, %p10196_p6 }
  0x6c   :  { %10204 = shalt.err (!%p10201_p8)
}
  0x6d   :  { %s10205_s23 = scalar_lea.vmem %s94_s16, 8192  ;;  %p10210_p10 = scmp.lt.s32.totalorder %s94_s16, %s94_s16 }
  0x6e   :  { %p10206_p9 = scmp.ne.s32.totalorder %s94_s16, %s10205_s23  ;;  %p10211_p11 = scmp.lt.s32.totalorder %s10205_s23, %s10205_s23 }
  0x70   :  { %p10212_p12 = por %p10211_p11, %p10210_p10 }
  0x72   :  { %p10213_p13 = pnand %p10212_p12, %p10206_p9 }
  0x74   :  { %10216 = shalt.err (!%p10213_p13)
}
  0x75   :  { %s10282_s5 = smov 64   ;;  %s10283_s6 = smov 4  }
  0x76   :  { %99 = dma.hbm_to_vmem [thread:$0]  %s10701_s7, 8192, %s94_s16, [#allocation12], %s10282_s5, %s10282_s5, %s10283_s6  }
  0x77   :  { %s10284_s1 = smov [#allocation14]   ;;  %s10217_s26 = scalar_lea.hbm %s10702_s8, 16 }
  0x78   :  { %s106_s15 = sshll.u32 %s10284_s1, 4  ;;  %p10218_p0 = scmp.ne.s32.totalorder %s10702_s8, %s10217_s26  ;;  %s107_s15 = int_to_ptr.vmem [resolvable:$true] %s106_s15 }
  0x79   :  { %p10221_p1 = scmp.lt.u32.totalorder %s10217_s26, %s10702_s8 }
  0x7b   :  { %p10223_p2 = pnand %p10221_p1, %p10218_p0 }
  0x7d   :  { %10226 = shalt.err (!%p10223_p2)
}
  0x7e   :  { %s10227_s2 = scalar_lea.vmem %s107_s15, 16  ;;  %s10231_s7 = scalar_lea.vmem %s107_s15, 32 }
  0x7f   :  { %p10228_p3 = scmp.ne.s32.totalorder %s107_s15, %s10227_s2  ;;  %p10232_p4 = scmp.lt.s32.totalorder %s107_s15, %s107_s15 }
  0x80   :  { %p10233_p5 = scmp.lt.s32.totalorder %s10231_s7, %s10227_s2 }
  0x82   :  { %p10234_p6 = por %p10233_p5, %p10232_p4 }
  0x84   :  { %p10235_p7 = pnand %p10234_p6, %p10228_p3 }
  0x86   :  { %10238 = shalt.err (!%p10235_p7)
}
  0x87   :  { %109 = dma.hbm_to_vmem [thread:$0]  %s10702_s8, 16, %s107_s15, [#allocation15]  }
  0x88   :  { %10261 = dma.done.wait [#allocation3], 1024  }
  0x89   :  { %10262 = vsyncadd [#allocation3], 4294966272 }
  0x8a   :  { %10263 = dma.done.wait [#allocation6], 65664  }
  0x8b   :  { %10264 = vsyncadd [#allocation6], 4294901632 }
  0x8c   :  { %10265 = dma.done.wait [#allocation9], 65664  }
  0x8d   :  { %10266 = vsyncadd [#allocation9], 4294901632 }
  0x8e   :  { %10267 = dma.done.wait [#allocation12], 8320  }
  0x8f   :  { %10268 = vsyncadd [#allocation12], 4294958976 }
  0x90   :  { %10269 = dma.done.wait [#allocation15], 16  }
  0x91   :  { %10270 = vsyncadd [#allocation15], 4294967280  ;;  %v10285_v0 = vmov 0   ;;  %v137_v1 = vld [vmem:[#allocation2] sm:$0xff]  ;;  %v138_v6 = vld [vmem:[#allocation2 + $0x8] sm:$0xff]  ;;  %vm227_vm0 = vcmask 130048  }
  0x92   :  { %263 = vmatprep.mubr.bf16.mxu0 %v10285_v0  ;;  %304 = vmatprep.mubr.bf16.mxu1 %v10285_v0  ;;  %v141_v2 = vld [vmem:[#allocation2 + $0x20] sm:$0xff]  ;;  %v142_v7 = vld [vmem:[#allocation2 + $0x28] sm:$0xff]  ;;  %v139_v8 = vld [vmem:[#allocation2 + $0x10] sm:$0xff] }
  0x93   :  { %v135_v3 = vld [vmem:[%s10694_s0] sm:$0xff]  ;;  %v8683_v4 = vcombine.high %v137_v1, %v141_v2  ;;  %v8682_v5 = vcombine.low %v137_v1, %v141_v2  ;;  %v8685_v9 = vcombine.high %v138_v6, %v142_v7  ;;  %v8684_v10 = vcombine.low %v138_v6, %v142_v7  ;;  %v143_v11 = vld [vmem:[#allocation2 + $0x30] sm:$0xff]  ;;  %v140_v12 = vld [vmem:[#allocation2 + $0x18] sm:$0xff]  ;;  %s10286_s0 = smov [#allocation16]  }
  0x94   :  { %v144_v13 = vld [vmem:[#allocation2 + $0x38] sm:$0xff]  ;;  %v136_v14 = vpack.c.bf16 %v135_v3, %v135_v3  ;;  %v8687_v15 = vcombine.high %v139_v8, %v143_v11  ;;  %v411_v17 = vld [vmem:[#allocation7] sm:$0xff]  ;;  %v8686_v19 = vcombine.low %v139_v8, %v143_v11  ;;  %v412_v20 = vld [vmem:[#allocation7 + $0x8] sm:$0xff]  ;;  %s8669_s8 = sshll.u32 %s10286_s0, 4  ;;  %s8670_s8 = int_to_ptr.vmem [resolvable:$true] %s8669_s8 }
  0x95   :  { %231 = vmatprep.subr.bf16.mxu0 %v8683_v4  ;;  %v8689_v16 = vcombine.high %v140_v12, %v144_v13  ;;  %v415_v18 = vld [vmem:[#allocation7 + $0x20] sm:$0xff]  ;;  %272 = vmatprep.subr.bf16.mxu1 %v8685_v9  ;;  %v416_v21 = vld [vmem:[#allocation7 + $0x28] sm:$0xff]  ;;  %v8688_v22 = vcombine.low %v140_v12, %v144_v13  ;;  %s10239_s16 = scalar_lea.vmem %s8670_s8, 128  ;;  %p10244_p9 = scmp.lt.s32.totalorder %s8670_s8, %s8670_s8 }
  0x96   :  { %232 = vmatpush1.bf16.msra.mxu0 %v8682_v5  ;;  %273 = vmatpush1.bf16.msra.mxu1 %v8684_v10  ;;  %v8695_v23 = vcombine.high %v411_v17, %v415_v18  ;;  %v8697_v24 = vcombine.high %v412_v20, %v416_v21  ;;  %v419_v25 = vld [vmem:[#allocation7 + $0x40] sm:$0xff]  ;;  %v420_v27 = vld [vmem:[#allocation7 + $0x48] sm:$0xff]  ;;  %v8694_v29 = vcombine.low %v411_v17, %v415_v18  ;;  %p10240_p8 = scmp.ne.s32.totalorder %s8670_s8, %s10239_s16  ;;  %p10245_p10 = scmp.lt.s32.totalorder %s10239_s16, %s10239_s16 }
  0x97   :  { %313 = vmatprep.subr.bf16.mxu0 %v8687_v15  ;;  %354 = vmatprep.subr.bf16.mxu1 %v8689_v16  ;;  %v423_v26 = vld [vmem:[#allocation7 + $0x60] sm:$0xff]  ;;  %v424_v28 = vld [vmem:[#allocation7 + $0x68] sm:$0xff]  ;;  %v8696_v30 = vcombine.low %v412_v20, %v416_v21 }
  0x98   :  { %v8703_v31 = vcombine.high %v419_v25, %v423_v26  ;;  %v8705_v32 = vcombine.high %v420_v27, %v424_v28  ;;  %v427_v33 = vld [vmem:[#allocation7 + $0x80] sm:$0xff]  ;;  %v428_v35 = vld [vmem:[#allocation7 + $0x88] sm:$0xff]  ;;  %v8702_v37 = vcombine.low %v419_v25, %v423_v26  ;;  %v8704_v38 = vcombine.low %v420_v27, %v424_v28  ;;  %p10246_p11 = por %p10245_p10, %p10244_p9 }
  0x99   :  { %8690 = vmatmul.mubr.msk.bf16.vlgmr.msra.gmra.mrb[0].mxu0 %vm227_vm0, %v136_v14  ;;  %8691 = vmatmul.mubr.msk.bf16.vlgmr.msra.gmra.mrb[0].mxu1 %vm227_vm0, %v136_v14  ;;  %v431_v34 = vld [vmem:[#allocation7 + $0xa0] sm:$0xff]  ;;  %v432_v36 = vld [vmem:[#allocation7 + $0xa8] sm:$0xff] }
  0x9a   :  { %314 = vmatpush1.bf16.msra.mxu0 %v8686_v19  ;;  %345 = vmatprep.mubr.bf16.mxu0 %v10285_v0  ;;  %v8711_v39 = vcombine.high %v427_v33, %v431_v34  ;;  %v8713_v40 = vcombine.high %v428_v35, %v432_v36  ;;  %v435_v41 = vld [vmem:[#allocation7 + $0xc0] sm:$0xff]  ;;  %v436_v43 = vld [vmem:[#allocation7 + $0xc8] sm:$0xff]  ;;  %v8710_v45 = vcombine.low %v427_v33, %v431_v34  ;;  %p10247_p12 = pnand %p10246_p11, %p10240_p8 }
  0x9b   :  { %355 = vmatpush1.bf16.msra.mxu1 %v8688_v22  ;;  %386 = vmatprep.mubr.bf16.mxu1 %v10285_v0  ;;  %v439_v42 = vld [vmem:[#allocation7 + $0xe0] sm:$0xff]  ;;  %v440_v44 = vld [vmem:[#allocation7 + $0xe8] sm:$0xff]  ;;  %v8712_v47 = vcombine.low %v428_v35, %v432_v36 }
  0x9c   :  { %3525 = vmatprep.subr.bf16.mxu0 %v8695_v23  ;;  %3689 = vmatprep.subr.bf16.mxu1 %v8697_v24  ;;  %v443_v46 = vld [vmem:[#allocation7 + $0x100] sm:$0xff]  ;;  %v8719_v48 = vcombine.high %v435_v41, %v439_v42  ;;  %v444_v50 = vld [vmem:[#allocation7 + $0x108] sm:$0xff]  ;;  %v8721_v52 = vcombine.high %v436_v43, %v440_v44  ;;  %v8718_v53 = vcombine.low %v435_v41, %v439_v42 }
  0x9d   :  { %v447_v49 = vld [vmem:[#allocation7 + $0x120] sm:$0xff]  ;;  %v448_v51 = vld [vmem:[#allocation7 + $0x128] sm:$0xff]  ;;  %v8720_v56 = vcombine.low %v436_v43, %v440_v44 }
  0x9e   :  { %v451_v54 = vld [vmem:[#allocation7 + $0x140] sm:$0xff]  ;;  %v8727_v57 = vcombine.high %v443_v46, %v447_v49  ;;  %v452_v58 = vld [vmem:[#allocation7 + $0x148] sm:$0xff]  ;;  %v8729_v60 = vcombine.high %v444_v50, %v448_v51  ;;  %v8726_v61 = vcombine.low %v443_v46, %v447_v49  ;;  %v8728_v0 = vcombine.low %v444_v50, %v448_v51 }
  0x9f   :  { %v455_v55 = vld [vmem:[#allocation7 + $0x160] sm:$0xff]  ;;  %v456_v59 = vld [vmem:[#allocation7 + $0x168] sm:$0xff] }
  0xa0   :  { %v459_v62 = vld [vmem:[#allocation7 + $0x180] sm:$0xff]  ;;  %v8735_v1 = vcombine.high %v451_v54, %v455_v55  ;;  %v460_v2 = vld [vmem:[#allocation7 + $0x188] sm:$0xff]  ;;  %v8737_v4 = vcombine.high %v452_v58, %v456_v59  ;;  %v8734_v5 = vcombine.low %v451_v54, %v455_v55  ;;  %v8736_v8 = vcombine.low %v452_v58, %v456_v59 }
  0xa1   :  { %8692 = vmatmul.mubr.msk.bf16.vlgmr.msra.gmra.mrb[4].mxu0 %vm227_vm0, %v136_v14  ;;  %8693 = vmatmul.mubr.msk.bf16.vlgmr.msra.gmra.mrb[4].mxu1 %vm227_vm0, %v136_v14  ;;  %v463_v63 = vld [vmem:[#allocation7 + $0x1a0] sm:$0xff]  ;;  %v464_v3 = vld [vmem:[#allocation7 + $0x1a8] sm:$0xff] }
  0xa2   :  { %3526 = vmatpush1.bf16.msra.mxu0 %v8694_v29  ;;  %3690 = vmatpush1.bf16.msra.mxu1 %v8696_v30  ;;  %v467_v6 = vld [vmem:[#allocation7 + $0x1c0] sm:$0xff]  ;;  %v8743_v9 = vcombine.high %v459_v62, %v463_v63  ;;  %v468_v10 = vld [vmem:[#allocation7 + $0x1c8] sm:$0xff]  ;;  %v8745_v12 = vcombine.high %v460_v2, %v464_v3  ;;  %v8742_v13 = vcombine.low %v459_v62, %v463_v63 }
  0xa3   :  { %3527 = vmatprep.subr.bf16.mxu0 %v8703_v31  ;;  %3691 = vmatprep.subr.bf16.mxu1 %v8705_v32  ;;  %v471_v7 = vld [vmem:[#allocation7 + $0x1e0] sm:$0xff]  ;;  %v472_v11 = vld [vmem:[#allocation7 + $0x1e8] sm:$0xff]  ;;  %v8744_v16 = vcombine.low %v460_v2, %v464_v3 }
  0xa4   :  { %v475_v14 = vld [vmem:[#allocation7 + $0x200] sm:$0xff]  ;;  %v8751_v17 = vcombine.high %v467_v6, %v471_v7  ;;  %v476_v18 = vld [vmem:[#allocation7 + $0x208] sm:$0xff]  ;;  %v8753_v20 = vcombine.high %v468_v10, %v472_v11  ;;  %v8750_v21 = vcombine.low %v467_v6, %v471_v7  ;;  %v8752_v24 = vcombine.low %v468_v10, %v472_v11 }
  0xa5   :  { %v479_v15 = vld [vmem:[#allocation7 + $0x220] sm:$0xff]  ;;  %v480_v19 = vld [vmem:[#allocation7 + $0x228] sm:$0xff] }
  0xa6   :  { %3528 = vmatpush1.bf16.msra.mxu0 %v8702_v37  ;;  %3692 = vmatpush1.bf16.msra.mxu1 %v8704_v38  ;;  %v483_v22 = vld [vmem:[#allocation7 + $0x240] sm:$0xff]  ;;  %v8759_v25 = vcombine.high %v475_v14, %v479_v15  ;;  %v484_v26 = vld [vmem:[#allocation7 + $0x248] sm:$0xff]  ;;  %v8761_v28 = vcombine.high %v476_v18, %v480_v19  ;;  %v8758_v29 = vcombine.low %v475_v14, %v479_v15 }
  0xa7   :  { %3529 = vmatprep.subr.bf16.mxu0 %v8711_v39  ;;  %3693 = vmatprep.subr.bf16.mxu1 %v8713_v40  ;;  %v487_v23 = vld [vmem:[#allocation7 + $0x260] sm:$0xff]  ;;  %v488_v27 = vld [vmem:[#allocation7 + $0x268] sm:$0xff]  ;;  %v8760_v32 = vcombine.low %v476_v18, %v480_v19 }
  0xa8   :  { %v491_v30 = vld [vmem:[#allocation7 + $0x280] sm:$0xff]  ;;  %v8767_v33 = vcombine.high %v483_v22, %v487_v23  ;;  %v492_v34 = vld [vmem:[#allocation7 + $0x288] sm:$0xff]  ;;  %v8769_v36 = vcombine.high %v484_v26, %v488_v27  ;;  %v8766_v37 = vcombine.low %v483_v22, %v487_v23  ;;  %v8768_v40 = vcombine.low %v484_v26, %v488_v27 }
  0xa9   :  { %v495_v31 = vld [vmem:[#allocation7 + $0x2a0] sm:$0xff]  ;;  %v496_v35 = vld [vmem:[#allocation7 + $0x2a8] sm:$0xff]  ;;  %v147_v27 = vlaneseq }
  0xaa   :  { %3530 = vmatpush1.bf16.msra.mxu0 %v8710_v45  ;;  %3694 = vmatpush1.bf16.msra.mxu1 %v8712_v47  ;;  %v499_v38 = vld [vmem:[#allocation7 + $0x2c0] sm:$0xff]  ;;  %v8775_v41 = vcombine.high %v491_v30, %v495_v31  ;;  %v500_v42 = vld [vmem:[#allocation7 + $0x2c8] sm:$0xff]  ;;  %v8777_v44 = vcombine.high %v492_v34, %v496_v35  ;;  %v8774_v45 = vcombine.low %v491_v30, %v495_v31  ;;  %v10468_v30 = vld [vmem:[#allocation5] sm:$0xff] }
  0xab   :  { %3531 = vmatprep.subr.bf16.mxu0 %v8719_v48  ;;  %3695 = vmatprep.subr.bf16.mxu1 %v8721_v52  ;;  %v503_v39 = vld [vmem:[#allocation7 + $0x2e0] sm:$0xff]  ;;  %v504_v43 = vld [vmem:[#allocation7 + $0x2e8] sm:$0xff]  ;;  %v8776_v48 = vcombine.low %v492_v34, %v496_v35 }
  0xac   :  { %v507_v46 = vld [vmem:[#allocation7 + $0x300] sm:$0xff]  ;;  %v8783_v49 = vcombine.high %v499_v38, %v503_v39  ;;  %v508_v50 = vld [vmem:[#allocation7 + $0x308] sm:$0xff]  ;;  %v8785_v52 = vcombine.high %v500_v42, %v504_v43 }
  0xad   :  { %v511_v47 = vld [vmem:[#allocation7 + $0x320] sm:$0xff]  ;;  %v512_v51 = vld [vmem:[#allocation7 + $0x328] sm:$0xff] }
  0xae   :  { %3532 = vmatpush1.bf16.msra.mxu0 %v8718_v53  ;;  %3696 = vmatpush1.bf16.msra.mxu1 %v8720_v56  ;;  %v8782_v53 = vcombine.low %v499_v38, %v503_v39  ;;  %v515_v54 = vld [vmem:[#allocation7 + $0x340] sm:$0xff]  ;;  %v8784_v56 = vcombine.low %v500_v42, %v504_v43  ;;  %v516_v58 = vld [vmem:[#allocation7 + $0x348] sm:$0xff]  ;;  %v8792_v62 = vcombine.low %v508_v50, %v512_v51 }
  0xaf   :  { %3533 = vmatprep.subr.bf16.mxu0 %v8727_v57  ;;  %3697 = vmatprep.subr.bf16.mxu1 %v8729_v60  ;;  %v519_v55 = vld [vmem:[#allocation7 + $0x360] sm:$0xff]  ;;  %v8791_v57 = vcombine.high %v507_v46, %v511_v47  ;;  %v520_v59 = vld [vmem:[#allocation7 + $0x368] sm:$0xff]  ;;  %v8793_v60 = vcombine.high %v508_v50, %v512_v51 }
  0xb0   :  { %v8799_v63 = vcombine.high %v515_v54, %v519_v55  ;;  %v8800_v2 = vcombine.low %v516_v58, %v520_v59  ;;  %v523_v3 = vld [vmem:[#allocation7 + $0x380] sm:$0xff]  ;;  %v528_v7 = vld [vmem:[#allocation7 + $0x3a8] sm:$0xff] }
  0xb1   :  { %v531_v11 = vld [vmem:[#allocation7 + $0x3c0] sm:$0xff]  ;;  %v536_v15 = vld [vmem:[#allocation7 + $0x3e8] sm:$0xff] }
  0xb2   :  { %3534 = vmatpush1.bf16.msra.mxu0 %v8726_v61  ;;  %3698 = vmatpush1.bf16.msra.mxu1 %v8728_v0  ;;  %v8790_v61 = vcombine.low %v507_v46, %v511_v47  ;;  %v8801_v0 = vcombine.high %v516_v58, %v520_v59  ;;  %v539_v19 = vld [vmem:[#allocation7 + $0x400] sm:$0xff]  ;;  %v544_v23 = vld [vmem:[#allocation7 + $0x428] sm:$0xff] }
  0xb3   :  { %3535 = vmatprep.subr.bf16.mxu0 %v8735_v1  ;;  %3699 = vmatprep.subr.bf16.mxu1 %v8737_v4  ;;  %v8798_v1 = vcombine.low %v515_v54, %v519_v55  ;;  %v527_v4 = vld [vmem:[#allocation7 + $0x3a0] sm:$0xff]  ;;  %v548_v50 = vld [vmem:[#allocation7 + $0x448] sm:$0xff] }
  0xb4   :  { %v8807_v6 = vcombine.high %v523_v3, %v527_v4  ;;  %v552_v51 = vld [vmem:[#allocation7 + $0x468] sm:$0xff]  ;;  %v555_v58 = vld [vmem:[#allocation7 + $0x480] sm:$0xff] }
  0xb5   :  { %v559_v59 = vld [vmem:[#allocation7 + $0x4a0] sm:$0xff] }
  0xb6   :  { %3536 = vmatpush1.bf16.msra.mxu0 %v8734_v5  ;;  %3700 = vmatpush1.bf16.msra.mxu1 %v8736_v8  ;;  %v524_v5 = vld [vmem:[#allocation7 + $0x388] sm:$0xff]  ;;  %v8806_v8 = vcombine.low %v523_v3, %v527_v4  ;;  %v8839_v4 = vcombine.high %v555_v58, %v559_v59 }
  0xb7   :  { %3537 = vmatprep.subr.bf16.mxu0 %v8743_v9  ;;  %3701 = vmatprep.subr.bf16.mxu1 %v8745_v12  ;;  %v8808_v9 = vcombine.low %v524_v5, %v528_v7  ;;  %v8809_v10 = vcombine.high %v524_v5, %v528_v7  ;;  %v535_v12 = vld [vmem:[#allocation7 + $0x3e0] sm:$0xff] }
  0xb8   :  { %v8815_v14 = vcombine.high %v531_v11, %v535_v12 }
  0xba   :  { %3538 = vmatpush1.bf16.msra.mxu0 %v8742_v13  ;;  %3702 = vmatpush1.bf16.msra.mxu1 %v8744_v16  ;;  %v532_v13 = vld [vmem:[#allocation7 + $0x3c8] sm:$0xff]  ;;  %v8814_v16 = vcombine.low %v531_v11, %v535_v12  ;;  %v8838_v11 = vcombine.low %v555_v58, %v559_v59 }
  0xbb   :  { %3539 = vmatprep.subr.bf16.mxu0 %v8751_v17  ;;  %3703 = vmatprep.subr.bf16.mxu1 %v8753_v20  ;;  %v8816_v17 = vcombine.low %v532_v13, %v536_v15  ;;  %v8817_v18 = vcombine.high %v532_v13, %v536_v15  ;;  %v543_v20 = vld [vmem:[#allocation7 + $0x420] sm:$0xff]  ;;  %v608_v58 = vld [vmem:[#allocation7 + $0x628] sm:$0xff] }
  0xbc   :  { %v8823_v22 = vcombine.high %v539_v19, %v543_v20  ;;  %v571_v15 = vld [vmem:[#allocation7 + $0x500] sm:$0xff] }
  0xbe   :  { %3540 = vmatpush1.bf16.msra.mxu0 %v8750_v21  ;;  %3704 = vmatpush1.bf16.msra.mxu1 %v8752_v24  ;;  %v540_v21 = vld [vmem:[#allocation7 + $0x408] sm:$0xff]  ;;  %v8822_v24 = vcombine.low %v539_v19, %v543_v20 }
  0xbf   :  { %3541 = vmatprep.subr.bf16.mxu0 %v8759_v25  ;;  %3705 = vmatprep.subr.bf16.mxu1 %v8761_v28  ;;  %v8824_v25 = vcombine.low %v540_v21, %v544_v23  ;;  %v8825_v26 = vcombine.high %v540_v21, %v544_v23  ;;  %v10463_v28 = vshrl.u32 %v147_v27, 7  ;;  %v579_v23 = vld [vmem:[#allocation7 + $0x540] sm:$0xff] }
  0xc1   :  { %v10471_v31 = vsub.s32 1, %v10463_v28 }
  0xc2   :  { %3542 = vmatpush1.bf16.msra.mxu0 %v8758_v29  ;;  %3706 = vmatpush1.bf16.msra.mxu1 %v8760_v32  ;;  %v10466_v29 = vsub.s32 0, %v10463_v28  ;;  %v10474_v32 = vsub.s32 3, %v10463_v28 }
  0xc3   :  { %3543 = vmatprep.subr.bf16.mxu0 %v8767_v33  ;;  %3707 = vmatprep.subr.bf16.mxu1 %v8769_v36  ;;  %v154_v34 = vrot.slane %v10468_v30, %v10471_v31 }
  0xc4   :  { %v150_v33 = vrot.slane %v10468_v30, %v10466_v29  ;;  %v162_v35 = vrot.slane %v10468_v30, %v10474_v32 }
  0xc6   :  { %3544 = vmatpush1.bf16.msra.mxu0 %v8766_v37  ;;  %3708 = vmatpush1.bf16.msra.mxu1 %v8768_v40 }
  0xc7   :  { %3545 = vmatprep.subr.bf16.mxu0 %v8775_v41  ;;  %3709 = vmatprep.subr.bf16.mxu1 %v8777_v44 }
  0xca   :  { %3546 = vmatpush1.bf16.msra.mxu0 %v8774_v45  ;;  %3710 = vmatpush1.bf16.msra.mxu1 %v8776_v48  ;;  %v547_v45 = vld [vmem:[#allocation7 + $0x440] sm:$0xff] }
  0xcb   :  { %3547 = vmatprep.subr.bf16.mxu0 %v8783_v49  ;;  %3711 = vmatprep.subr.bf16.mxu1 %v8785_v52  ;;  %v551_v49 = vld [vmem:[#allocation7 + $0x460] sm:$0xff] }
  0xce   :  { %3548 = vmatpush1.bf16.msra.mxu0 %v8782_v53  ;;  %3712 = vmatpush1.bf16.msra.mxu1 %v8784_v56  ;;  %v8831_v56 = vcombine.high %v547_v45, %v551_v49 }
  0xcf   :  { %3549 = vmatprep.subr.bf16.mxu0 %v8791_v57  ;;  %3713 = vmatprep.subr.bf16.mxu1 %v8793_v60  ;;  %v8833_v57 = vcombine.high %v548_v50, %v552_v51  ;;  %v556_v60 = vld [vmem:[#allocation7 + $0x488] sm:$0xff] }
  0xd2   :  { %3550 = vmatpush1.bf16.msra.mxu0 %v8790_v61  ;;  %3714 = vmatpush1.bf16.msra.mxu1 %v8792_v62  ;;  %v560_v61 = vld [vmem:[#allocation7 + $0x4a8] sm:$0xff] }
  0xd3   :  { %3551 = vmatprep.subr.bf16.mxu0 %v8799_v63  ;;  %3715 = vmatprep.subr.bf16.mxu1 %v8801_v0  ;;  %v8841_v5 = vcombine.high %v556_v60, %v560_v61  ;;  %v8840_v12 = vcombine.low %v556_v60, %v560_v61 }
  0xd6   :  { %3552 = vmatpush1.bf16.msra.mxu0 %v8798_v1  ;;  %3716 = vmatpush1.bf16.msra.mxu1 %v8800_v2  ;;  %v8830_v1 = vcombine.low %v547_v45, %v551_v49  ;;  %v8832_v2 = vcombine.low %v548_v50, %v552_v51  ;;  %v595_v45 = vld [vmem:[#allocation7 + $0x5c0] sm:$0xff] }
  0xd7   :  { %3553 = vmatprep.subr.bf16.mxu0 %v8807_v6  ;;  %3717 = vmatprep.subr.bf16.mxu1 %v8809_v10  ;;  %v563_v6 = vld [vmem:[#allocation7 + $0x4c0] sm:$0xff]  ;;  %v568_v10 = vld [vmem:[#allocation7 + $0x4e8] sm:$0xff] }
  0xda   :  { %3554 = vmatpush1.bf16.msra.mxu0 %v8806_v8  ;;  %3718 = vmatpush1.bf16.msra.mxu1 %v8808_v9  ;;  %v567_v8 = vld [vmem:[#allocation7 + $0x4e0] sm:$0xff]  ;;  %v564_v9 = vld [vmem:[#allocation7 + $0x4c8] sm:$0xff] }
  0xdb   :  { %3555 = vmatprep.subr.bf16.mxu0 %v8815_v14  ;;  %3719 = vmatprep.subr.bf16.mxu1 %v8817_v18  ;;  %v8847_v13 = vcombine.high %v563_v6, %v567_v8  ;;  %v8849_v14 = vcombine.high %v564_v9, %v568_v10  ;;  %v576_v18 = vld [vmem:[#allocation7 + $0x528] sm:$0xff]  ;;  %v8846_v19 = vcombine.low %v563_v6, %v567_v8 }
  0xdc   :  { %v8848_v20 = vcombine.low %v564_v9, %v568_v10  ;;  %v619_v10 = vld [vmem:[#allocation7 + $0x680] sm:$0xff] }
  0xde   :  { %3556 = vmatpush1.bf16.msra.mxu0 %v8814_v16  ;;  %3720 = vmatpush1.bf16.msra.mxu1 %v8816_v17  ;;  %v575_v16 = vld [vmem:[#allocation7 + $0x520] sm:$0xff]  ;;  %v572_v17 = vld [vmem:[#allocation7 + $0x508] sm:$0xff] }
  0xdf   :  { %3566 = vmatprep.subr.bf16.mxu0 %v8823_v22  ;;  %3730 = vmatprep.subr.bf16.mxu1 %v8825_v26  ;;  %v8855_v21 = vcombine.high %v571_v15, %v575_v16  ;;  %v8857_v22 = vcombine.high %v572_v17, %v576_v18  ;;  %v584_v26 = vld [vmem:[#allocation7 + $0x568] sm:$0xff]  ;;  %v8854_v27 = vcombine.low %v571_v15, %v575_v16 }
 0x16c   :  { %v265_v36 = vpop.f32.mrb[0].mxu0  ;;  %v10482_v39 = vpop.f32.mrb[0].mxu1 }
 0x16d   :  { %v266_v37 = vadd.f32 %v265_v36, %v150_v33  ;;  %v267_v38 = vpop.f32.mrb[1].mxu0  ;;  %v308_v42 = vpop.f32.mrb[1].mxu1  ;;  %v8856_v33 = vcombine.low %v572_v17, %v576_v18  ;;  %v587_v36 = vld [vmem:[#allocation7 + $0x580] sm:$0xff] }
 0x16e   :  { %v268_v40 = vadd.f32 %v267_v38, %v154_v34  ;;  %v269_v41 = vpop.f32.mrb[2].mxu0  ;;  %v309_v46 = vadd.f32 %v308_v42, %v162_v35  ;;  %v310_v47 = vpop.f32.mrb[2].mxu1  ;;  %v588_v38 = vld [vmem:[#allocation7 + $0x588] sm:$0xff]  ;;  %v627_v18 = vld [vmem:[#allocation7 + $0x6c0] sm:$0xff] }
 0x16f   :  { %v395_v43 = vmax.f32 %v266_v37, 0.0  ;;  %v270_v44 = vpop.f32.mrb[3].mxu0  ;;  %v311_v52 = vpop.f32.mrb[3].mxu1  ;;  %v591_v37 = vld [vmem:[#allocation7 + $0x5a0] sm:$0xff]  ;;  %v596_v47 = vld [vmem:[#allocation7 + $0x5c8] sm:$0xff] }
 0x170   :  { %v396_v48 = vmax.f32 %v268_v40, 0.0  ;;  %v398_v53 = vmax.f32 %v309_v46, 0.0  ;;  %v592_v40 = vld [vmem:[#allocation7 + $0x5a8] sm:$0xff]  ;;  %v599_v46 = vld [vmem:[#allocation7 + $0x5e0] sm:$0xff]  ;;  %v8870_v49 = vcombine.low %v587_v36, %v591_v37 }
 0x171   :  { %v10486_v55 = vpack.c.bf16 %v395_v43, %v395_v43  ;;  %v8871_v43 = vcombine.high %v587_v36, %v591_v37  ;;  %v8873_v44 = vcombine.high %v588_v38, %v592_v40  ;;  %v8872_v50 = vcombine.low %v588_v38, %v592_v40  ;;  %v643_v40 = vld [vmem:[#allocation7 + $0x740] sm:$0xff] }
 0x172   :  { %v10484_v54 = vpack.c.bf16 %v396_v48, %v396_v48  ;;  %v10490_v62 = vpack.c.bf16 %v398_v53, %v398_v53  ;;  %v600_v48 = vld [vmem:[#allocation7 + $0x5e8] sm:$0xff]  ;;  %v8879_v51 = vcombine.high %v595_v45, %v599_v46  ;;  %v603_v53 = vld [vmem:[#allocation7 + $0x600] sm:$0xff]  ;;  %v8878_v59 = vcombine.low %v595_v45, %v599_v46 }
 0x173   :  { %v8881_v52 = vcombine.high %v596_v47, %v600_v48  ;;  %v8880_v60 = vcombine.low %v596_v47, %v600_v48 }
 0x174   :  { %3557 = vmatprep.mubr.bf16.mxu0 %v10484_v54  ;;  %3721 = vmatprep.mubr.bf16.mxu1 %v10484_v54  ;;  %v10492_v63 = vpop.f32.mrb[4].mxu0  ;;  %v10503_v47 = vpop.f32.mrb[4].mxu1 }
 0x175   :  { %3558 = vmatmul.mubr.bf16.vlgmr.msra.gmra.mrb[8].mxu0 %v10486_v55  ;;  %3722 = vmatmul.mubr.bf16.vlgmr.msra.gmra.mrb[8].mxu1 %v10486_v55  ;;  %v10496_v0 = vpop.f32.mrb[5].mxu0 }
 0x176   :  { %3567 = vmatpush1.bf16.msra.mxu0 %v8822_v24  ;;  %3731 = vmatpush1.bf16.msra.mxu1 %v8824_v25  ;;  %v351_v3 = vpop.f32.mrb[6].mxu0  ;;  %v583_v24 = vld [vmem:[#allocation7 + $0x560] sm:$0xff]  ;;  %v580_v25 = vld [vmem:[#allocation7 + $0x548] sm:$0xff] }
 0x177   :  { %3568 = vmatprep.subr.bf16.mxu0 %v8831_v56  ;;  %3732 = vmatprep.subr.bf16.mxu1 %v8833_v57  ;;  %v352_v7 = vpop.f32.mrb[7].mxu0  ;;  %v8863_v34 = vcombine.high %v579_v23, %v583_v24  ;;  %v8865_v35 = vcombine.high %v580_v25, %v584_v26  ;;  %v8862_v41 = vcombine.low %v579_v23, %v583_v24  ;;  %v607_v56 = vld [vmem:[#allocation7 + $0x620] sm:$0xff]  ;;  %v604_v57 = vld [vmem:[#allocation7 + $0x608] sm:$0xff] }
 0x178   :  { %3598 = vmatprep.mubr.bf16.mxu0 %v10490_v62  ;;  %3762 = vmatprep.mubr.bf16.mxu1 %v10490_v62  ;;  %v8864_v42 = vcombine.low %v580_v25, %v584_v26  ;;  %v8887_v61 = vcombine.high %v603_v53, %v607_v56  ;;  %v615_v3 = vld [vmem:[#allocation7 + $0x660] sm:$0xff]  ;;  %v8886_v6 = vcombine.low %v603_v53, %v607_v56  ;;  %v652_v53 = vld [vmem:[#allocation7 + $0x788] sm:$0xff] }
 0x179   :  { %v8888_v7 = vcombine.low %v604_v57, %v608_v58  ;;  %v635_v26 = vld [vmem:[#allocation7 + $0x700] sm:$0xff]  ;;  %v656_v56 = vld [vmem:[#allocation7 + $0x7a8] sm:$0xff] }
 0x17a   :  { %3569 = vmatpush1.bf16.msra.mxu0 %v8830_v1  ;;  %3733 = vmatpush1.bf16.msra.mxu1 %v8832_v2  ;;  %v8889_v1 = vcombine.high %v604_v57, %v608_v58  ;;  %v611_v2 = vld [vmem:[#allocation7 + $0x640] sm:$0xff]  ;;  %v10508_v57 = vsub.s32 5, %v10463_v28 }
 0x17b   :  { %3570 = vmatprep.subr.bf16.mxu0 %v8839_v4  ;;  %3734 = vmatprep.subr.bf16.mxu1 %v8841_v5  ;;  %v612_v4 = vld [vmem:[#allocation7 + $0x648] sm:$0xff]  ;;  %v8895_v8 = vcombine.high %v611_v2, %v615_v3 }
 0x17c   :  { %v616_v5 = vld [vmem:[#allocation7 + $0x668] sm:$0xff] }
 0x17d   :  { %v8897_v9 = vcombine.high %v612_v4, %v616_v5  ;;  %v8896_v15 = vcombine.low %v612_v4, %v616_v5  ;;  %v659_v4 = vld [vmem:[#allocation7 + $0x7c0] sm:$0xff] }
 0x17e   :  { %3571 = vmatpush1.bf16.msra.mxu0 %v8838_v11  ;;  %3735 = vmatpush1.bf16.msra.mxu1 %v8840_v12  ;;  %v623_v11 = vld [vmem:[#allocation7 + $0x6a0] sm:$0xff]  ;;  %v620_v12 = vld [vmem:[#allocation7 + $0x688] sm:$0xff] }
 0x17f   :  { %3572 = vmatprep.subr.bf16.mxu0 %v8847_v13  ;;  %3736 = vmatprep.subr.bf16.mxu1 %v8849_v14  ;;  %v624_v13 = vld [vmem:[#allocation7 + $0x6a8] sm:$0xff]  ;;  %v8894_v14 = vcombine.low %v611_v2, %v615_v3  ;;  %v8903_v16 = vcombine.high %v619_v10, %v623_v11  ;;  %v8937_v3 = vcombine.high %v652_v53, %v656_v56  ;;  %v663_v5 = vld [vmem:[#allocation7 + $0x7e0] sm:$0xff] }
 0x180   :  { %v8905_v17 = vcombine.high %v620_v12, %v624_v13  ;;  %v8904_v23 = vcombine.low %v620_v12, %v624_v13  ;;  %v8943_v12 = vcombine.high %v659_v4, %v663_v5 }
 0x182   :  { %3573 = vmatpush1.bf16.msra.mxu0 %v8846_v19  ;;  %3737 = vmatpush1.bf16.msra.mxu1 %v8848_v20  ;;  %v631_v19 = vld [vmem:[#allocation7 + $0x6e0] sm:$0xff]  ;;  %v628_v20 = vld [vmem:[#allocation7 + $0x6c8] sm:$0xff] }
 0x183   :  { %3574 = vmatprep.subr.bf16.mxu0 %v8855_v21  ;;  %3738 = vmatprep.subr.bf16.mxu1 %v8857_v22  ;;  %v632_v21 = vld [vmem:[#allocation7 + $0x6e8] sm:$0xff]  ;;  %v8902_v22 = vcombine.low %v619_v10, %v623_v11  ;;  %v8911_v24 = vcombine.high %v627_v18, %v631_v19  ;;  %v8936_v11 = vcombine.low %v652_v53, %v656_v56 }
 0x184   :  { %v8913_v25 = vcombine.high %v628_v20, %v632_v21  ;;  %v8912_v36 = vcombine.low %v628_v20, %v632_v21  ;;  %v8942_v20 = vcombine.low %v659_v4, %v663_v5  ;;  %v696_v53 = vld [vmem:[#allocation7 + $0x8e8] sm:$0xff] }
 0x186   :  { %3575 = vmatpush1.bf16.msra.mxu0 %v8854_v27  ;;  %3739 = vmatpush1.bf16.msra.mxu1 %v8856_v33  ;;  %v639_v27 = vld [vmem:[#allocation7 + $0x720] sm:$0xff]  ;;  %v636_v33 = vld [vmem:[#allocation7 + $0x708] sm:$0xff] }
 0x187   :  { %3576 = vmatprep.subr.bf16.mxu0 %v8863_v34  ;;  %3740 = vmatprep.subr.bf16.mxu1 %v8865_v35  ;;  %v640_v34 = vld [vmem:[#allocation7 + $0x728] sm:$0xff]  ;;  %v8910_v35 = vcombine.low %v627_v18, %v631_v19  ;;  %v8919_v37 = vcombine.high %v635_v26, %v639_v27  ;;  %v8918_v45 = vcombine.low %v635_v26, %v639_v27 }
 0x188   :  { %v8921_v38 = vcombine.high %v636_v33, %v640_v34  ;;  %v8920_v46 = vcombine.low %v636_v33, %v640_v34  ;;  %v680_v26 = vld [vmem:[#allocation7 + $0x868] sm:$0xff] }
 0x18a   :  { %3577 = vmatpush1.bf16.msra.mxu0 %v8862_v41  ;;  %3741 = vmatpush1.bf16.msra.mxu1 %v8864_v42  ;;  %v647_v41 = vld [vmem:[#allocation7 + $0x760] sm:$0xff]  ;;  %v644_v42 = vld [vmem:[#allocation7 + $0x748] sm:$0xff] }
 0x18b   :  { %3578 = vmatprep.subr.bf16.mxu0 %v8871_v43  ;;  %3742 = vmatprep.subr.bf16.mxu1 %v8873_v44  ;;  %v648_v43 = vld [vmem:[#allocation7 + $0x768] sm:$0xff]  ;;  %v10501_v44 = vsub.s32 2, %v10463_v28  ;;  %v8927_v48 = vcombine.high %v643_v40, %v647_v41 }
 0x18e   :  { %3579 = vmatpush1.bf16.msra.mxu0 %v8870_v49  ;;  %3743 = vmatpush1.bf16.msra.mxu1 %v8872_v50  ;;  %v8929_v49 = vcombine.high %v644_v42, %v648_v43  ;;  %v651_v50 = vld [vmem:[#allocation7 + $0x780] sm:$0xff] }
 0x18f   :  { %3580 = vmatprep.subr.bf16.mxu0 %v8879_v51  ;;  %3744 = vmatprep.subr.bf16.mxu1 %v8881_v52  ;;  %v10505_v51 = vpop.f32.mrb[5].mxu1  ;;  %v655_v52 = vld [vmem:[#allocation7 + $0x7a0] sm:$0xff] }
 0x190   :  { %v392_v58 = vpop.f32.mrb[6].mxu1  ;;  %v8935_v2 = vcombine.high %v651_v50, %v655_v52  ;;  %v8934_v10 = vcombine.low %v651_v50, %v655_v52  ;;  %v695_v50 = vld [vmem:[#allocation7 + $0x8e0] sm:$0xff]  ;;  %v692_v52 = vld [vmem:[#allocation7 + $0x8c8] sm:$0xff] }
 0x191   :  { %v8976_v5 = vcombine.low %v692_v52, %v696_v53 }
 0x192   :  { %3581 = vmatpush1.bf16.msra.mxu0 %v8878_v59  ;;  %3745 = vmatpush1.bf16.msra.mxu1 %v8880_v60  ;;  %v158_v59 = vrot.slane %v10468_v30, %v10501_v44  ;;  %v393_v60 = vpop.f32.mrb[7].mxu1 }
 0x193   :  { %3582 = vmatprep.subr.bf16.mxu0 %v8887_v61  ;;  %3746 = vmatprep.subr.bf16.mxu1 %v8889_v1  ;;  %v8926_v61 = vcombine.low %v643_v40, %v647_v41  ;;  %v8928_v1 = vcombine.low %v644_v42, %v648_v43  ;;  %v684_v40 = vld [vmem:[#allocation7 + $0x888] sm:$0xff]  ;;  %v8977_v60 = vcombine.high %v692_v52, %v696_v53 }
 0x194   :  { %v688_v41 = vld [vmem:[#allocation7 + $0x8a8] sm:$0xff] }
 0x195   :  { %v8968_v58 = vcombine.low %v684_v40, %v688_v41  ;;  %v744_v52 = vld [vmem:[#allocation7 + $0xa68] sm:$0xff] }
 0x196   :  { %3583 = vmatpush1.bf16.msra.mxu0 %v8886_v6  ;;  %3747 = vmatpush1.bf16.msra.mxu1 %v8888_v7  ;;  %v660_v6 = vld [vmem:[#allocation7 + $0x7c8] sm:$0xff] }
 0x197   :  { %3584 = vmatprep.subr.bf16.mxu0 %v8895_v8  ;;  %3748 = vmatprep.subr.bf16.mxu1 %v8897_v9  ;;  %v664_v7 = vld [vmem:[#allocation7 + $0x7e8] sm:$0xff]  ;;  %v170_v8 = vrot.slane %v10468_v30, %v10508_v57  ;;  %v307_v9 = vadd.f32 %v10482_v39, %v158_v59 }
 0x198   :  { %v8945_v13 = vcombine.high %v660_v6, %v664_v7  ;;  %v8944_v21 = vcombine.low %v660_v6, %v664_v7 }
 0x199   :  { %v350_v18 = vadd.f32 %v10496_v0, %v170_v8  ;;  %v397_v19 = vmax.f32 %v307_v9, 0.0  ;;  %v707_v8 = vld [vmem:[#allocation7 + $0x940] sm:$0xff] }
 0x19a   :  { %3585 = vmatpush1.bf16.msra.mxu0 %v8894_v14  ;;  %3749 = vmatpush1.bf16.msra.mxu1 %v8896_v15  ;;  %v667_v14 = vld [vmem:[#allocation7 + $0x800] sm:$0xff] }
 0x19b   :  { %3586 = vmatprep.subr.bf16.mxu0 %v8903_v16  ;;  %3750 = vmatprep.subr.bf16.mxu1 %v8905_v17  ;;  %v671_v15 = vld [vmem:[#allocation7 + $0x820] sm:$0xff]  ;;  %v668_v16 = vld [vmem:[#allocation7 + $0x808] sm:$0xff]  ;;  %v400_v27 = vmax.f32 %v350_v18, 0.0  ;;  %v10516_v33 = vpack.c.bf16 %v397_v19, %v397_v19 }
 0x19c   :  { %v672_v17 = vld [vmem:[#allocation7 + $0x828] sm:$0xff]  ;;  %v8951_v39 = vcombine.high %v667_v14, %v671_v15  ;;  %v8950_v34 = vcombine.low %v667_v14, %v671_v15  ;;  %v711_v9 = vld [vmem:[#allocation7 + $0x960] sm:$0xff] }
 0x19d   :  { %v8952_v0 = vcombine.low %v668_v16, %v672_v17  ;;  %v10518_v42 = vpack.c.bf16 %v400_v27, %v400_v27  ;;  %v8991_v14 = vcombine.high %v707_v8, %v711_v9  ;;  %v716_v18 = vld [vmem:[#allocation7 + $0x988] sm:$0xff] }
 0x19e   :  { %3587 = vmatpush1.bf16.msra.mxu0 %v8902_v22  ;;  %3751 = vmatpush1.bf16.msra.mxu1 %v8904_v23  ;;  %v8953_v22 = vcombine.high %v668_v16, %v672_v17  ;;  %v675_v23 = vld [vmem:[#allocation7 + $0x840] sm:$0xff]  ;;  %v720_v19 = vld [vmem:[#allocation7 + $0x9a8] sm:$0xff] }
 0x19f   :  { %3588 = vmatprep.subr.bf16.mxu0 %v8911_v24  ;;  %3752 = vmatprep.subr.bf16.mxu1 %v8913_v25  ;;  %v679_v24 = vld [vmem:[#allocation7 + $0x860] sm:$0xff]  ;;  %v676_v25 = vld [vmem:[#allocation7 + $0x848] sm:$0xff] }
 0x1a0   :  { %v8958_v43 = vcombine.low %v675_v23, %v679_v24  ;;  %v715_v16 = vld [vmem:[#allocation7 + $0x980] sm:$0xff] }
 0x1a1   :  { %v719_v17 = vld [vmem:[#allocation7 + $0x9a0] sm:$0xff] }
 0x1a2   :  { %3589 = vmatpush1.bf16.msra.mxu0 %v8910_v35  ;;  %3753 = vmatpush1.bf16.msra.mxu1 %v8912_v36  ;;  %v8959_v35 = vcombine.high %v675_v23, %v679_v24  ;;  %v8961_v36 = vcombine.high %v676_v25, %v680_v26  ;;  %v723_v23 = vld [vmem:[#allocation7 + $0x9c0] sm:$0xff]  ;;  %v8998_v27 = vcombine.low %v715_v16, %v719_v17 }
 0x1a3   :  { %3590 = vmatprep.subr.bf16.mxu0 %v8919_v37  ;;  %3754 = vmatprep.subr.bf16.mxu1 %v8921_v38  ;;  %v683_v37 = vld [vmem:[#allocation7 + $0x880] sm:$0xff] }
 0x1a4   :  { %v687_v38 = vld [vmem:[#allocation7 + $0x8a0] sm:$0xff] }
 0x1a5   :  { %v8966_v56 = vcombine.low %v683_v37, %v687_v38  ;;  %v727_v24 = vld [vmem:[#allocation7 + $0x9e0] sm:$0xff] }
 0x1a6   :  { %3591 = vmatpush1.bf16.msra.mxu0 %v8918_v45  ;;  %3755 = vmatpush1.bf16.msra.mxu1 %v8920_v46  ;;  %v8960_v45 = vcombine.low %v676_v25, %v680_v26  ;;  %v8967_v46 = vcombine.high %v683_v37, %v687_v38  ;;  %v724_v25 = vld [vmem:[#allocation7 + $0x9c8] sm:$0xff]  ;;  %v735_v37 = vld [vmem:[#allocation7 + $0xa20] sm:$0xff] }
 0x1a7   :  { %3592 = vmatprep.subr.bf16.mxu0 %v8927_v48  ;;  %3756 = vmatprep.subr.bf16.mxu1 %v8929_v49  ;;  %v8969_v48 = vcombine.high %v684_v40, %v688_v41  ;;  %v691_v49 = vld [vmem:[#allocation7 + $0x8c0] sm:$0xff]  ;;  %v728_v26 = vld [vmem:[#allocation7 + $0x9e8] sm:$0xff]  ;;  %v9006_v41 = vcombine.low %v723_v23, %v727_v24 }
 0x1a8   :  { %v8975_v59 = vcombine.high %v691_v49, %v695_v50  ;;  %v8974_v4 = vcombine.low %v691_v49, %v695_v50  ;;  %v732_v38 = vld [vmem:[#allocation7 + $0xa08] sm:$0xff]  ;;  %v743_v49 = vld [vmem:[#allocation7 + $0xa60] sm:$0xff] }
 0x1a9   :  { %v736_v40 = vld [vmem:[#allocation7 + $0xa28] sm:$0xff] }
 0x1aa   :  { %3593 = vmatpush1.bf16.msra.mxu0 %v8926_v61  ;;  %3757 = vmatpush1.bf16.msra.mxu1 %v8928_v1  ;;  %v699_v61 = vld [vmem:[#allocation7 + $0x900] sm:$0xff]  ;;  %v740_v50 = vld [vmem:[#allocation7 + $0xa48] sm:$0xff] }
 0x1ab   :  { %3594 = vmatprep.subr.bf16.mxu0 %v8935_v2  ;;  %3758 = vmatprep.subr.bf16.mxu1 %v8937_v3  ;;  %v703_v1 = vld [vmem:[#allocation7 + $0x920] sm:$0xff]  ;;  %v700_v2 = vld [vmem:[#allocation7 + $0x908] sm:$0xff] }
 0x1ac   :  { %v704_v3 = vld [vmem:[#allocation7 + $0x928] sm:$0xff]  ;;  %v8983_v6 = vcombine.high %v699_v61, %v703_v1 }
 0x1ad   :  { %v8985_v7 = vcombine.high %v700_v2, %v704_v3 }
 0x1ae   :  { %3595 = vmatpush1.bf16.msra.mxu0 %v8934_v10  ;;  %3759 = vmatpush1.bf16.msra.mxu1 %v8936_v11  ;;  %v708_v10 = vld [vmem:[#allocation7 + $0x948] sm:$0xff] }
 0x1af   :  { %3596 = vmatprep.subr.bf16.mxu0 %v8943_v12  ;;  %3760 = vmatprep.subr.bf16.mxu1 %v8945_v13  ;;  %v712_v11 = vld [vmem:[#allocation7 + $0x968] sm:$0xff]  ;;  %v8982_v12 = vcombine.low %v699_v61, %v703_v1  ;;  %v8984_v13 = vcombine.low %v700_v2, %v704_v3  ;;  %v751_v61 = vld [vmem:[#allocation7 + $0xaa0] sm:$0xff] }
 0x1b0   :  { %v8993_v15 = vcombine.high %v708_v10, %v712_v11  ;;  %v748_v1 = vld [vmem:[#allocation7 + $0xa88] sm:$0xff] }
 0x1b1   :  { %v752_v2 = vld [vmem:[#allocation7 + $0xaa8] sm:$0xff] }
 0x1b2   :  { %3597 = vmatpush1.bf16.msra.mxu0 %v8942_v20  ;;  %3761 = vmatpush1.bf16.msra.mxu1 %v8944_v21  ;;  %v8990_v20 = vcombine.low %v707_v8, %v711_v9  ;;  %v8992_v21 = vcombine.low %v708_v10, %v712_v11  ;;  %v759_v8 = vld [vmem:[#allocation7 + $0xae0] sm:$0xff]  ;;  %v756_v9 = vld [vmem:[#allocation7 + $0xac8] sm:$0xff] }
 0x1b3   :  { %3607 = vmatprep.subr.bf16.mxu0 %v8951_v39  ;;  %3771 = vmatprep.subr.bf16.mxu1 %v8953_v22  ;;  %v8999_v39 = vcombine.high %v715_v16, %v719_v17  ;;  %v9001_v22 = vcombine.high %v716_v18, %v720_v19  ;;  %v760_v10 = vld [vmem:[#allocation7 + $0xae8] sm:$0xff]  ;;  %v767_v16 = vld [vmem:[#allocation7 + $0xb20] sm:$0xff] }
 0x1b4   :  { %v764_v17 = vld [vmem:[#allocation7 + $0xb08] sm:$0xff] }
 0x1b5   :  { %3599 = vmatmul.mubr.bf16.vlgmr.msra.gmra.mrb[8].mxu0 %v10516_v33  ;;  %3763 = vmatmul.mubr.bf16.vlgmr.msra.gmra.mrb[8].mxu1 %v10516_v33 }
 0x1b6   :  { %3608 = vmatpush1.bf16.msra.mxu0 %v8950_v34  ;;  %3772 = vmatpush1.bf16.msra.mxu1 %v8952_v0  ;;  %v9000_v34 = vcombine.low %v716_v18, %v720_v19  ;;  %v9007_v0 = vcombine.high %v723_v23, %v727_v24  ;;  %v768_v18 = vld [vmem:[#allocation7 + $0xb28] sm:$0xff]  ;;  %v775_v23 = vld [vmem:[#allocation7 + $0xb60] sm:$0xff] }
 0x1b7   :  { %3609 = vmatprep.subr.bf16.mxu0 %v8959_v35  ;;  %3773 = vmatprep.subr.bf16.mxu1 %v8961_v36  ;;  %v9009_v35 = vcombine.high %v724_v25, %v728_v26  ;;  %v731_v36 = vld [vmem:[#allocation7 + $0xa00] sm:$0xff]  ;;  %v772_v24 = vld [vmem:[#allocation7 + $0xb48] sm:$0xff] }
 0x1b8   :  { %3639 = vmatprep.mubr.bf16.mxu0 %v10518_v42  ;;  %3803 = vmatprep.mubr.bf16.mxu1 %v10518_v42  ;;  %v9014_v53 = vcombine.low %v731_v36, %v735_v37 }
 0x1ba   :  { %3610 = vmatpush1.bf16.msra.mxu0 %v8958_v43  ;;  %3774 = vmatpush1.bf16.msra.mxu1 %v8960_v45  ;;  %v9008_v43 = vcombine.low %v724_v25, %v728_v26  ;;  %v9015_v45 = vcombine.high %v731_v36, %v735_v37  ;;  %v776_v25 = vld [vmem:[#allocation7 + $0xb68] sm:$0xff]  ;;  %v10525_v26 = vsub.s32 4, %v10463_v28  ;;  %v779_v36 = vld [vmem:[#allocation7 + $0xb80] sm:$0xff] }
 0x1bb   :  { %3611 = vmatprep.subr.bf16.mxu0 %v8967_v46  ;;  %3775 = vmatprep.subr.bf16.mxu1 %v8969_v48  ;;  %v9017_v46 = vcombine.high %v732_v38, %v736_v40  ;;  %v739_v48 = vld [vmem:[#allocation7 + $0xa40] sm:$0xff] }
 0x1bc   :  { %v9022_v3 = vcombine.low %v739_v48, %v743_v49  ;;  %v783_v37 = vld [vmem:[#allocation7 + $0xba0] sm:$0xff] }
 0x1be   :  { %3612 = vmatpush1.bf16.msra.mxu0 %v8966_v56  ;;  %3776 = vmatpush1.bf16.msra.mxu1 %v8968_v58  ;;  %v9016_v56 = vcombine.low %v732_v38, %v736_v40  ;;  %v9023_v58 = vcombine.high %v739_v48, %v743_v49  ;;  %v780_v38 = vld [vmem:[#allocation7 + $0xb88] sm:$0xff]  ;;  %v9063_v48 = vcombine.high %v779_v36, %v783_v37 }
 0x1bf   :  { %3613 = vmatprep.subr.bf16.mxu0 %v8975_v59  ;;  %3777 = vmatprep.subr.bf16.mxu1 %v8977_v60  ;;  %v9025_v59 = vcombine.high %v740_v50, %v744_v52  ;;  %v747_v60 = vld [vmem:[#allocation7 + $0xa80] sm:$0xff]  ;;  %v784_v40 = vld [vmem:[#allocation7 + $0xba8] sm:$0xff] }
 0x1c0   :  { %v9030_v11 = vcombine.low %v747_v60, %v751_v61  ;;  %v9065_v49 = vcombine.high %v780_v38, %v784_v40 }
 0x1c2   :  { %3614 = vmatpush1.bf16.msra.mxu0 %v8974_v4  ;;  %3778 = vmatpush1.bf16.msra.mxu1 %v8976_v5  ;;  %v9024_v4 = vcombine.low %v740_v50, %v744_v52  ;;  %v9031_v5 = vcombine.high %v747_v60, %v751_v61  ;;  %v787_v50 = vld [vmem:[#allocation7 + $0xbc0] sm:$0xff]  ;;  %v9062_v60 = vcombine.low %v779_v36, %v783_v37  ;;  %v820_v36 = vld [vmem:[#allocation7 + $0xcc8] sm:$0xff] }
 0x1c3   :  { %3615 = vmatprep.subr.bf16.mxu0 %v8983_v6  ;;  %3779 = vmatprep.subr.bf16.mxu1 %v8985_v7  ;;  %v9033_v6 = vcombine.high %v748_v1, %v752_v2  ;;  %v755_v7 = vld [vmem:[#allocation7 + $0xac0] sm:$0xff]  ;;  %v9064_v61 = vcombine.low %v780_v38, %v784_v40  ;;  %v824_v37 = vld [vmem:[#allocation7 + $0xce8] sm:$0xff] }
 0x1c4   :  { %v9038_v19 = vcombine.low %v755_v7, %v759_v8  ;;  %v791_v52 = vld [vmem:[#allocation7 + $0xbe0] sm:$0xff] }
 0x1c6   :  { %3616 = vmatpush1.bf16.msra.mxu0 %v8982_v12  ;;  %3780 = vmatpush1.bf16.msra.mxu1 %v8984_v13  ;;  %v9032_v12 = vcombine.low %v748_v1, %v752_v2  ;;  %v9039_v13 = vcombine.high %v755_v7, %v759_v8  ;;  %v9071_v1 = vcombine.high %v787_v50, %v791_v52 }
 0x1c7   :  { %3617 = vmatprep.subr.bf16.mxu0 %v8991_v14  ;;  %3781 = vmatprep.subr.bf16.mxu1 %v8993_v15  ;;  %v9041_v14 = vcombine.high %v756_v9, %v760_v10  ;;  %v763_v15 = vld [vmem:[#allocation7 + $0xb00] sm:$0xff] }
 0x1ca   :  { %3618 = vmatpush1.bf16.msra.mxu0 %v8990_v20  ;;  %3782 = vmatpush1.bf16.msra.mxu1 %v8992_v21  ;;  %v9040_v20 = vcombine.low %v756_v9, %v760_v10  ;;  %v9047_v21 = vcombine.high %v763_v15, %v767_v16 }
 0x1cb   :  { %3619 = vmatprep.subr.bf16.mxu0 %v8999_v39  ;;  %3783 = vmatprep.subr.bf16.mxu1 %v9001_v22  ;;  %v9049_v39 = vcombine.high %v764_v17, %v768_v18  ;;  %v771_v22 = vld [vmem:[#allocation7 + $0xb40] sm:$0xff] }
 0x1ce   :  { %3620 = vmatpush1.bf16.msra.mxu0 %v8998_v27  ;;  %3784 = vmatpush1.bf16.msra.mxu1 %v9000_v34  ;;  %v9046_v27 = vcombine.low %v763_v15, %v767_v16  ;;  %v9048_v34 = vcombine.low %v764_v17, %v768_v18 }
 0x1cf   :  { %3621 = vmatprep.subr.bf16.mxu0 %v9007_v0  ;;  %3785 = vmatprep.subr.bf16.mxu1 %v9009_v35  ;;  %v9055_v0 = vcombine.high %v771_v22, %v775_v23  ;;  %v9057_v35 = vcombine.high %v772_v24, %v776_v25 }
 0x1d2   :  { %3622 = vmatpush1.bf16.msra.mxu0 %v9006_v41  ;;  %3786 = vmatpush1.bf16.msra.mxu1 %v9008_v43  ;;  %v10528_v41 = vsub.s32 7, %v10463_v28  ;;  %v166_v43 = vrot.slane %v10468_v30, %v10525_v26 }
 0x1d3   :  { %3623 = vmatprep.subr.bf16.mxu0 %v9015_v45  ;;  %3787 = vmatprep.subr.bf16.mxu1 %v9017_v46  ;;  %v9054_v45 = vcombine.low %v771_v22, %v775_v23  ;;  %v9056_v46 = vcombine.low %v772_v24, %v776_v25  ;;  %v816_v22 = vld [vmem:[#allocation7 + $0xca8] sm:$0xff] }
 0x1d6   :  { %3624 = vmatpush1.bf16.msra.mxu0 %v9014_v53  ;;  %3788 = vmatpush1.bf16.msra.mxu1 %v9016_v56  ;;  %v788_v53 = vld [vmem:[#allocation7 + $0xbc8] sm:$0xff] }
 0x1d7   :  { %3625 = vmatprep.subr.bf16.mxu0 %v9023_v58  ;;  %3789 = vmatprep.subr.bf16.mxu1 %v9025_v59  ;;  %v792_v56 = vld [vmem:[#allocation7 + $0xbe8] sm:$0xff]  ;;  %v178_v58 = vrot.slane %v10468_v30, %v10528_v41  ;;  %v348_v59 = vadd.f32 %v10492_v63, %v166_v43  ;;  %v9070_v30 = vcombine.low %v787_v50, %v791_v52 }
 0x1d8   :  { %v9073_v2 = vcombine.high %v788_v53, %v792_v56  ;;  %v9072_v9 = vcombine.low %v788_v53, %v792_v56  ;;  %v832_v50 = vld [vmem:[#allocation7 + $0xd28] sm:$0xff]  ;;  %v9104_v53 = vcombine.low %v820_v36, %v824_v37 }
 0x1d9   :  { %v391_v7 = vadd.f32 %v10505_v51, %v178_v58  ;;  %v399_v8 = vmax.f32 %v348_v59, 0.0  ;;  %v835_v59 = vld [vmem:[#allocation7 + $0xd40] sm:$0xff] }
 0x1da   :  { %3626 = vmatpush1.bf16.msra.mxu0 %v9022_v3  ;;  %3790 = vmatpush1.bf16.msra.mxu1 %v9024_v4  ;;  %v795_v3 = vld [vmem:[#allocation7 + $0xc00] sm:$0xff] }
 0x1db   :  { %3627 = vmatprep.subr.bf16.mxu0 %v9031_v5  ;;  %3791 = vmatprep.subr.bf16.mxu1 %v9033_v6  ;;  %v799_v4 = vld [vmem:[#allocation7 + $0xc20] sm:$0xff]  ;;  %v796_v5 = vld [vmem:[#allocation7 + $0xc08] sm:$0xff]  ;;  %v402_v15 = vmax.f32 %v391_v7, 0.0  ;;  %v10536_v16 = vpack.c.bf16 %v399_v8, %v399_v8 }
 0x1dc   :  { %v800_v6 = vld [vmem:[#allocation7 + $0xc28] sm:$0xff]  ;;  %v9079_v63 = vcombine.high %v795_v3, %v799_v4  ;;  %v9078_v17 = vcombine.low %v795_v3, %v799_v4  ;;  %v847_v7 = vld [vmem:[#allocation7 + $0xda0] sm:$0xff] }
 0x1dd   :  { %v9081_v10 = vcombine.high %v796_v5, %v800_v6  ;;  %v9080_v51 = vcombine.low %v796_v5, %v800_v6  ;;  %v10538_v23 = vpack.c.bf16 %v402_v15, %v402_v15  ;;  %v843_v6 = vld [vmem:[#allocation7 + $0xd80] sm:$0xff]  ;;  %v844_v8 = vld [vmem:[#allocation7 + $0xd88] sm:$0xff] }
 0x1de   :  { %3628 = vmatpush1.bf16.msra.mxu0 %v9030_v11  ;;  %3792 = vmatpush1.bf16.msra.mxu1 %v9032_v12  ;;  %v803_v11 = vld [vmem:[#allocation7 + $0xc40] sm:$0xff]  ;;  %v856_v15 = vld [vmem:[#allocation7 + $0xde8] sm:$0xff] }
 0x1df   :  { %3629 = vmatprep.subr.bf16.mxu0 %v9039_v13  ;;  %3793 = vmatprep.subr.bf16.mxu1 %v9041_v14  ;;  %v807_v12 = vld [vmem:[#allocation7 + $0xc60] sm:$0xff]  ;;  %v804_v13 = vld [vmem:[#allocation7 + $0xc48] sm:$0xff] }
 0x1e0   :  { %v808_v14 = vld [vmem:[#allocation7 + $0xc68] sm:$0xff]  ;;  %v9087_v18 = vcombine.high %v803_v11, %v807_v12  ;;  %v9086_v24 = vcombine.low %v803_v11, %v807_v12  ;;  %v851_v12 = vld [vmem:[#allocation7 + $0xdc0] sm:$0xff] }
 0x1e1   :  { %v9088_v25 = vcombine.low %v804_v13, %v808_v14 }
 0x1e2   :  { %3630 = vmatpush1.bf16.msra.mxu0 %v9038_v19  ;;  %3794 = vmatpush1.bf16.msra.mxu1 %v9040_v20  ;;  %v9089_v19 = vcombine.high %v804_v13, %v808_v14  ;;  %v811_v20 = vld [vmem:[#allocation7 + $0xc80] sm:$0xff]  ;;  %v852_v14 = vld [vmem:[#allocation7 + $0xdc8] sm:$0xff] }
 0x1e3   :  { %3631 = vmatprep.subr.bf16.mxu0 %v9047_v21  ;;  %3795 = vmatprep.subr.bf16.mxu1 %v9049_v39  ;;  %v815_v21 = vld [vmem:[#allocation7 + $0xca0] sm:$0xff]  ;;  %v812_v39 = vld [vmem:[#allocation7 + $0xc88] sm:$0xff] }
 0x1e4   :  { %v9094_v38 = vcombine.low %v811_v20, %v815_v21  ;;  %v9096_v40 = vcombine.low %v812_v39, %v816_v22  ;;  %v855_v13 = vld [vmem:[#allocation7 + $0xde0] sm:$0xff] }
 0x1e6   :  { %3632 = vmatpush1.bf16.msra.mxu0 %v9046_v27  ;;  %3796 = vmatpush1.bf16.msra.mxu1 %v9048_v34  ;;  %v9095_v27 = vcombine.high %v811_v20, %v815_v21  ;;  %v9097_v34 = vcombine.high %v812_v39, %v816_v22  ;;  %v859_v20 = vld [vmem:[#allocation7 + $0xe00] sm:$0xff]  ;;  %v860_v39 = vld [vmem:[#allocation7 + $0xe08] sm:$0xff] }
 0x1e7   :  { %3633 = vmatprep.subr.bf16.mxu0 %v9055_v0  ;;  %3797 = vmatprep.subr.bf16.mxu1 %v9057_v35  ;;  %v819_v0 = vld [vmem:[#allocation7 + $0xcc0] sm:$0xff]  ;;  %v864_v22 = vld [vmem:[#allocation7 + $0xe28] sm:$0xff] }
 0x1e8   :  { %v823_v35 = vld [vmem:[#allocation7 + $0xce0] sm:$0xff] }
 0x1e9   :  { %v9103_v43 = vcombine.high %v819_v0, %v823_v35  ;;  %v9102_v52 = vcombine.low %v819_v0, %v823_v35  ;;  %v863_v21 = vld [vmem:[#allocation7 + $0xe20] sm:$0xff] }
 0x1ea   :  { %3634 = vmatpush1.bf16.msra.mxu0 %v9054_v45  ;;  %3798 = vmatpush1.bf16.msra.mxu1 %v9056_v46  ;;  %v9105_v45 = vcombine.high %v820_v36, %v824_v37  ;;  %v827_v46 = vld [vmem:[#allocation7 + $0xd00] sm:$0xff]  ;;  %v868_v36 = vld [vmem:[#allocation7 + $0xe48] sm:$0xff] }
 0x1eb   :  { %3635 = vmatprep.subr.bf16.mxu0 %v9063_v48  ;;  %3799 = vmatprep.subr.bf16.mxu1 %v9065_v49  ;;  %v831_v48 = vld [vmem:[#allocation7 + $0xd20] sm:$0xff]  ;;  %v828_v49 = vld [vmem:[#allocation7 + $0xd08] sm:$0xff] }
 0x1ec   :  { %v9111_v56 = vcombine.high %v827_v46, %v831_v48  ;;  %v9113_v58 = vcombine.high %v828_v49, %v832_v50  ;;  %v9112_v3 = vcombine.low %v828_v49, %v832_v50  ;;  %v867_v0 = vld [vmem:[#allocation7 + $0xe40] sm:$0xff]  ;;  %v872_v37 = vld [vmem:[#allocation7 + $0xe68] sm:$0xff] }
 0x1ed   :  { %v871_v35 = vld [vmem:[#allocation7 + $0xe60] sm:$0xff]  ;;  %v876_v49 = vld [vmem:[#allocation7 + $0xe88] sm:$0xff] }
 0x1ee   :  { %3636 = vmatpush1.bf16.msra.mxu0 %v9062_v60  ;;  %3800 = vmatpush1.bf16.msra.mxu1 %v9064_v61  ;;  %v839_v60 = vld [vmem:[#allocation7 + $0xd60] sm:$0xff]  ;;  %v836_v61 = vld [vmem:[#allocation7 + $0xd48] sm:$0xff] }
 0x1ef   :  { %3637 = vmatprep.subr.bf16.mxu0 %v9071_v1  ;;  %3801 = vmatprep.subr.bf16.mxu1 %v9073_v2  ;;  %v840_v1 = vld [vmem:[#allocation7 + $0xd68] sm:$0xff]  ;;  %v9110_v2 = vcombine.low %v827_v46, %v831_v48  ;;  %v9119_v4 = vcombine.high %v835_v59, %v839_v60  ;;  %v875_v46 = vld [vmem:[#allocation7 + $0xe80] sm:$0xff] }
 0x1f0   :  { %v9121_v5 = vcombine.high %v836_v61, %v840_v1  ;;  %v879_v48 = vld [vmem:[#allocation7 + $0xea0] sm:$0xff]  ;;  %v880_v50 = vld [vmem:[#allocation7 + $0xea8] sm:$0xff] }
 0x1f2   :  { %3638 = vmatpush1.bf16.msra.mxu0 %v9070_v30  ;;  %3802 = vmatpush1.bf16.msra.mxu1 %v9072_v9  ;;  %v848_v30 = vld [vmem:[#allocation7 + $0xda8] sm:$0xff]  ;;  %v9118_v9 = vcombine.low %v835_v59, %v839_v60  ;;  %v883_v59 = vld [vmem:[#allocation7 + $0xec0] sm:$0xff] }
 0x1f3   :  { %3648 = vmatprep.subr.bf16.mxu0 %v9079_v63  ;;  %3812 = vmatprep.subr.bf16.mxu1 %v9081_v10  ;;  %v9120_v63 = vcombine.low %v836_v61, %v840_v1  ;;  %v9127_v10 = vcombine.high %v843_v6, %v847_v7  ;;  %v9129_v11 = vcombine.high %v844_v8, %v848_v30  ;;  %v887_v60 = vld [vmem:[#allocation7 + $0xee0] sm:$0xff]  ;;  %v884_v61 = vld [vmem:[#allocation7 + $0xec8] sm:$0xff] }
 0x1f4   :  { %v888_v1 = vld [vmem:[#allocation7 + $0xee8] sm:$0xff] }
 0x1f5   :  { %3640 = vmatmul.mubr.bf16.vlgmr.msra.gmra.mrb[8].mxu0 %v10536_v16  ;;  %3804 = vmatmul.mubr.bf16.vlgmr.msra.gmra.mrb[8].mxu1 %v10536_v16 }
 0x1f6   :  { %3649 = vmatpush1.bf16.msra.mxu0 %v9078_v17  ;;  %3813 = vmatpush1.bf16.msra.mxu1 %v9080_v51  ;;  %v9126_v17 = vcombine.low %v843_v6, %v847_v7  ;;  %v9128_v51 = vcombine.low %v844_v8, %v848_v30  ;;  %v891_v6 = vld [vmem:[#allocation7 + $0xf00] sm:$0xff]  ;;  %v892_v8 = vld [vmem:[#allocation7 + $0xf08] sm:$0xff] }
 0x1f7   :  { %3650 = vmatprep.subr.bf16.mxu0 %v9087_v18  ;;  %3814 = vmatprep.subr.bf16.mxu1 %v9089_v19  ;;  %v9135_v18 = vcombine.high %v851_v12, %v855_v13  ;;  %v9137_v19 = vcombine.high %v852_v14, %v856_v15  ;;  %v895_v7 = vld [vmem:[#allocation7 + $0xf20] sm:$0xff]  ;;  %v896_v30 = vld [vmem:[#allocation7 + $0xf28] sm:$0xff] }
 0x1f8   :  { %3680 = vmatprep.mubr.bf16.mxu0 %v10538_v23  ;;  %3844 = vmatprep.mubr.bf16.mxu1 %v10538_v23 }
 0x1fa   :  { %3651 = vmatpush1.bf16.msra.mxu0 %v9086_v24  ;;  %3815 = vmatpush1.bf16.msra.mxu1 %v9088_v25  ;;  %v9134_v24 = vcombine.low %v851_v12, %v855_v13  ;;  %v9136_v25 = vcombine.low %v852_v14, %v856_v15  ;;  %v899_v12 = vld [vmem:[#allocation7 + $0xf40] sm:$0xff]  ;;  %v900_v14 = vld [vmem:[#allocation7 + $0xf48] sm:$0xff] }
 0x1fb   :  { %3652 = vmatprep.subr.bf16.mxu0 %v9095_v27  ;;  %3816 = vmatprep.subr.bf16.mxu1 %v9097_v34  ;;  %v9143_v27 = vcombine.high %v859_v20, %v863_v21  ;;  %v9145_v34 = vcombine.high %v860_v39, %v864_v22  ;;  %v903_v13 = vld [vmem:[#allocation7 + $0xf60] sm:$0xff]  ;;  %v904_v15 = vld [vmem:[#allocation7 + $0xf68] sm:$0xff] }
 0x1fe   :  { %3653 = vmatpush1.bf16.msra.mxu0 %v9094_v38  ;;  %3817 = vmatpush1.bf16.msra.mxu1 %v9096_v40  ;;  %v9142_v38 = vcombine.low %v859_v20, %v863_v21  ;;  %v9144_v40 = vcombine.low %v860_v39, %v864_v22  ;;  %v9185_v20 = vcombine.high %v900_v14, %v904_v15  ;;  %v907_v21 = vld [vmem:[#allocation7 + $0xf80] sm:$0xff]  ;;  %v908_v22 = vld [vmem:[#allocation7 + $0xf88] sm:$0xff] }
 0x1ff   :  { %3654 = vmatprep.subr.bf16.mxu0 %v9103_v43  ;;  %3818 = vmatprep.subr.bf16.mxu1 %v9105_v45  ;;  %v9151_v43 = vcombine.high %v867_v0, %v871_v35  ;;  %v9153_v45 = vcombine.high %v868_v36, %v872_v37  ;;  %v911_v39 = vld [vmem:[#allocation7 + $0xfa0] sm:$0xff] }
 0x202   :  { %3655 = vmatpush1.bf16.msra.mxu0 %v9102_v52  ;;  %3819 = vmatpush1.bf16.msra.mxu1 %v9104_v53  ;;  %v9150_v52 = vcombine.low %v867_v0, %v871_v35  ;;  %v9152_v53 = vcombine.low %v868_v36, %v872_v37  ;;  %v9191_v35 = vcombine.high %v907_v21, %v911_v39  ;;  %v915_v36 = vld [vmem:[#allocation7 + $0xfc0] sm:$0xff] }
 0x203   :  { %3656 = vmatprep.subr.bf16.mxu0 %v9111_v56  ;;  %3820 = vmatprep.subr.bf16.mxu1 %v9113_v58  ;;  %v9159_v56 = vcombine.high %v875_v46, %v879_v48  ;;  %v9161_v58 = vcombine.high %v876_v49, %v880_v50  ;;  %v919_v37 = vld [vmem:[#allocation7 + $0xfe0] sm:$0xff] }
 0x206   :  { %3657 = vmatpush1.bf16.msra.mxu0 %v9110_v2  ;;  %3821 = vmatpush1.bf16.msra.mxu1 %v9112_v3  ;;  %v9158_v2 = vcombine.low %v875_v46, %v879_v48  ;;  %v9160_v3 = vcombine.low %v876_v49, %v880_v50  ;;  %v9199_v48 = vcombine.high %v915_v36, %v919_v37  ;;  %v413_v50 = vld [vmem:[#allocation7 + $0x10] sm:$0xff] }
 0x207   :  { %3658 = vmatprep.subr.bf16.mxu0 %v9119_v4  ;;  %3822 = vmatprep.subr.bf16.mxu1 %v9121_v5  ;;  %v9167_v4 = vcombine.high %v883_v59, %v887_v60  ;;  %v9169_v5 = vcombine.high %v884_v61, %v888_v1 }
 0x20a   :  { %3659 = vmatpush1.bf16.msra.mxu0 %v9118_v9  ;;  %3823 = vmatpush1.bf16.msra.mxu1 %v9120_v63  ;;  %v9166_v9 = vcombine.low %v883_v59, %v887_v60  ;;  %v9168_v63 = vcombine.low %v884_v61, %v888_v1 }
 0x20b   :  { %3660 = vmatprep.subr.bf16.mxu0 %v9127_v10  ;;  %3824 = vmatprep.subr.bf16.mxu1 %v9129_v11  ;;  %v9175_v10 = vcombine.high %v891_v6, %v895_v7  ;;  %v9177_v11 = vcombine.high %v892_v8, %v896_v30 }
 0x20e   :  { %3661 = vmatpush1.bf16.msra.mxu0 %v9126_v17  ;;  %3825 = vmatpush1.bf16.msra.mxu1 %v9128_v51  ;;  %v9174_v17 = vcombine.low %v891_v6, %v895_v7  ;;  %v9176_v51 = vcombine.low %v892_v8, %v896_v30 }
 0x20f   :  { %3662 = vmatprep.subr.bf16.mxu0 %v9135_v18  ;;  %3826 = vmatprep.subr.bf16.mxu1 %v9137_v19  ;;  %v10545_v18 = vsub.s32 6, %v10463_v28  ;;  %v9183_v19 = vcombine.high %v899_v12, %v903_v13 }
 0x212   :  { %3663 = vmatpush1.bf16.msra.mxu0 %v9134_v24  ;;  %3827 = vmatpush1.bf16.msra.mxu1 %v9136_v25  ;;  %v912_v24 = vld [vmem:[#allocation7 + $0xfa8] sm:$0xff]  ;;  %v9182_v25 = vcombine.low %v899_v12, %v903_v13 }
 0x213   :  { %3664 = vmatprep.subr.bf16.mxu0 %v9143_v27  ;;  %3828 = vmatprep.subr.bf16.mxu1 %v9145_v34  ;;  %v9184_v27 = vcombine.low %v900_v14, %v904_v15  ;;  %v10061_v34 = vld [vmem:[#allocation5] sm:$0xff]  ;;  %v9193_v28 = vcombine.high %v908_v22, %v912_v24 }
 0x214   :  { %v174_v0 = vrot.slane %v10061_v34, %v10545_v18  ;;  %v450_v34 = vld [vmem:[#allocation7 + $0x138] sm:$0xff] }
 0x216   :  { %3665 = vmatpush1.bf16.msra.mxu0 %v9142_v38  ;;  %3829 = vmatpush1.bf16.msra.mxu1 %v9144_v40  ;;  %v916_v38 = vld [vmem:[#allocation7 + $0xfc8] sm:$0xff]  ;;  %v389_v46 = vadd.f32 %v10503_v47, %v174_v0  ;;  %v422_v47 = vld [vmem:[#allocation7 + $0x58] sm:$0xff] }
 0x217   :  { %3666 = vmatprep.subr.bf16.mxu0 %v9151_v43  ;;  %3830 = vmatprep.subr.bf16.mxu1 %v9153_v45  ;;  %v920_v40 = vld [vmem:[#allocation7 + $0xfe8] sm:$0xff]  ;;  %v9190_v43 = vcombine.low %v907_v21, %v911_v39  ;;  %v9192_v45 = vcombine.low %v908_v22, %v912_v24 }
 0x218   :  { %v9201_v49 = vcombine.high %v916_v38, %v920_v40  ;;  %v9200_v59 = vcombine.low %v916_v38, %v920_v40  ;;  %v401_v60 = vmax.f32 %v389_v46, 0.0  ;;  %v457_v38 = vld [vmem:[#allocation7 + $0x170] sm:$0xff]  ;;  %v454_v40 = vld [vmem:[#allocation7 + $0x158] sm:$0xff] }
 0x21a   :  { %3667 = vmatpush1.bf16.msra.mxu0 %v9150_v52  ;;  %3831 = vmatpush1.bf16.msra.mxu1 %v9152_v53  ;;  %v417_v52 = vld [vmem:[#allocation7 + $0x30] sm:$0xff]  ;;  %v414_v53 = vld [vmem:[#allocation7 + $0x18] sm:$0xff]  ;;  %v10549_v6 = vpack.c.bf16 %v401_v60, %v401_v60 }
 0x21b   :  { %3668 = vmatprep.subr.bf16.mxu0 %v9159_v56  ;;  %3832 = vmatprep.subr.bf16.mxu1 %v9161_v58  ;;  %v418_v56 = vld [vmem:[#allocation7 + $0x38] sm:$0xff]  ;;  %v9198_v58 = vcombine.low %v915_v36, %v919_v37  ;;  %v8699_v61 = vcombine.high %v413_v50, %v417_v52  ;;  %v453_v37 = vld [vmem:[#allocation7 + $0x150] sm:$0xff] }
 0x21c   :  { %v8701_v1 = vcombine.high %v414_v53, %v418_v56  ;;  %v8700_v7 = vcombine.low %v414_v53, %v418_v56  ;;  %v462_v53 = vld [vmem:[#allocation7 + $0x198] sm:$0xff] }
 0x21d   :  { %v466_v56 = vld [vmem:[#allocation7 + $0x1b8] sm:$0xff] }
 0x21e   :  { %3669 = vmatpush1.bf16.msra.mxu0 %v9158_v2  ;;  %3833 = vmatpush1.bf16.msra.mxu1 %v9160_v3  ;;  %v421_v2 = vld [vmem:[#allocation7 + $0x50] sm:$0xff] }
 0x21f   :  { %3670 = vmatprep.subr.bf16.mxu0 %v9167_v4  ;;  %3834 = vmatprep.subr.bf16.mxu1 %v9169_v5  ;;  %v425_v3 = vld [vmem:[#allocation7 + $0x70] sm:$0xff]  ;;  %v426_v4 = vld [vmem:[#allocation7 + $0x78] sm:$0xff]  ;;  %v8698_v5 = vcombine.low %v413_v50, %v417_v52 }
 0x220   :  { %v8707_v8 = vcombine.high %v421_v2, %v425_v3  ;;  %v8709_v30 = vcombine.high %v422_v47, %v426_v4  ;;  %v8706_v12 = vcombine.low %v421_v2, %v425_v3  ;;  %v8708_v13 = vcombine.low %v422_v47, %v426_v4  ;;  %v461_v50 = vld [vmem:[#allocation7 + $0x190] sm:$0xff]  ;;  %v470_v3 = vld [vmem:[#allocation7 + $0x1d8] sm:$0xff] }
 0x221   :  { %v465_v52 = vld [vmem:[#allocation7 + $0x1b0] sm:$0xff]  ;;  %v474_v47 = vld [vmem:[#allocation7 + $0x1f8] sm:$0xff] }
 0x222   :  { %3671 = vmatpush1.bf16.msra.mxu0 %v9166_v9  ;;  %3835 = vmatpush1.bf16.msra.mxu1 %v9168_v63  ;;  %v429_v9 = vld [vmem:[#allocation7 + $0x90] sm:$0xff]  ;;  %v8747_v60 = vcombine.high %v461_v50, %v465_v52  ;;  %v8746_v4 = vcombine.low %v461_v50, %v465_v52  ;;  %v510_v52 = vld [vmem:[#allocation7 + $0x318] sm:$0xff] }
 0x223   :  { %3672 = vmatprep.subr.bf16.mxu0 %v9175_v10  ;;  %3836 = vmatprep.subr.bf16.mxu1 %v9177_v11  ;;  %v433_v63 = vld [vmem:[#allocation7 + $0xb0] sm:$0xff]  ;;  %v430_v10 = vld [vmem:[#allocation7 + $0x98] sm:$0xff] }
 0x224   :  { %v434_v11 = vld [vmem:[#allocation7 + $0xb8] sm:$0xff]  ;;  %v8715_v14 = vcombine.high %v429_v9, %v433_v63  ;;  %v8714_v21 = vcombine.low %v429_v9, %v433_v63  ;;  %v473_v2 = vld [vmem:[#allocation7 + $0x1f0] sm:$0xff] }
 0x225   :  { %v8717_v15 = vcombine.high %v430_v10, %v434_v11  ;;  %v8716_v39 = vcombine.low %v430_v10, %v434_v11  ;;  %v481_v9 = vld [vmem:[#allocation7 + $0x230] sm:$0xff]  ;;  %v478_v63 = vld [vmem:[#allocation7 + $0x218] sm:$0xff] }
 0x226   :  { %3673 = vmatpush1.bf16.msra.mxu0 %v9174_v17  ;;  %3837 = vmatpush1.bf16.msra.mxu1 %v9176_v51  ;;  %v437_v17 = vld [vmem:[#allocation7 + $0xd0] sm:$0xff]  ;;  %v482_v10 = vld [vmem:[#allocation7 + $0x238] sm:$0xff] }
 0x227   :  { %3674 = vmatprep.subr.bf16.mxu0 %v9183_v19  ;;  %3838 = vmatprep.subr.bf16.mxu1 %v9185_v20  ;;  %v441_v51 = vld [vmem:[#allocation7 + $0xf0] sm:$0xff]  ;;  %v438_v19 = vld [vmem:[#allocation7 + $0xd8] sm:$0xff] }
 0x228   :  { %v442_v20 = vld [vmem:[#allocation7 + $0xf8] sm:$0xff]  ;;  %v8723_v22 = vcombine.high %v437_v17, %v441_v51  ;;  %v8722_v0 = vcombine.low %v437_v17, %v441_v51  ;;  %v489_v17 = vld [vmem:[#allocation7 + $0x270] sm:$0xff] }
 0x229   :  { %v8725_v24 = vcombine.high %v438_v19, %v442_v20  ;;  %v486_v51 = vld [vmem:[#allocation7 + $0x258] sm:$0xff]  ;;  %v513_v50 = vld [vmem:[#allocation7 + $0x330] sm:$0xff] }
 0x22a   :  { %3675 = vmatpush1.bf16.msra.mxu0 %v9182_v25  ;;  %3839 = vmatpush1.bf16.msra.mxu1 %v9184_v27  ;;  %v445_v25 = vld [vmem:[#allocation7 + $0x110] sm:$0xff] }
 0x22b   :  { %3676 = vmatprep.subr.bf16.mxu0 %v9191_v35  ;;  %3840 = vmatprep.subr.bf16.mxu1 %v9193_v28  ;;  %v449_v27 = vld [vmem:[#allocation7 + $0x130] sm:$0xff]  ;;  %v8724_v35 = vcombine.low %v438_v19, %v442_v20  ;;  %v490_v19 = vld [vmem:[#allocation7 + $0x278] sm:$0xff] }
 0x22c   :  { %v8731_v28 = vcombine.high %v445_v25, %v449_v27 }
 0x22e   :  { %3677 = vmatpush1.bf16.msra.mxu0 %v9190_v43  ;;  %3841 = vmatpush1.bf16.msra.mxu1 %v9192_v45  ;;  %v458_v43 = vld [vmem:[#allocation7 + $0x178] sm:$0xff]  ;;  %v8730_v45 = vcombine.low %v445_v25, %v449_v27  ;;  %v497_v25 = vld [vmem:[#allocation7 + $0x2b0] sm:$0xff] }
 0x22f   :  { %3678 = vmatprep.subr.bf16.mxu0 %v9199_v48  ;;  %3842 = vmatprep.subr.bf16.mxu1 %v9201_v49  ;;  %v8739_v48 = vcombine.high %v453_v37, %v457_v38  ;;  %v8741_v49 = vcombine.high %v454_v40, %v458_v43  ;;  %v494_v27 = vld [vmem:[#allocation7 + $0x298] sm:$0xff] }
 0x232   :  { %3679 = vmatpush1.bf16.msra.mxu0 %v9198_v58  ;;  %3843 = vmatpush1.bf16.msra.mxu1 %v9200_v59  ;;  %v8738_v58 = vcombine.low %v453_v37, %v457_v38  ;;  %v8740_v59 = vcombine.low %v454_v40, %v458_v43  ;;  %v505_v37 = vld [vmem:[#allocation7 + $0x2f0] sm:$0xff]  ;;  %v502_v38 = vld [vmem:[#allocation7 + $0x2d8] sm:$0xff] }
 0x233   :  { %3853 = vmatprep.subr.bf16.mxu0 %v8699_v61  ;;  %4017 = vmatprep.subr.bf16.mxu1 %v8701_v1  ;;  %v8749_v61 = vcombine.high %v462_v53, %v466_v56  ;;  %v469_v1 = vld [vmem:[#allocation7 + $0x1d0] sm:$0xff]  ;;  %v506_v40 = vld [vmem:[#allocation7 + $0x2f8] sm:$0xff] }
 0x234   :  { %v8754_v11 = vcombine.low %v469_v1, %v473_v2 }
 0x235   :  { %3681 = vmatmul.mubr.bf16.vlgmr.msra.gmra.mrb[8].mxu0 %v10549_v6  ;;  %3845 = vmatmul.mubr.bf16.vlgmr.msra.gmra.mrb[8].mxu1 %v10549_v6 }
 0x236   :  { %3854 = vmatpush1.bf16.msra.mxu0 %v8698_v5  ;;  %3885 = vmatprep.mubr.bf16.mxu0 %v10484_v54  ;;  %v8748_v5 = vcombine.low %v462_v53, %v466_v56  ;;  %v514_v53 = vld [vmem:[#allocation7 + $0x338] sm:$0xff] }
 0x237   :  { %4018 = vmatpush1.bf16.msra.mxu1 %v8700_v7  ;;  %4049 = vmatprep.mubr.bf16.mxu1 %v10484_v54  ;;  %v446_v54 = vld [vmem:[#allocation7 + $0x118] sm:$0xff]  ;;  %v8755_v7 = vcombine.high %v469_v1, %v473_v2  ;;  %v521_v1 = vld [vmem:[#allocation7 + $0x370] sm:$0xff] }
 0x238   :  { %3855 = vmatprep.subr.bf16.mxu0 %v8707_v8  ;;  %4019 = vmatprep.subr.bf16.mxu1 %v8709_v30  ;;  %v8733_v36 = vcombine.high %v446_v54, %v450_v34  ;;  %v8732_v46 = vcombine.low %v446_v54, %v450_v34  ;;  %v8757_v8 = vcombine.high %v470_v3, %v474_v47  ;;  %v477_v30 = vld [vmem:[#allocation7 + $0x210] sm:$0xff]  ;;  %v498_v54 = vld [vmem:[#allocation7 + $0x2b8] sm:$0xff] }
 0x239   :  { %v8762_v20 = vcombine.low %v477_v30, %v481_v9  ;;  %v518_v2 = vld [vmem:[#allocation7 + $0x358] sm:$0xff] }
 0x23a   :  { %3856 = vmatpush1.bf16.msra.mxu0 %v8706_v12  ;;  %v8756_v12 = vcombine.low %v470_v3, %v474_v47  ;;  %v522_v3 = vld [vmem:[#allocation7 + $0x378] sm:$0xff] }
 0x23b   :  { %4020 = vmatpush1.bf16.msra.mxu1 %v8708_v13  ;;  %3857 = vmatprep.subr.bf16.mxu0 %v8715_v14  ;;  %v8763_v13 = vcombine.high %v477_v30, %v481_v9  ;;  %v8765_v14 = vcombine.high %v478_v63, %v482_v10  ;;  %v529_v30 = vld [vmem:[#allocation7 + $0x3b0] sm:$0xff]  ;;  %v526_v9 = vld [vmem:[#allocation7 + $0x398] sm:$0xff] }
 0x23c   :  { %4021 = vmatprep.subr.bf16.mxu1 %v8717_v15  ;;  %v485_v15 = vld [vmem:[#allocation7 + $0x250] sm:$0xff] }
 0x23d   :  { %v8770_v34 = vcombine.low %v485_v15, %v489_v17 }
 0x23e   :  { %3858 = vmatpush1.bf16.msra.mxu0 %v8714_v21  ;;  %v8764_v21 = vcombine.low %v478_v63, %v482_v10  ;;  %v530_v63 = vld [vmem:[#allocation7 + $0x3b8] sm:$0xff] }
 0x23f   :  { %4022 = vmatpush1.bf16.msra.mxu1 %v8716_v39  ;;  %3859 = vmatprep.subr.bf16.mxu0 %v8723_v22  ;;  %v8771_v39 = vcombine.high %v485_v15, %v489_v17  ;;  %v8773_v22 = vcombine.high %v486_v51, %v490_v19  ;;  %v537_v15 = vld [vmem:[#allocation7 + $0x3f0] sm:$0xff]  ;;  %v534_v17 = vld [vmem:[#allocation7 + $0x3d8] sm:$0xff] }
 0x240   :  { %4023 = vmatprep.subr.bf16.mxu1 %v8725_v24  ;;  %v493_v24 = vld [vmem:[#allocation7 + $0x290] sm:$0xff] }
 0x241   :  { %v8778_v43 = vcombine.low %v493_v24, %v497_v25 }
 0x242   :  { %3860 = vmatpush1.bf16.msra.mxu0 %v8722_v0  ;;  %v8772_v0 = vcombine.low %v486_v51, %v490_v19  ;;  %v538_v51 = vld [vmem:[#allocation7 + $0x3f8] sm:$0xff] }
 0x243   :  { %4024 = vmatpush1.bf16.msra.mxu1 %v8724_v35  ;;  %3861 = vmatprep.subr.bf16.mxu0 %v8731_v28  ;;  %v8779_v35 = vcombine.high %v493_v24, %v497_v25  ;;  %v8781_v28 = vcombine.high %v494_v27, %v498_v54  ;;  %v545_v24 = vld [vmem:[#allocation7 + $0x430] sm:$0xff]  ;;  %v542_v25 = vld [vmem:[#allocation7 + $0x418] sm:$0xff] }
 0x244   :  { %4025 = vmatprep.subr.bf16.mxu1 %v8733_v36  ;;  %v501_v36 = vld [vmem:[#allocation7 + $0x2d0] sm:$0xff] }
 0x245   :  { %v8786_v56 = vcombine.low %v501_v36, %v505_v37 }
 0x246   :  { %3862 = vmatpush1.bf16.msra.mxu0 %v8730_v45  ;;  %v8780_v45 = vcombine.low %v494_v27, %v498_v54  ;;  %v546_v27 = vld [vmem:[#allocation7 + $0x438] sm:$0xff] }
 0x247   :  { %4026 = vmatpush1.bf16.msra.mxu1 %v8732_v46  ;;  %3863 = vmatprep.subr.bf16.mxu0 %v8739_v48  ;;  %v8787_v46 = vcombine.high %v501_v36, %v505_v37  ;;  %v8789_v48 = vcombine.high %v502_v38, %v506_v40  ;;  %v553_v36 = vld [vmem:[#allocation7 + $0x470] sm:$0xff] }
 0x248   :  { %4027 = vmatprep.subr.bf16.mxu1 %v8741_v49  ;;  %v509_v49 = vld [vmem:[#allocation7 + $0x310] sm:$0xff] }
 0x249   :  { %v8794_v47 = vcombine.low %v509_v49, %v513_v50 }
 0x24a   :  { %3864 = vmatpush1.bf16.msra.mxu0 %v8738_v58  ;;  %v8788_v58 = vcombine.low %v502_v38, %v506_v40  ;;  %v550_v38 = vld [vmem:[#allocation7 + $0x458] sm:$0xff] }
 0x24b   :  { %4028 = vmatpush1.bf16.msra.mxu1 %v8740_v59  ;;  %3865 = vmatprep.subr.bf16.mxu0 %v8747_v60  ;;  %v8795_v59 = vcombine.high %v509_v49, %v513_v50  ;;  %v8797_v60 = vcombine.high %v510_v52, %v514_v53  ;;  %v554_v40 = vld [vmem:[#allocation7 + $0x478] sm:$0xff] }
 0x24c   :  { %4029 = vmatprep.subr.bf16.mxu1 %v8749_v61  ;;  %v517_v61 = vld [vmem:[#allocation7 + $0x350] sm:$0xff]  ;;  %v8837_v49 = vcombine.high %v550_v38, %v554_v40  ;;  %v558_v50 = vld [vmem:[#allocation7 + $0x498] sm:$0xff] }
 0x24d   :  { %v8802_v10 = vcombine.low %v517_v61, %v521_v1 }
 0x24e   :  { %3866 = vmatpush1.bf16.msra.mxu0 %v8746_v4  ;;  %v8796_v4 = vcombine.low %v510_v52, %v514_v53  ;;  %v562_v52 = vld [vmem:[#allocation7 + $0x4b8] sm:$0xff] }
 0x24f   :  { %4030 = vmatpush1.bf16.msra.mxu1 %v8748_v5  ;;  %3867 = vmatprep.subr.bf16.mxu0 %v8755_v7  ;;  %v8803_v5 = vcombine.high %v517_v61, %v521_v1  ;;  %v8805_v7 = vcombine.high %v518_v2, %v522_v3  ;;  %v569_v61 = vld [vmem:[#allocation7 + $0x4f0] sm:$0xff]  ;;  %v566_v1 = vld [vmem:[#allocation7 + $0x4d8] sm:$0xff] }
 0x250   :  { %4031 = vmatprep.subr.bf16.mxu1 %v8757_v8  ;;  %v525_v8 = vld [vmem:[#allocation7 + $0x390] sm:$0xff] }
 0x251   :  { %v8810_v19 = vcombine.low %v525_v8, %v529_v30 }
 0x252   :  { %3868 = vmatpush1.bf16.msra.mxu0 %v8754_v11  ;;  %v8804_v11 = vcombine.low %v518_v2, %v522_v3  ;;  %v570_v2 = vld [vmem:[#allocation7 + $0x4f8] sm:$0xff] }
 0x253   :  { %4032 = vmatpush1.bf16.msra.mxu1 %v8756_v12  ;;  %3869 = vmatprep.subr.bf16.mxu0 %v8763_v13  ;;  %v8811_v12 = vcombine.high %v525_v8, %v529_v30  ;;  %v8813_v13 = vcombine.high %v526_v9, %v530_v63  ;;  %v574_v8 = vld [vmem:[#allocation7 + $0x518] sm:$0xff] }
 0x254   :  { %4033 = vmatprep.subr.bf16.mxu1 %v8765_v14  ;;  %v533_v14 = vld [vmem:[#allocation7 + $0x3d0] sm:$0xff]  ;;  %v578_v30 = vld [vmem:[#allocation7 + $0x538] sm:$0xff] }
 0x255   :  { %v8818_v54 = vcombine.low %v533_v14, %v537_v15 }
 0x256   :  { %3870 = vmatpush1.bf16.msra.mxu0 %v8762_v20  ;;  %v8812_v20 = vcombine.low %v526_v9, %v530_v63  ;;  %v8852_v9 = vcombine.low %v566_v1, %v570_v2 }
 0x257   :  { %4034 = vmatpush1.bf16.msra.mxu1 %v8764_v21  ;;  %3871 = vmatprep.subr.bf16.mxu0 %v8771_v39  ;;  %v8819_v21 = vcombine.high %v533_v14, %v537_v15  ;;  %v8821_v39 = vcombine.high %v534_v17, %v538_v51  ;;  %v586_v14 = vld [vmem:[#allocation7 + $0x578] sm:$0xff] }
 0x258   :  { %4035 = vmatprep.subr.bf16.mxu1 %v8773_v22  ;;  %v541_v22 = vld [vmem:[#allocation7 + $0x410] sm:$0xff] }
 0x259   :  { %v8826_v37 = vcombine.low %v541_v22, %v545_v24 }
 0x25a   :  { %3872 = vmatpush1.bf16.msra.mxu0 %v8770_v34  ;;  %v8820_v34 = vcombine.low %v534_v17, %v538_v51  ;;  %v8860_v17 = vcombine.low %v574_v8, %v578_v30 }
 0x25b   :  { %4036 = vmatpush1.bf16.msra.mxu1 %v8772_v0  ;;  %3873 = vmatprep.subr.bf16.mxu0 %v8779_v35  ;;  %v8827_v0 = vcombine.high %v541_v22, %v545_v24  ;;  %v8829_v35 = vcombine.high %v542_v25, %v546_v27  ;;  %v594_v22 = vld [vmem:[#allocation7 + $0x5b8] sm:$0xff] }
 0x25c   :  { %4037 = vmatprep.subr.bf16.mxu1 %v8781_v28  ;;  %v549_v28 = vld [vmem:[#allocation7 + $0x450] sm:$0xff] }
 0x25d   :  { %v8834_v53 = vcombine.low %v549_v28, %v553_v36 }
 0x25e   :  { %3874 = vmatpush1.bf16.msra.mxu0 %v8778_v43  ;;  %v8828_v43 = vcombine.low %v542_v25, %v546_v27 }
 0x25f   :  { %4038 = vmatpush1.bf16.msra.mxu1 %v8780_v45  ;;  %3875 = vmatprep.subr.bf16.mxu0 %v8787_v46  ;;  %v8835_v45 = vcombine.high %v549_v28, %v553_v36  ;;  %v557_v46 = vld [vmem:[#allocation7 + $0x490] sm:$0xff]  ;;  %v602_v28 = vld [vmem:[#allocation7 + $0x5f8] sm:$0xff] }
 0x260   :  { %4039 = vmatprep.subr.bf16.mxu1 %v8789_v48  ;;  %v561_v48 = vld [vmem:[#allocation7 + $0x4b0] sm:$0xff] }
 0x261   :  { %v8842_v3 = vcombine.low %v557_v46, %v561_v48 }
 0x262   :  { %3876 = vmatpush1.bf16.msra.mxu0 %v8786_v56  ;;  %v8836_v56 = vcombine.low %v550_v38, %v554_v40 }
 0x263   :  { %4040 = vmatpush1.bf16.msra.mxu1 %v8788_v58  ;;  %3877 = vmatprep.subr.bf16.mxu0 %v8795_v59  ;;  %v8843_v58 = vcombine.high %v557_v46, %v561_v48  ;;  %v8845_v59 = vcombine.high %v558_v50, %v562_v52  ;;  %v606_v46 = vld [vmem:[#allocation7 + $0x618] sm:$0xff] }
 0x264   :  { %4041 = vmatprep.subr.bf16.mxu1 %v8797_v60  ;;  %v565_v60 = vld [vmem:[#allocation7 + $0x4d0] sm:$0xff]  ;;  %v610_v48 = vld [vmem:[#allocation7 + $0x638] sm:$0xff] }
 0x266   :  { %3878 = vmatpush1.bf16.msra.mxu0 %v8794_v47  ;;  %v8851_v47 = vcombine.high %v565_v60, %v569_v61 }
 0x267   :  { %4042 = vmatpush1.bf16.msra.mxu1 %v8796_v4  ;;  %3879 = vmatprep.subr.bf16.mxu0 %v8803_v5  ;;  %v8853_v4 = vcombine.high %v566_v1, %v570_v2  ;;  %v573_v5 = vld [vmem:[#allocation7 + $0x510] sm:$0xff]  ;;  %v8892_v1 = vcombine.low %v606_v46, %v610_v48 }
 0x268   :  { %4043 = vmatprep.subr.bf16.mxu1 %v8805_v7  ;;  %v577_v7 = vld [vmem:[#allocation7 + $0x530] sm:$0xff] }
 0x269   :  { %v8859_v63 = vcombine.high %v573_v5, %v577_v7  ;;  %v8858_v15 = vcombine.low %v573_v5, %v577_v7  ;;  %v626_v5 = vld [vmem:[#allocation7 + $0x6b8] sm:$0xff] }
 0x26a   :  { %3880 = vmatpush1.bf16.msra.mxu0 %v8802_v10  ;;  %v8861_v10 = vcombine.high %v574_v8, %v578_v30 }
 0x26b   :  { %4044 = vmatpush1.bf16.msra.mxu1 %v8804_v11  ;;  %3881 = vmatprep.subr.bf16.mxu0 %v8811_v12  ;;  %v581_v11 = vld [vmem:[#allocation7 + $0x550] sm:$0xff] }
 0x26c   :  { %4045 = vmatprep.subr.bf16.mxu1 %v8813_v13  ;;  %v585_v12 = vld [vmem:[#allocation7 + $0x570] sm:$0xff]  ;;  %v582_v13 = vld [vmem:[#allocation7 + $0x558] sm:$0xff] }
 0x26d   :  { %v8867_v51 = vcombine.high %v581_v11, %v585_v12  ;;  %v8866_v24 = vcombine.low %v581_v11, %v585_v12  ;;  %v8868_v25 = vcombine.low %v582_v13, %v586_v14  ;;  %v634_v11 = vld [vmem:[#allocation7 + $0x6f8] sm:$0xff] }
 0x26e   :  { %3882 = vmatpush1.bf16.msra.mxu0 %v8810_v19  ;;  %v8869_v19 = vcombine.high %v582_v13, %v586_v14 }
 0x26f   :  { %4046 = vmatpush1.bf16.msra.mxu1 %v8812_v20  ;;  %3883 = vmatprep.subr.bf16.mxu0 %v8819_v21  ;;  %v589_v20 = vld [vmem:[#allocation7 + $0x590] sm:$0xff] }
 0x270   :  { %4047 = vmatprep.subr.bf16.mxu1 %v8821_v39  ;;  %v593_v21 = vld [vmem:[#allocation7 + $0x5b0] sm:$0xff]  ;;  %v590_v39 = vld [vmem:[#allocation7 + $0x598] sm:$0xff] }
 0x271   :  { %v8875_v27 = vcombine.high %v589_v20, %v593_v21  ;;  %v8874_v36 = vcombine.low %v589_v20, %v593_v21  ;;  %v642_v20 = vld [vmem:[#allocation7 + $0x738] sm:$0xff] }
 0x272   :  { %3884 = vmatpush1.bf16.msra.mxu0 %v8818_v54  ;;  %v8877_v54 = vcombine.high %v590_v39, %v594_v22 }
 0x273   :  { %4048 = vmatpush1.bf16.msra.mxu1 %v8820_v34  ;;  %3894 = vmatprep.subr.bf16.mxu0 %v8827_v0  ;;  %v597_v34 = vld [vmem:[#allocation7 + $0x5d0] sm:$0xff] }
 0x274   :  { %4058 = vmatprep.subr.bf16.mxu1 %v8829_v35  ;;  %v601_v0 = vld [vmem:[#allocation7 + $0x5f0] sm:$0xff]  ;;  %v598_v35 = vld [vmem:[#allocation7 + $0x5d8] sm:$0xff] }
 0x275   :  { %3886 = vmatmul.mubr.bf16.vlgmr.msra.gmra.mrb[12].mxu0 %v10486_v55  ;;  %v8883_v38 = vcombine.high %v597_v34, %v601_v0  ;;  %v8885_v40 = vcombine.high %v598_v35, %v602_v28 }
 0x276   :  { %4050 = vmatmul.mubr.bf16.vlgmr.msra.gmra.mrb[12].mxu1 %v10486_v55  ;;  %3895 = vmatpush1.bf16.msra.mxu0 %v8826_v37  ;;  %v8844_v55 = vcombine.low %v558_v50, %v562_v52  ;;  %v8876_v37 = vcombine.low %v590_v39, %v594_v22  ;;  %v8884_v50 = vcombine.low %v598_v35, %v602_v28 }
 0x277   :  { %3926 = vmatprep.mubr.bf16.mxu0 %v10490_v62  ;;  %4059 = vmatpush1.bf16.msra.mxu1 %v8828_v43  ;;  %v605_v43 = vld [vmem:[#allocation7 + $0x610] sm:$0xff] }
 0x278   :  { %4090 = vmatprep.mubr.bf16.mxu1 %v10490_v62  ;;  %3896 = vmatprep.subr.bf16.mxu0 %v8835_v45  ;;  %v8850_v62 = vcombine.low %v565_v60, %v569_v61  ;;  %v609_v45 = vld [vmem:[#allocation7 + $0x630] sm:$0xff]  ;;  %v618_v60 = vld [vmem:[#allocation7 + $0x678] sm:$0xff] }
 0x279   :  { %4060 = vmatprep.subr.bf16.mxu1 %v8837_v49  ;;  %v8882_v49 = vcombine.low %v597_v34, %v601_v0  ;;  %v8891_v52 = vcombine.high %v605_v43, %v609_v45  ;;  %v8890_v61 = vcombine.low %v605_v43, %v609_v45  ;;  %v650_v34 = vld [vmem:[#allocation7 + $0x778] sm:$0xff] }
 0x27a   :  { %3897 = vmatpush1.bf16.msra.mxu0 %v8834_v53  ;;  %v8893_v53 = vcombine.high %v606_v46, %v610_v48  ;;  %v658_v43 = vld [vmem:[#allocation7 + $0x7b8] sm:$0xff] }
 0x27b   :  { %4061 = vmatpush1.bf16.msra.mxu1 %v8836_v56  ;;  %3898 = vmatprep.subr.bf16.mxu0 %v8843_v58  ;;  %v613_v56 = vld [vmem:[#allocation7 + $0x650] sm:$0xff] }
 0x27c   :  { %4062 = vmatprep.subr.bf16.mxu1 %v8845_v59  ;;  %v617_v58 = vld [vmem:[#allocation7 + $0x670] sm:$0xff]  ;;  %v614_v59 = vld [vmem:[#allocation7 + $0x658] sm:$0xff] }
 0x27d   :  { %v8899_v2 = vcombine.high %v613_v56, %v617_v58  ;;  %v8898_v7 = vcombine.low %v613_v56, %v617_v58  ;;  %v8900_v8 = vcombine.low %v614_v59, %v618_v60  ;;  %v666_v56 = vld [vmem:[#allocation7 + $0x7f8] sm:$0xff] }
 0x27e   :  { %3899 = vmatpush1.bf16.msra.mxu0 %v8842_v3  ;;  %v8901_v3 = vcombine.high %v614_v59, %v618_v60 }
 0x27f   :  { %4063 = vmatpush1.bf16.msra.mxu1 %v8844_v55  ;;  %3900 = vmatprep.subr.bf16.mxu0 %v8851_v47  ;;  %v621_v55 = vld [vmem:[#allocation7 + $0x690] sm:$0xff] }
 0x280   :  { %4064 = vmatprep.subr.bf16.mxu1 %v8853_v4  ;;  %v625_v47 = vld [vmem:[#allocation7 + $0x6b0] sm:$0xff]  ;;  %v622_v4 = vld [vmem:[#allocation7 + $0x698] sm:$0xff] }
 0x281   :  { %v8907_v30 = vcombine.high %v621_v55, %v625_v47  ;;  %v8906_v12 = vcombine.low %v621_v55, %v625_v47  ;;  %v8908_v13 = vcombine.low %v622_v4, %v626_v5  ;;  %v674_v55 = vld [vmem:[#allocation7 + $0x838] sm:$0xff] }
 0x282   :  { %3901 = vmatpush1.bf16.msra.mxu0 %v8850_v62  ;;  %v8909_v62 = vcombine.high %v622_v4, %v626_v5 }
 0x283   :  { %4065 = vmatpush1.bf16.msra.mxu1 %v8852_v9  ;;  %3902 = vmatprep.subr.bf16.mxu0 %v8859_v63  ;;  %v629_v9 = vld [vmem:[#allocation7 + $0x6d0] sm:$0xff] }
 0x284   :  { %4066 = vmatprep.subr.bf16.mxu1 %v8861_v10  ;;  %v633_v63 = vld [vmem:[#allocation7 + $0x6f0] sm:$0xff]  ;;  %v630_v10 = vld [vmem:[#allocation7 + $0x6d8] sm:$0xff] }
 0x285   :  { %v8915_v14 = vcombine.high %v629_v9, %v633_v63  ;;  %v8914_v21 = vcombine.low %v629_v9, %v633_v63  ;;  %v8916_v39 = vcombine.low %v630_v10, %v634_v11  ;;  %v678_v9 = vld [vmem:[#allocation7 + $0x858] sm:$0xff] }
 0x286   :  { %3903 = vmatpush1.bf16.msra.mxu0 %v8858_v15  ;;  %v8917_v15 = vcombine.high %v630_v10, %v634_v11  ;;  %v682_v63 = vld [vmem:[#allocation7 + $0x878] sm:$0xff] }
 0x287   :  { %4067 = vmatpush1.bf16.msra.mxu1 %v8860_v17  ;;  %3904 = vmatprep.subr.bf16.mxu0 %v8867_v51  ;;  %v637_v17 = vld [vmem:[#allocation7 + $0x710] sm:$0xff] }
 0x288   :  { %4068 = vmatprep.subr.bf16.mxu1 %v8869_v19  ;;  %v641_v51 = vld [vmem:[#allocation7 + $0x730] sm:$0xff]  ;;  %v638_v19 = vld [vmem:[#allocation7 + $0x718] sm:$0xff] }
 0x289   :  { %v8923_v22 = vcombine.high %v637_v17, %v641_v51  ;;  %v8922_v0 = vcombine.low %v637_v17, %v641_v51  ;;  %v8924_v35 = vcombine.low %v638_v19, %v642_v20  ;;  %v690_v17 = vld [vmem:[#allocation7 + $0x8b8] sm:$0xff] }
 0x28a   :  { %3905 = vmatpush1.bf16.msra.mxu0 %v8866_v24  ;;  %v8925_v24 = vcombine.high %v638_v19, %v642_v20  ;;  %v8964_v19 = vcombine.low %v678_v9, %v682_v63 }
 0x28b   :  { %4069 = vmatpush1.bf16.msra.mxu1 %v8868_v25  ;;  %3906 = vmatprep.subr.bf16.mxu0 %v8875_v27  ;;  %v645_v25 = vld [vmem:[#allocation7 + $0x750] sm:$0xff] }
 0x28c   :  { %4070 = vmatprep.subr.bf16.mxu1 %v8877_v54  ;;  %v649_v27 = vld [vmem:[#allocation7 + $0x770] sm:$0xff]  ;;  %v646_v54 = vld [vmem:[#allocation7 + $0x758] sm:$0xff] }
 0x28d   :  { %v8931_v28 = vcombine.high %v645_v25, %v649_v27  ;;  %v8930_v45 = vcombine.low %v645_v25, %v649_v27  ;;  %v8932_v46 = vcombine.low %v646_v54, %v650_v34  ;;  %v698_v25 = vld [vmem:[#allocation7 + $0x8f8] sm:$0xff] }
 0x28e   :  { %3907 = vmatpush1.bf16.msra.mxu0 %v8874_v36  ;;  %v8933_v36 = vcombine.high %v646_v54, %v650_v34 }
 0x28f   :  { %4071 = vmatpush1.bf16.msra.mxu1 %v8876_v37  ;;  %3908 = vmatprep.subr.bf16.mxu0 %v8883_v38  ;;  %v653_v37 = vld [vmem:[#allocation7 + $0x790] sm:$0xff] }
 0x290   :  { %4072 = vmatprep.subr.bf16.mxu1 %v8885_v40  ;;  %v657_v38 = vld [vmem:[#allocation7 + $0x7b0] sm:$0xff]  ;;  %v654_v40 = vld [vmem:[#allocation7 + $0x798] sm:$0xff] }
 0x291   :  { %v8939_v48 = vcombine.high %v653_v37, %v657_v38  ;;  %v8938_v58 = vcombine.low %v653_v37, %v657_v38  ;;  %v8940_v59 = vcombine.low %v654_v40, %v658_v43 }
 0x292   :  { %3909 = vmatpush1.bf16.msra.mxu0 %v8882_v49  ;;  %v8941_v49 = vcombine.high %v654_v40, %v658_v43  ;;  %v709_v43 = vld [vmem:[#allocation7 + $0x950] sm:$0xff] }
 0x293   :  { %4073 = vmatpush1.bf16.msra.mxu1 %v8884_v50  ;;  %3910 = vmatprep.subr.bf16.mxu0 %v8891_v52  ;;  %v661_v50 = vld [vmem:[#allocation7 + $0x7d0] sm:$0xff] }
 0x294   :  { %4074 = vmatprep.subr.bf16.mxu1 %v8893_v53  ;;  %v665_v52 = vld [vmem:[#allocation7 + $0x7f0] sm:$0xff]  ;;  %v662_v53 = vld [vmem:[#allocation7 + $0x7d8] sm:$0xff] }
 0x295   :  { %v8947_v60 = vcombine.high %v661_v50, %v665_v52  ;;  %v8946_v47 = vcombine.low %v661_v50, %v665_v52  ;;  %v8948_v4 = vcombine.low %v662_v53, %v666_v56 }
 0x296   :  { %3911 = vmatpush1.bf16.msra.mxu0 %v8890_v61  ;;  %v8949_v61 = vcombine.high %v662_v53, %v666_v56  ;;  %v717_v56 = vld [vmem:[#allocation7 + $0x990] sm:$0xff] }
 0x297   :  { %4075 = vmatpush1.bf16.msra.mxu1 %v8892_v1  ;;  %3912 = vmatprep.subr.bf16.mxu0 %v8899_v2  ;;  %v669_v1 = vld [vmem:[#allocation7 + $0x810] sm:$0xff] }
 0x298   :  { %4076 = vmatprep.subr.bf16.mxu1 %v8901_v3  ;;  %v673_v2 = vld [vmem:[#allocation7 + $0x830] sm:$0xff]  ;;  %v670_v3 = vld [vmem:[#allocation7 + $0x818] sm:$0xff] }
 0x299   :  { %v8955_v5 = vcombine.high %v669_v1, %v673_v2  ;;  %v8956_v10 = vcombine.low %v670_v3, %v674_v55 }
 0x29a   :  { %3913 = vmatpush1.bf16.msra.mxu0 %v8898_v7  ;;  %v8957_v7 = vcombine.high %v670_v3, %v674_v55  ;;  %v725_v55 = vld [vmem:[#allocation7 + $0x9d0] sm:$0xff] }
 0x29b   :  { %4077 = vmatpush1.bf16.msra.mxu1 %v8900_v8  ;;  %3914 = vmatprep.subr.bf16.mxu0 %v8907_v30  ;;  %v677_v8 = vld [vmem:[#allocation7 + $0x850] sm:$0xff] }
 0x29c   :  { %4078 = vmatprep.subr.bf16.mxu1 %v8909_v62  ;;  %v681_v30 = vld [vmem:[#allocation7 + $0x870] sm:$0xff]  ;;  %v8954_v62 = vcombine.low %v669_v1, %v673_v2 }
 0x29d   :  { %v8963_v11 = vcombine.high %v677_v8, %v681_v30  ;;  %v8962_v51 = vcombine.low %v677_v8, %v681_v30 }
 0x29e   :  { %3915 = vmatpush1.bf16.msra.mxu0 %v8906_v12  ;;  %v685_v12 = vld [vmem:[#allocation7 + $0x890] sm:$0xff] }
 0x29f   :  { %4079 = vmatpush1.bf16.msra.mxu1 %v8908_v13  ;;  %3916 = vmatprep.subr.bf16.mxu0 %v8915_v14  ;;  %v689_v13 = vld [vmem:[#allocation7 + $0x8b0] sm:$0xff]  ;;  %v8965_v14 = vcombine.high %v678_v9, %v682_v63 }
 0x2a0   :  { %4080 = vmatprep.subr.bf16.mxu1 %v8917_v15  ;;  %v686_v15 = vld [vmem:[#allocation7 + $0x898] sm:$0xff]  ;;  %v8971_v20 = vcombine.high %v685_v12, %v689_v13  ;;  %v8970_v27 = vcombine.low %v685_v12, %v689_v13  ;;  %v733_v9 = vld [vmem:[#allocation7 + $0xa10] sm:$0xff] }
 0x2a1   :  { %v737_v63 = vld [vmem:[#allocation7 + $0xa30] sm:$0xff] }
 0x2a2   :  { %3917 = vmatpush1.bf16.msra.mxu0 %v8914_v21  ;;  %v8973_v21 = vcombine.high %v686_v15, %v690_v17 }
 0x2a3   :  { %4081 = vmatpush1.bf16.msra.mxu1 %v8916_v39  ;;  %3918 = vmatprep.subr.bf16.mxu0 %v8923_v22  ;;  %v693_v39 = vld [vmem:[#allocation7 + $0x8d0] sm:$0xff] }
 0x2a4   :  { %4082 = vmatprep.subr.bf16.mxu1 %v8925_v24  ;;  %v697_v22 = vld [vmem:[#allocation7 + $0x8f0] sm:$0xff]  ;;  %v694_v24 = vld [vmem:[#allocation7 + $0x8d8] sm:$0xff] }
 0x2a5   :  { %v8979_v54 = vcombine.high %v693_v39, %v697_v22  ;;  %v8981_v34 = vcombine.high %v694_v24, %v698_v25  ;;  %v8980_v37 = vcombine.low %v694_v24, %v698_v25  ;;  %v749_v25 = vld [vmem:[#allocation7 + $0xa90] sm:$0xff] }
 0x2a6   :  { %3919 = vmatpush1.bf16.msra.mxu0 %v8922_v0  ;;  %v701_v0 = vld [vmem:[#allocation7 + $0x910] sm:$0xff] }
 0x2a7   :  { %4083 = vmatpush1.bf16.msra.mxu1 %v8924_v35  ;;  %3920 = vmatprep.subr.bf16.mxu0 %v8931_v28  ;;  %v705_v35 = vld [vmem:[#allocation7 + $0x930] sm:$0xff]  ;;  %v702_v28 = vld [vmem:[#allocation7 + $0x918] sm:$0xff] }
 0x2a8   :  { %4084 = vmatprep.subr.bf16.mxu1 %v8933_v36  ;;  %v706_v36 = vld [vmem:[#allocation7 + $0x938] sm:$0xff]  ;;  %v8987_v38 = vcombine.high %v701_v0, %v705_v35 }
 0x2a9   :  { %v8989_v40 = vcombine.high %v702_v28, %v706_v36  ;;  %v8988_v50 = vcombine.low %v702_v28, %v706_v36  ;;  %v757_v36 = vld [vmem:[#allocation7 + $0xad0] sm:$0xff] }
 0x2aa   :  { %3921 = vmatpush1.bf16.msra.mxu0 %v8930_v45  ;;  %v713_v45 = vld [vmem:[#allocation7 + $0x970] sm:$0xff] }
 0x2ab   :  { %4085 = vmatpush1.bf16.msra.mxu1 %v8932_v46  ;;  %3922 = vmatprep.subr.bf16.mxu0 %v8939_v48  ;;  %v710_v46 = vld [vmem:[#allocation7 + $0x958] sm:$0xff]  ;;  %v8995_v52 = vcombine.high %v709_v43, %v713_v45 }
 0x2ac   :  { %4086 = vmatprep.subr.bf16.mxu1 %v8941_v49  ;;  %v714_v48 = vld [vmem:[#allocation7 + $0x978] sm:$0xff]  ;;  %v8986_v49 = vcombine.low %v701_v0, %v705_v35 }
 0x2ad   :  { %v8997_v53 = vcombine.high %v710_v46, %v714_v48  ;;  %v8996_v1 = vcombine.low %v710_v46, %v714_v48  ;;  %v765_v48 = vld [vmem:[#allocation7 + $0xb10] sm:$0xff] }
 0x2ae   :  { %3923 = vmatpush1.bf16.msra.mxu0 %v8938_v58  ;;  %v721_v58 = vld [vmem:[#allocation7 + $0x9b0] sm:$0xff] }
 0x2af   :  { %4087 = vmatpush1.bf16.msra.mxu1 %v8940_v59  ;;  %3924 = vmatprep.subr.bf16.mxu0 %v8947_v60  ;;  %v718_v59 = vld [vmem:[#allocation7 + $0x998] sm:$0xff]  ;;  %v9003_v2 = vcombine.high %v717_v56, %v721_v58 }
 0x2b0   :  { %4088 = vmatprep.subr.bf16.mxu1 %v8949_v61  ;;  %v722_v60 = vld [vmem:[#allocation7 + $0x9b8] sm:$0xff]  ;;  %v8994_v61 = vcombine.low %v709_v43, %v713_v45 }
 0x2b1   :  { %v9005_v3 = vcombine.high %v718_v59, %v722_v60  ;;  %v9004_v8 = vcombine.low %v718_v59, %v722_v60  ;;  %v773_v60 = vld [vmem:[#allocation7 + $0xb50] sm:$0xff] }
 0x2b2   :  { %3925 = vmatpush1.bf16.msra.mxu0 %v8946_v47  ;;  %v729_v47 = vld [vmem:[#allocation7 + $0x9f0] sm:$0xff] }
 0x2b3   :  { %4089 = vmatpush1.bf16.msra.mxu1 %v8948_v4  ;;  %3935 = vmatprep.subr.bf16.mxu0 %v8955_v5  ;;  %v726_v4 = vld [vmem:[#allocation7 + $0x9d8] sm:$0xff]  ;;  %v9011_v30 = vcombine.high %v725_v55, %v729_v47  ;;  %v9010_v12 = vcombine.low %v725_v55, %v729_v47 }
 0x2b4   :  { %4099 = vmatprep.subr.bf16.mxu1 %v8957_v7  ;;  %v730_v5 = vld [vmem:[#allocation7 + $0x9f8] sm:$0xff]  ;;  %v9002_v7 = vcombine.low %v717_v56, %v721_v58 }
 0x2b5   :  { %3927 = vmatmul.mubr.bf16.vlgmr.msra.gmra.mrb[12].mxu0 %v10516_v33  ;;  %v9012_v13 = vcombine.low %v726_v4, %v730_v5 }
 0x2b6   :  { %4091 = vmatmul.mubr.bf16.vlgmr.msra.gmra.mrb[12].mxu1 %v10516_v33  ;;  %3936 = vmatpush1.bf16.msra.mxu0 %v8954_v62  ;;  %v8972_v33 = vcombine.low %v686_v15, %v690_v17  ;;  %v9013_v62 = vcombine.high %v726_v4, %v730_v5  ;;  %v741_v17 = vld [vmem:[#allocation7 + $0xa50] sm:$0xff] }
 0x2b7   :  { %3967 = vmatprep.mubr.bf16.mxu0 %v10518_v42  ;;  %4100 = vmatpush1.bf16.msra.mxu1 %v8956_v10  ;;  %v734_v10 = vld [vmem:[#allocation7 + $0xa18] sm:$0xff]  ;;  %v781_v5 = vld [vmem:[#allocation7 + $0xb90] sm:$0xff] }
 0x2b8   :  { %4131 = vmatprep.mubr.bf16.mxu1 %v10518_v42  ;;  %3937 = vmatprep.subr.bf16.mxu0 %v8963_v11  ;;  %v8978_v42 = vcombine.low %v693_v39, %v697_v22  ;;  %v738_v11 = vld [vmem:[#allocation7 + $0xa38] sm:$0xff] }
 0x2b9   :  { %4101 = vmatprep.subr.bf16.mxu1 %v8965_v14  ;;  %v9019_v14 = vcombine.high %v733_v9, %v737_v63  ;;  %v9021_v15 = vcombine.high %v734_v10, %v738_v11  ;;  %v9020_v39 = vcombine.low %v734_v10, %v738_v11  ;;  %v789_v11 = vld [vmem:[#allocation7 + $0xbd0] sm:$0xff] }
 0x2ba   :  { %3938 = vmatpush1.bf16.msra.mxu0 %v8962_v51  ;;  %v745_v51 = vld [vmem:[#allocation7 + $0xa70] sm:$0xff] }
 0x2bb   :  { %4102 = vmatpush1.bf16.msra.mxu1 %v8964_v19  ;;  %3939 = vmatprep.subr.bf16.mxu0 %v8971_v20  ;;  %v742_v19 = vld [vmem:[#allocation7 + $0xa58] sm:$0xff]  ;;  %v9027_v22 = vcombine.high %v741_v17, %v745_v51 }
 0x2bc   :  { %4103 = vmatprep.subr.bf16.mxu1 %v8973_v21  ;;  %v746_v20 = vld [vmem:[#allocation7 + $0xa78] sm:$0xff]  ;;  %v9018_v21 = vcombine.low %v733_v9, %v737_v63 }
 0x2bd   :  { %v9029_v24 = vcombine.high %v742_v19, %v746_v20  ;;  %v9028_v0 = vcombine.low %v742_v19, %v746_v20  ;;  %v797_v20 = vld [vmem:[#allocation7 + $0xc10] sm:$0xff] }
 0x2be   :  { %3940 = vmatpush1.bf16.msra.mxu0 %v8970_v27  ;;  %v753_v27 = vld [vmem:[#allocation7 + $0xab0] sm:$0xff] }
 0x2bf   :  { %4104 = vmatpush1.bf16.msra.mxu1 %v8972_v33  ;;  %3941 = vmatprep.subr.bf16.mxu0 %v8979_v54  ;;  %v750_v33 = vld [vmem:[#allocation7 + $0xa98] sm:$0xff]  ;;  %v9035_v35 = vcombine.high %v749_v25, %v753_v27 }
 0x2c0   :  { %4105 = vmatprep.subr.bf16.mxu1 %v8981_v34  ;;  %v754_v54 = vld [vmem:[#allocation7 + $0xab8] sm:$0xff]  ;;  %v9026_v34 = vcombine.low %v741_v17, %v745_v51 }
 0x2c1   :  { %v9037_v28 = vcombine.high %v750_v33, %v754_v54  ;;  %v9036_v43 = vcombine.low %v750_v33, %v754_v54  ;;  %v805_v54 = vld [vmem:[#allocation7 + $0xc50] sm:$0xff] }
 0x2c2   :  { %3942 = vmatpush1.bf16.msra.mxu0 %v8978_v42  ;;  %v761_v42 = vld [vmem:[#allocation7 + $0xaf0] sm:$0xff] }
 0x2c3   :  { %4106 = vmatpush1.bf16.msra.mxu1 %v8980_v37  ;;  %3943 = vmatprep.subr.bf16.mxu0 %v8987_v38  ;;  %v758_v37 = vld [vmem:[#allocation7 + $0xad8] sm:$0xff]  ;;  %v9043_v45 = vcombine.high %v757_v36, %v761_v42 }
 0x2c4   :  { %4107 = vmatprep.subr.bf16.mxu1 %v8989_v40  ;;  %v762_v38 = vld [vmem:[#allocation7 + $0xaf8] sm:$0xff]  ;;  %v9034_v40 = vcombine.low %v749_v25, %v753_v27 }
 0x2c5   :  { %v9045_v46 = vcombine.high %v758_v37, %v762_v38  ;;  %v9044_v56 = vcombine.low %v758_v37, %v762_v38  ;;  %v813_v37 = vld [vmem:[#allocation7 + $0xc90] sm:$0xff] }
 0x2c6   :  { %3944 = vmatpush1.bf16.msra.mxu0 %v8986_v49  ;;  %v769_v49 = vld [vmem:[#allocation7 + $0xb30] sm:$0xff] }
 0x2c7   :  { %4108 = vmatpush1.bf16.msra.mxu1 %v8988_v50  ;;  %3945 = vmatprep.subr.bf16.mxu0 %v8995_v52  ;;  %v766_v50 = vld [vmem:[#allocation7 + $0xb18] sm:$0xff]  ;;  %v9051_v58 = vcombine.high %v765_v48, %v769_v49  ;;  %v817_v38 = vld [vmem:[#allocation7 + $0xcb0] sm:$0xff] }
 0x2c8   :  { %4109 = vmatprep.subr.bf16.mxu1 %v8997_v53  ;;  %v770_v52 = vld [vmem:[#allocation7 + $0xb38] sm:$0xff]  ;;  %v9042_v53 = vcombine.low %v757_v36, %v761_v42 }
 0x2c9   :  { %v9053_v59 = vcombine.high %v766_v50, %v770_v52  ;;  %v9052_v55 = vcombine.low %v766_v50, %v770_v52  ;;  %v821_v52 = vld [vmem:[#allocation7 + $0xcd0] sm:$0xff] }
 0x2ca   :  { %3946 = vmatpush1.bf16.msra.mxu0 %v8994_v61  ;;  %v777_v61 = vld [vmem:[#allocation7 + $0xb70] sm:$0xff] }
 0x2cb   :  { %4110 = vmatpush1.bf16.msra.mxu1 %v8996_v1  ;;  %3947 = vmatprep.subr.bf16.mxu0 %v9003_v2  ;;  %v774_v1 = vld [vmem:[#allocation7 + $0xb58] sm:$0xff]  ;;  %v9059_v47 = vcombine.high %v773_v60, %v777_v61 }
 0x2cc   :  { %4111 = vmatprep.subr.bf16.mxu1 %v9005_v3  ;;  %v778_v2 = vld [vmem:[#allocation7 + $0xb78] sm:$0xff]  ;;  %v9050_v3 = vcombine.low %v765_v48, %v769_v49  ;;  %v9099_v49 = vcombine.high %v813_v37, %v817_v38 }
 0x2cd   :  { %v9061_v4 = vcombine.high %v774_v1, %v778_v2  ;;  %v9060_v9 = vcombine.low %v774_v1, %v778_v2  ;;  %v829_v1 = vld [vmem:[#allocation7 + $0xd10] sm:$0xff] }
 0x2ce   :  { %3948 = vmatpush1.bf16.msra.mxu0 %v9002_v7  ;;  %v785_v7 = vld [vmem:[#allocation7 + $0xbb0] sm:$0xff] }
 0x2cf   :  { %4112 = vmatpush1.bf16.msra.mxu1 %v9004_v8  ;;  %3949 = vmatprep.subr.bf16.mxu0 %v9011_v30  ;;  %v782_v8 = vld [vmem:[#allocation7 + $0xb98] sm:$0xff]  ;;  %v9067_v63 = vcombine.high %v781_v5, %v785_v7  ;;  %v833_v2 = vld [vmem:[#allocation7 + $0xd30] sm:$0xff] }
 0x2d0   :  { %4113 = vmatprep.subr.bf16.mxu1 %v9013_v62  ;;  %v786_v30 = vld [vmem:[#allocation7 + $0xbb8] sm:$0xff]  ;;  %v9058_v62 = vcombine.low %v773_v60, %v777_v61 }
 0x2d1   :  { %v9069_v10 = vcombine.high %v782_v8, %v786_v30  ;;  %v9068_v17 = vcombine.low %v782_v8, %v786_v30  ;;  %v841_v8 = vld [vmem:[#allocation7 + $0xd70] sm:$0xff]  ;;  %v838_v30 = vld [vmem:[#allocation7 + $0xd58] sm:$0xff] }
 0x2d2   :  { %3950 = vmatpush1.bf16.msra.mxu0 %v9010_v12  ;;  %v793_v12 = vld [vmem:[#allocation7 + $0xbf0] sm:$0xff] }
 0x2d3   :  { %4114 = vmatpush1.bf16.msra.mxu1 %v9012_v13  ;;  %3951 = vmatprep.subr.bf16.mxu0 %v9019_v14  ;;  %v790_v13 = vld [vmem:[#allocation7 + $0xbd8] sm:$0xff]  ;;  %v9075_v51 = vcombine.high %v789_v11, %v793_v12 }
 0x2d4   :  { %4115 = vmatprep.subr.bf16.mxu1 %v9021_v15  ;;  %v794_v14 = vld [vmem:[#allocation7 + $0xbf8] sm:$0xff]  ;;  %v9066_v15 = vcombine.low %v781_v5, %v785_v7  ;;  %v837_v7 = vld [vmem:[#allocation7 + $0xd50] sm:$0xff] }
 0x2d5   :  { %v9077_v19 = vcombine.high %v790_v13, %v794_v14  ;;  %v9076_v25 = vcombine.low %v790_v13, %v794_v14  ;;  %v849_v13 = vld [vmem:[#allocation7 + $0xdb0] sm:$0xff]  ;;  %v846_v14 = vld [vmem:[#allocation7 + $0xd98] sm:$0xff] }
 0x2d6   :  { %3952 = vmatpush1.bf16.msra.mxu0 %v9018_v21  ;;  %v801_v21 = vld [vmem:[#allocation7 + $0xc30] sm:$0xff] }
 0x2d7   :  { %4116 = vmatpush1.bf16.msra.mxu1 %v9020_v39  ;;  %3953 = vmatprep.subr.bf16.mxu0 %v9027_v22  ;;  %v798_v39 = vld [vmem:[#allocation7 + $0xc18] sm:$0xff]  ;;  %v9083_v27 = vcombine.high %v797_v20, %v801_v21 }
 0x2d8   :  { %4117 = vmatprep.subr.bf16.mxu1 %v9029_v24  ;;  %v802_v22 = vld [vmem:[#allocation7 + $0xc38] sm:$0xff]  ;;  %v9074_v24 = vcombine.low %v789_v11, %v793_v12  ;;  %v845_v12 = vld [vmem:[#allocation7 + $0xd90] sm:$0xff] }
 0x2d9   :  { %v9085_v33 = vcombine.high %v798_v39, %v802_v22  ;;  %v9084_v36 = vcombine.low %v798_v39, %v802_v22  ;;  %v853_v22 = vld [vmem:[#allocation7 + $0xdd0] sm:$0xff] }
 0x2da   :  { %3954 = vmatpush1.bf16.msra.mxu0 %v9026_v34  ;;  %v809_v34 = vld [vmem:[#allocation7 + $0xc70] sm:$0xff] }
 0x2db   :  { %4118 = vmatpush1.bf16.msra.mxu1 %v9028_v0  ;;  %3955 = vmatprep.subr.bf16.mxu0 %v9035_v35  ;;  %v9082_v0 = vcombine.low %v797_v20, %v801_v21  ;;  %v806_v35 = vld [vmem:[#allocation7 + $0xc58] sm:$0xff]  ;;  %v9091_v42 = vcombine.high %v805_v54, %v809_v34 }
 0x2dc   :  { %4119 = vmatprep.subr.bf16.mxu1 %v9037_v28  ;;  %v810_v28 = vld [vmem:[#allocation7 + $0xc78] sm:$0xff] }
 0x2dd   :  { %v9092_v48 = vcombine.low %v806_v35, %v810_v28 }
 0x2de   :  { %3956 = vmatpush1.bf16.msra.mxu0 %v9034_v40  ;;  %v9093_v40 = vcombine.high %v806_v35, %v810_v28  ;;  %v9130_v35 = vcombine.low %v845_v12, %v849_v13 }
 0x2df   :  { %4120 = vmatpush1.bf16.msra.mxu1 %v9036_v43  ;;  %3957 = vmatprep.subr.bf16.mxu0 %v9043_v45  ;;  %v814_v43 = vld [vmem:[#allocation7 + $0xc98] sm:$0xff] }
 0x2e0   :  { %4121 = vmatprep.subr.bf16.mxu1 %v9045_v46  ;;  %v818_v45 = vld [vmem:[#allocation7 + $0xcb8] sm:$0xff]  ;;  %v9090_v46 = vcombine.low %v805_v54, %v809_v34 }
 0x2e1   :  { %v9101_v50 = vcombine.high %v814_v43, %v818_v45  ;;  %v858_v54 = vld [vmem:[#allocation7 + $0xdf8] sm:$0xff] }
 0x2e2   :  { %3958 = vmatpush1.bf16.msra.mxu0 %v9042_v53  ;;  %v825_v53 = vld [vmem:[#allocation7 + $0xcf0] sm:$0xff] }
 0x2e3   :  { %4122 = vmatpush1.bf16.msra.mxu1 %v9044_v56  ;;  %3959 = vmatprep.subr.bf16.mxu0 %v9051_v58  ;;  %v822_v56 = vld [vmem:[#allocation7 + $0xcd8] sm:$0xff]  ;;  %v9107_v60 = vcombine.high %v821_v52, %v825_v53 }
 0x2e4   :  { %4123 = vmatprep.subr.bf16.mxu1 %v9053_v59  ;;  %v826_v58 = vld [vmem:[#allocation7 + $0xcf8] sm:$0xff]  ;;  %v9098_v59 = vcombine.low %v813_v37, %v817_v38 }
 0x2e5   :  { %v9109_v61 = vcombine.high %v822_v56, %v826_v58 }
 0x2e6   :  { %3960 = vmatpush1.bf16.msra.mxu0 %v9050_v3  ;;  %v830_v3 = vld [vmem:[#allocation7 + $0xd18] sm:$0xff] }
 0x2e7   :  { %4124 = vmatpush1.bf16.msra.mxu1 %v9052_v55  ;;  %3961 = vmatprep.subr.bf16.mxu0 %v9059_v47  ;;  %v834_v55 = vld [vmem:[#allocation7 + $0xd38] sm:$0xff]  ;;  %v9108_v47 = vcombine.low %v822_v56, %v826_v58  ;;  %v873_v56 = vld [vmem:[#allocation7 + $0xe70] sm:$0xff] }
 0x2e8   :  { %4125 = vmatprep.subr.bf16.mxu1 %v9061_v4  ;;  %v9115_v4 = vcombine.high %v829_v1, %v833_v2  ;;  %v9117_v5 = vcombine.high %v830_v3, %v834_v55  ;;  %v870_v58 = vld [vmem:[#allocation7 + $0xe58] sm:$0xff] }
 0x2ea   :  { %3962 = vmatpush1.bf16.msra.mxu0 %v9058_v62  ;;  %v842_v62 = vld [vmem:[#allocation7 + $0xd78] sm:$0xff] }
 0x2eb   :  { %4126 = vmatpush1.bf16.msra.mxu1 %v9060_v9  ;;  %3963 = vmatprep.subr.bf16.mxu0 %v9067_v63  ;;  %v9114_v9 = vcombine.low %v829_v1, %v833_v2  ;;  %v9116_v63 = vcombine.low %v830_v3, %v834_v55  ;;  %v9125_v11 = vcombine.high %v838_v30, %v842_v62  ;;  %v877_v2 = vld [vmem:[#allocation7 + $0xe90] sm:$0xff]  ;;  %v878_v55 = vld [vmem:[#allocation7 + $0xe98] sm:$0xff] }
 0x2ec   :  { %4127 = vmatprep.subr.bf16.mxu1 %v9069_v10  ;;  %v9123_v10 = vcombine.high %v837_v7, %v841_v8  ;;  %v881_v3 = vld [vmem:[#allocation7 + $0xeb0] sm:$0xff] }
 0x2ee   :  { %3964 = vmatpush1.bf16.msra.mxu0 %v9066_v15  ;;  %v850_v15 = vld [vmem:[#allocation7 + $0xdb8] sm:$0xff] }
 0x2ef   :  { %4128 = vmatpush1.bf16.msra.mxu1 %v9068_v17  ;;  %3965 = vmatprep.subr.bf16.mxu0 %v9075_v51  ;;  %v9122_v17 = vcombine.low %v837_v7, %v841_v8  ;;  %v9124_v51 = vcombine.low %v838_v30, %v842_v62  ;;  %v9133_v39 = vcombine.high %v846_v14, %v850_v15  ;;  %v885_v8 = vld [vmem:[#allocation7 + $0xed0] sm:$0xff]  ;;  %v886_v62 = vld [vmem:[#allocation7 + $0xed8] sm:$0xff] }
 0x2f0   :  { %4129 = vmatprep.subr.bf16.mxu1 %v9077_v19  ;;  %v9131_v19 = vcombine.high %v845_v12, %v849_v13  ;;  %v889_v30 = vld [vmem:[#allocation7 + $0xef0] sm:$0xff] }
 0x2f1   :  { %v893_v13 = vld [vmem:[#allocation7 + $0xf10] sm:$0xff] }
 0x2f2   :  { %3966 = vmatpush1.bf16.msra.mxu0 %v9074_v24  ;;  %v857_v24 = vld [vmem:[#allocation7 + $0xdf0] sm:$0xff] }
 0x2f3   :  { %4130 = vmatpush1.bf16.msra.mxu1 %v9076_v25  ;;  %3976 = vmatprep.subr.bf16.mxu0 %v9083_v27  ;;  %v9139_v37 = vcombine.high %v853_v22, %v857_v24 }
 0x2f4   :  { %4140 = vmatprep.subr.bf16.mxu1 %v9085_v33  ;;  %v854_v33 = vld [vmem:[#allocation7 + $0xdd8] sm:$0xff] }
 0x2f5   :  { %3968 = vmatmul.mubr.bf16.vlgmr.msra.gmra.mrb[12].mxu0 %v10536_v16  ;;  %v9141_v38 = vcombine.high %v854_v33, %v858_v54 }
 0x2f6   :  { %4132 = vmatmul.mubr.bf16.vlgmr.msra.gmra.mrb[12].mxu1 %v10536_v16  ;;  %3977 = vmatpush1.bf16.msra.mxu0 %v9082_v0  ;;  %v9100_v16 = vcombine.low %v814_v43, %v818_v45  ;;  %v865_v43 = vld [vmem:[#allocation7 + $0xe30] sm:$0xff]  ;;  %v862_v45 = vld [vmem:[#allocation7 + $0xe18] sm:$0xff] }
 0x2f7   :  { %4008 = vmatprep.mubr.bf16.mxu0 %v10538_v23  ;;  %4141 = vmatpush1.bf16.msra.mxu1 %v9084_v36 }
 0x2f8   :  { %4172 = vmatprep.mubr.bf16.mxu1 %v10538_v23  ;;  %3978 = vmatprep.subr.bf16.mxu0 %v9091_v42  ;;  %v9106_v23 = vcombine.low %v821_v52, %v825_v53  ;;  %v9132_v42 = vcombine.low %v846_v14, %v850_v15  ;;  %v869_v53 = vld [vmem:[#allocation7 + $0xe50] sm:$0xff]  ;;  %v894_v15 = vld [vmem:[#allocation7 + $0xf18] sm:$0xff] }
 0x2f9   :  { %4142 = vmatprep.subr.bf16.mxu1 %v9093_v40  ;;  %v861_v40 = vld [vmem:[#allocation7 + $0xe10] sm:$0xff] }
 0x2fa   :  { %3979 = vmatpush1.bf16.msra.mxu0 %v9090_v46  ;;  %v866_v46 = vld [vmem:[#allocation7 + $0xe38] sm:$0xff]  ;;  %v897_v14 = vld [vmem:[#allocation7 + $0xf30] sm:$0xff] }
 0x2fb   :  { %4143 = vmatpush1.bf16.msra.mxu1 %v9092_v48  ;;  %3980 = vmatprep.subr.bf16.mxu0 %v9099_v49  ;;  %v9138_v48 = vcombine.low %v853_v22, %v857_v24  ;;  %v9140_v49 = vcombine.low %v854_v33, %v858_v54  ;;  %v9149_v52 = vcombine.high %v862_v45, %v866_v46  ;;  %v901_v24 = vld [vmem:[#allocation7 + $0xf50] sm:$0xff]  ;;  %v902_v54 = vld [vmem:[#allocation7 + $0xf58] sm:$0xff] }
 0x2fc   :  { %4144 = vmatprep.subr.bf16.mxu1 %v9101_v50  ;;  %v9147_v50 = vcombine.high %v861_v40, %v865_v43  ;;  %v905_v33 = vld [vmem:[#allocation7 + $0xf70] sm:$0xff] }
 0x2fe   :  { %3981 = vmatpush1.bf16.msra.mxu0 %v9098_v59  ;;  %v874_v59 = vld [vmem:[#allocation7 + $0xe78] sm:$0xff] }
 0x2ff   :  { %4145 = vmatpush1.bf16.msra.mxu1 %v9100_v16  ;;  %3982 = vmatprep.subr.bf16.mxu0 %v9107_v60  ;;  %v9146_v16 = vcombine.low %v861_v40, %v865_v43  ;;  %v9148_v60 = vcombine.low %v862_v45, %v866_v46  ;;  %v9157_v1 = vcombine.high %v870_v58, %v874_v59  ;;  %v914_v40 = vld [vmem:[#allocation7 + $0xfb8] sm:$0xff]  ;;  %v10575_v43 = vld [vmem:[#allocation8] sm:$0xff] }
 0x300   :  { %4146 = vmatprep.subr.bf16.mxu1 %v9109_v61  ;;  %v9155_v61 = vcombine.high %v869_v53, %v873_v56  ;;  %v9186_v45 = vcombine.low %v901_v24, %v905_v33 }
 0x302   :  { %3983 = vmatpush1.bf16.msra.mxu0 %v9106_v23  ;;  %v882_v23 = vld [vmem:[#allocation7 + $0xeb8] sm:$0xff] }
 0x303   :  { %4147 = vmatpush1.bf16.msra.mxu1 %v9108_v47  ;;  %3984 = vmatprep.subr.bf16.mxu0 %v9115_v4  ;;  %v9154_v47 = vcombine.low %v869_v53, %v873_v56  ;;  %v9156_v4 = vcombine.low %v870_v58, %v874_v59  ;;  %v9165_v7 = vcombine.high %v878_v55, %v882_v23  ;;  %v918_v56 = vld [vmem:[#allocation7 + $0xfd8] sm:$0xff] }
 0x304   :  { %4148 = vmatprep.subr.bf16.mxu1 %v9117_v5  ;;  %v9163_v5 = vcombine.high %v877_v2, %v881_v3  ;;  %v932_v53 = vrot.slane %v10575_v43, %v10471_v31  ;;  %v922_v58 = vld [vmem:[#allocation7 + $0xff8] sm:$0xff] }
 0x306   :  { %3985 = vmatpush1.bf16.msra.mxu0 %v9114_v9  ;;  %v890_v9 = vld [vmem:[#allocation7 + $0xef8] sm:$0xff] }
 0x307   :  { %4149 = vmatpush1.bf16.msra.mxu1 %v9116_v63  ;;  %3986 = vmatprep.subr.bf16.mxu0 %v9123_v10  ;;  %v9162_v63 = vcombine.low %v877_v2, %v881_v3  ;;  %v9164_v10 = vcombine.low %v878_v55, %v882_v23  ;;  %v9173_v12 = vcombine.high %v886_v62, %v890_v9  ;;  %v4201_v2 = vld [vmem:[#allocation10 + $0x20] sm:$0xff]  ;;  %v4198_v55 = vld [vmem:[#allocation10 + $0x8] sm:$0xff] }
 0x308   :  { %v10567_v20 = vpop.f32.mrb[8].mxu0  ;;  %v10569_v21 = vpop.f32.mrb[8].mxu1  ;;  %4150 = vmatprep.subr.bf16.mxu1 %v9125_v11  ;;  %v9171_v11 = vcombine.high %v885_v8, %v889_v30  ;;  %v4202_v23 = vld [vmem:[#allocation10 + $0x28] sm:$0xff] }
 0x309   :  { %v10571_v25 = vpop.f32.mrb[9].mxu0  ;;  %v10573_v27 = vpop.f32.mrb[9].mxu1 }
 0x30a   :  { %v3686_v34 = vpop.f32.mrb[10].mxu0  ;;  %v3850_v0 = vpop.f32.mrb[10].mxu1  ;;  %3987 = vmatpush1.bf16.msra.mxu0 %v9122_v17  ;;  %v898_v17 = vld [vmem:[#allocation7 + $0xf38] sm:$0xff]  ;;  %v9872_v3 = vadd.f32 %v10571_v25, %v932_v53  ;;  %v9208_v25 = vcombine.low %v4198_v55, %v4202_v23  ;;  %v4238_v53 = vld [vmem:[#allocation10 + $0x148] sm:$0xff] }
 0x30b   :  { %4151 = vmatpush1.bf16.msra.mxu1 %v9124_v51  ;;  %v3687_v28 = vpop.f32.mrb[11].mxu0  ;;  %v3851_v36 = vpop.f32.mrb[11].mxu1  ;;  %3988 = vmatprep.subr.bf16.mxu0 %v9131_v19  ;;  %v9170_v51 = vcombine.low %v885_v8, %v889_v30  ;;  %v9172_v19 = vcombine.low %v886_v62, %v890_v9  ;;  %v9181_v22 = vcombine.high %v894_v15, %v898_v17  ;;  %v906_v34 = vld [vmem:[#allocation7 + $0xf78] sm:$0xff]  ;;  %v4205_v30 = vld [vmem:[#allocation10 + $0x40] sm:$0xff] }
 0x30c   :  { %4152 = vmatprep.subr.bf16.mxu1 %v9133_v39  ;;  %v9179_v39 = vcombine.high %v893_v13, %v897_v14  ;;  %v9178_v0 = vcombine.low %v893_v13, %v897_v14  ;;  %v9187_v28 = vcombine.high %v901_v24, %v905_v33  ;;  %v9189_v36 = vcombine.high %v902_v54, %v906_v34  ;;  %v4209_v62 = vld [vmem:[#allocation10 + $0x60] sm:$0xff] }
 0x30d   :  { %v9188_v46 = vcombine.low %v902_v54, %v906_v34  ;;  %v4182_v8 = vmax.f32 %v9872_v3, 0.0  ;;  %v4217_v13 = vld [vmem:[#allocation10 + $0xa0] sm:$0xff]  ;;  %v4222_v34 = vld [vmem:[#allocation10 + $0xc8] sm:$0xff] }
 0x30e   :  { %3989 = vmatpush1.bf16.msra.mxu0 %v9130_v35  ;;  %v9180_v35 = vcombine.low %v894_v15, %v898_v17  ;;  %v4214_v17 = vld [vmem:[#allocation10 + $0x88] sm:$0xff]  ;;  %v4221_v33 = vld [vmem:[#allocation10 + $0xc0] sm:$0xff] }
 0x30f   :  { %4153 = vmatpush1.bf16.msra.mxu1 %v9132_v42  ;;  %3990 = vmatprep.subr.bf16.mxu0 %v9139_v37  ;;  %v909_v42 = vld [vmem:[#allocation7 + $0xf90] sm:$0xff]  ;;  %v10580_v14 = vpack.c.bf16 %v4182_v8, %v4182_v8  ;;  %v4225_v54 = vld [vmem:[#allocation10 + $0xe0] sm:$0xff] }
 0x310   :  { %4154 = vmatprep.subr.bf16.mxu1 %v9141_v38  ;;  %v913_v37 = vld [vmem:[#allocation7 + $0xfb0] sm:$0xff]  ;;  %v910_v38 = vld [vmem:[#allocation7 + $0xf98] sm:$0xff] }
 0x311   :  { %v9194_v59 = vcombine.low %v909_v42, %v913_v37  ;;  %v4250_v3 = vld [vmem:[#allocation10 + $0x1a8] sm:$0xff] }
 0x312   :  { %3991 = vmatpush1.bf16.msra.mxu0 %v9138_v48  ;;  %v9195_v48 = vcombine.high %v909_v42, %v913_v37  ;;  %v4229_v42 = vld [vmem:[#allocation10 + $0x100] sm:$0xff]  ;;  %v4254_v8 = vld [vmem:[#allocation10 + $0x1c8] sm:$0xff] }
 0x313   :  { %4155 = vmatpush1.bf16.msra.mxu1 %v9140_v49  ;;  %3992 = vmatprep.subr.bf16.mxu0 %v9147_v50  ;;  %v9197_v49 = vcombine.high %v910_v38, %v914_v40  ;;  %v917_v50 = vld [vmem:[#allocation7 + $0xfd0] sm:$0xff]  ;;  %v4233_v37 = vld [vmem:[#allocation10 + $0x120] sm:$0xff] }
 0x314   :  { %4156 = vmatprep.subr.bf16.mxu1 %v9149_v52  ;;  %v921_v52 = vld [vmem:[#allocation7 + $0xff0] sm:$0xff] }
 0x316   :  { %3993 = vmatpush1.bf16.msra.mxu0 %v9146_v16  ;;  %v9196_v16 = vcombine.low %v910_v38, %v914_v40  ;;  %v4230_v38 = vld [vmem:[#allocation10 + $0x108] sm:$0xff] }
 0x317   :  { %4157 = vmatpush1.bf16.msra.mxu1 %v9148_v60  ;;  %3994 = vmatprep.subr.bf16.mxu0 %v9155_v61  ;;  %v9203_v60 = vcombine.high %v917_v50, %v921_v52  ;;  %v9205_v61 = vcombine.high %v918_v56, %v922_v58  ;;  %v4234_v40 = vld [vmem:[#allocation10 + $0x128] sm:$0xff] }
 0x318   :  { %4158 = vmatprep.subr.bf16.mxu1 %v9157_v1  ;;  %v4197_v1 = vld [vmem:[#allocation10] sm:$0xff] }
 0x319   :  { %v9206_v9 = vcombine.low %v4197_v1, %v4201_v2 }
 0x31a   :  { %3995 = vmatpush1.bf16.msra.mxu0 %v9154_v47  ;;  %v9202_v47 = vcombine.low %v917_v50, %v921_v52  ;;  %v4237_v50 = vld [vmem:[#allocation10 + $0x140] sm:$0xff] }
 0x31b   :  { %4159 = vmatpush1.bf16.msra.mxu1 %v9156_v4  ;;  %3996 = vmatprep.subr.bf16.mxu0 %v9163_v5  ;;  %v9204_v4 = vcombine.low %v918_v56, %v922_v58  ;;  %v9207_v5 = vcombine.high %v4197_v1, %v4201_v2  ;;  %v4241_v52 = vld [vmem:[#allocation10 + $0x160] sm:$0xff]  ;;  %v4242_v56 = vld [vmem:[#allocation10 + $0x168] sm:$0xff]  ;;  %v9238_v58 = vcombine.low %v4229_v42, %v4233_v37 }
 0x31c   :  { %4160 = vmatprep.subr.bf16.mxu1 %v9165_v7  ;;  %v9209_v7 = vcombine.high %v4198_v55, %v4202_v23  ;;  %v4249_v1 = vld [vmem:[#allocation10 + $0x1a0] sm:$0xff]  ;;  %v4246_v2 = vld [vmem:[#allocation10 + $0x188] sm:$0xff]  ;;  %v9246_v55 = vcombine.low %v4237_v50, %v4241_v52  ;;  %v9248_v23 = vcombine.low %v4238_v53, %v4242_v56 }
 0x31e   :  { %3997 = vmatpush1.bf16.msra.mxu0 %v9162_v63  ;;  %v4206_v63 = vld [vmem:[#allocation10 + $0x48] sm:$0xff] }
 0x31f   :  { %4161 = vmatpush1.bf16.msra.mxu1 %v9164_v10  ;;  %3998 = vmatprep.subr.bf16.mxu0 %v9171_v11  ;;  %v4210_v10 = vld [vmem:[#allocation10 + $0x68] sm:$0xff]  ;;  %v9215_v11 = vcombine.high %v4205_v30, %v4209_v62 }
 0x320   :  { %4162 = vmatprep.subr.bf16.mxu1 %v9173_v12  ;;  %v4213_v12 = vld [vmem:[#allocation10 + $0x80] sm:$0xff]  ;;  %v9217_v15 = vcombine.high %v4206_v63, %v4210_v10 }
 0x322   :  { %3999 = vmatpush1.bf16.msra.mxu0 %v9170_v51  ;;  %v4218_v51 = vld [vmem:[#allocation10 + $0xa8] sm:$0xff] }
 0x323   :  { %4163 = vmatpush1.bf16.msra.mxu1 %v9172_v19  ;;  %4000 = vmatprep.subr.bf16.mxu0 %v9179_v39  ;;  %v9214_v19 = vcombine.low %v4205_v30, %v4209_v62  ;;  %v9216_v39 = vcombine.low %v4206_v63, %v4210_v10  ;;  %v9225_v24 = vcombine.high %v4214_v17, %v4218_v51  ;;  %v4258_v30 = vld [vmem:[#allocation10 + $0x1e8] sm:$0xff] }
 0x324   :  { %4164 = vmatprep.subr.bf16.mxu1 %v9181_v22  ;;  %v9223_v22 = vcombine.high %v4213_v12, %v4217_v13  ;;  %v9265_v10 = vcombine.high %v4254_v8, %v4258_v30 }
 0x326   :  { %4001 = vmatpush1.bf16.msra.mxu0 %v9178_v0  ;;  %v4226_v0 = vld [vmem:[#allocation10 + $0xe8] sm:$0xff] }
 0x327   :  { %4165 = vmatpush1.bf16.msra.mxu1 %v9180_v35  ;;  %4002 = vmatprep.subr.bf16.mxu0 %v9187_v28  ;;  %v9222_v35 = vcombine.low %v4213_v12, %v4217_v13  ;;  %v9231_v28 = vcombine.high %v4221_v33, %v4225_v54  ;;  %v4262_v12 = vld [vmem:[#allocation10 + $0x208] sm:$0xff] }
 0x328   :  { %4166 = vmatprep.subr.bf16.mxu1 %v9189_v36  ;;  %v9233_v36 = vcombine.high %v4222_v34, %v4226_v0  ;;  %v4266_v13 = vld [vmem:[#allocation10 + $0x228] sm:$0xff] }
 0x32a   :  { %4003 = vmatpush1.bf16.msra.mxu0 %v9186_v45  ;;  %v9230_v45 = vcombine.low %v4221_v33, %v4225_v54  ;;  %v4274_v33 = vld [vmem:[#allocation10 + $0x268] sm:$0xff] }
 0x32b   :  { %4167 = vmatpush1.bf16.msra.mxu1 %v9188_v46  ;;  %4004 = vmatprep.subr.bf16.mxu0 %v9195_v48  ;;  %v9232_v46 = vcombine.low %v4222_v34, %v4226_v0  ;;  %v9239_v48 = vcombine.high %v4229_v42, %v4233_v37  ;;  %v9272_v34 = vcombine.low %v4262_v12, %v4266_v13  ;;  %v4282_v42 = vld [vmem:[#allocation10 + $0x2a8] sm:$0xff] }
 0x32c   :  { %4168 = vmatprep.subr.bf16.mxu1 %v9197_v49  ;;  %v9241_v49 = vcombine.high %v4230_v38, %v4234_v40 }
 0x32e   :  { %4005 = vmatpush1.bf16.msra.mxu0 %v9194_v59  ;;  %v9240_v59 = vcombine.low %v4230_v38, %v4234_v40 }
 0x32f   :  { %4169 = vmatpush1.bf16.msra.mxu1 %v9196_v16  ;;  %4006 = vmatprep.subr.bf16.mxu0 %v9203_v60  ;;  %v9247_v16 = vcombine.high %v4237_v50, %v4241_v52  ;;  %v9249_v60 = vcombine.high %v4238_v53, %v4242_v56  ;;  %v4290_v50 = vld [vmem:[#allocation10 + $0x2e8] sm:$0xff] }
 0x330   :  { %4170 = vmatprep.subr.bf16.mxu1 %v9205_v61  ;;  %v4245_v61 = vld [vmem:[#allocation10 + $0x180] sm:$0xff] }
 0x331   :  { %v9254_v62 = vcombine.low %v4245_v61, %v4249_v1 }
 0x332   :  { %4007 = vmatpush1.bf16.msra.mxu0 %v9202_v47  ;;  %v9255_v47 = vcombine.high %v4245_v61, %v4249_v1  ;;  %v4298_v61 = vld [vmem:[#allocation10 + $0x328] sm:$0xff] }
 0x333   :  { %4171 = vmatpush1.bf16.msra.mxu1 %v9204_v4  ;;  %7311 = vmatprep.subr.bf16.mxu0 %v9207_v5  ;;  %v9257_v4 = vcombine.high %v4246_v2, %v4250_v3  ;;  %v4253_v5 = vld [vmem:[#allocation10 + $0x1c0] sm:$0xff] }
 0x334   :  { %7475 = vmatprep.subr.bf16.mxu1 %v9209_v7  ;;  %v4257_v7 = vld [vmem:[#allocation10 + $0x1e0] sm:$0xff] }
 0x335   :  { %4009 = vmatmul.mubr.bf16.vlgmr.msra.gmra.mrb[12].mxu0 %v10549_v6  ;;  %v9263_v63 = vcombine.high %v4253_v5, %v4257_v7 }
 0x336   :  { %4173 = vmatmul.mubr.bf16.vlgmr.msra.gmra.mrb[12].mxu1 %v10549_v6  ;;  %7312 = vmatpush1.bf16.msra.mxu0 %v9206_v9  ;;  %v9224_v6 = vcombine.low %v4214_v17, %v4218_v51  ;;  %v9256_v9 = vcombine.low %v4246_v2, %v4250_v3  ;;  %v9264_v17 = vcombine.low %v4254_v8, %v4258_v30 }
 0x337   :  { %7343 = vmatprep.mubr.bf16.mxu0 %v10580_v14  ;;  %7476 = vmatpush1.bf16.msra.mxu1 %v9208_v25  ;;  %v4261_v25 = vld [vmem:[#allocation10 + $0x200] sm:$0xff] }
 0x338   :  { %7507 = vmatprep.mubr.bf16.mxu1 %v10580_v14  ;;  %7313 = vmatprep.subr.bf16.mxu0 %v9215_v11  ;;  %v4265_v11 = vld [vmem:[#allocation10 + $0x220] sm:$0xff] }
 0x339   :  { %7477 = vmatprep.subr.bf16.mxu1 %v9217_v15  ;;  %v9262_v15 = vcombine.low %v4253_v5, %v4257_v7  ;;  %v9271_v51 = vcombine.high %v4261_v25, %v4265_v11  ;;  %v9270_v54 = vcombine.low %v4261_v25, %v4265_v11  ;;  %v4306_v5 = vld [vmem:[#allocation10 + $0x368] sm:$0xff] }
 0x33a   :  { %7314 = vmatpush1.bf16.msra.mxu0 %v9214_v19  ;;  %v9273_v19 = vcombine.high %v4262_v12, %v4266_v13  ;;  %v4314_v25 = vld [vmem:[#allocation10 + $0x3a8] sm:$0xff]  ;;  %v928_v12 = vrot.slane %v10575_v43, %v10466_v29 }
 0x33b   :  { %7478 = vmatpush1.bf16.msra.mxu1 %v9216_v39  ;;  %7315 = vmatprep.subr.bf16.mxu0 %v9223_v22  ;;  %v4269_v39 = vld [vmem:[#allocation10 + $0x240] sm:$0xff] }
 0x33c   :  { %7479 = vmatprep.subr.bf16.mxu1 %v9225_v24  ;;  %v4273_v22 = vld [vmem:[#allocation10 + $0x260] sm:$0xff]  ;;  %v4270_v24 = vld [vmem:[#allocation10 + $0x248] sm:$0xff] }
 0x33d   :  { %v9279_v0 = vcombine.high %v4269_v39, %v4273_v22  ;;  %v9278_v37 = vcombine.low %v4269_v39, %v4273_v22  ;;  %v9280_v38 = vcombine.low %v4270_v24, %v4274_v33  ;;  %v940_v39 = vrot.slane %v10575_v43, %v10474_v32  ;;  %v4318_v22 = vld [vmem:[#allocation10 + $0x3c8] sm:$0xff] }
 0x33e   :  { %7316 = vmatpush1.bf16.msra.mxu0 %v9222_v35  ;;  %v9281_v35 = vcombine.high %v4270_v24, %v4274_v33  ;;  %v4322_v24 = vld [vmem:[#allocation10 + $0x3e8] sm:$0xff] }
 0x33f   :  { %7480 = vmatpush1.bf16.msra.mxu1 %v9224_v6  ;;  %7317 = vmatprep.subr.bf16.mxu0 %v9231_v28  ;;  %v4277_v6 = vld [vmem:[#allocation10 + $0x280] sm:$0xff] }
 0x340   :  { %7481 = vmatprep.subr.bf16.mxu1 %v9233_v36  ;;  %v4281_v28 = vld [vmem:[#allocation10 + $0x2a0] sm:$0xff]  ;;  %v4278_v36 = vld [vmem:[#allocation10 + $0x288] sm:$0xff] }
 0x341   :  { %v9287_v40 = vcombine.high %v4277_v6, %v4281_v28  ;;  %v9286_v52 = vcombine.low %v4277_v6, %v4281_v28  ;;  %v9288_v53 = vcombine.low %v4278_v36, %v4282_v42  ;;  %v4325_v6 = vld [vmem:[#allocation10 + $0x400] sm:$0xff] }
 0x342   :  { %7318 = vmatpush1.bf16.msra.mxu0 %v9230_v45  ;;  %v9289_v45 = vcombine.high %v4278_v36, %v4282_v42  ;;  %v4329_v28 = vld [vmem:[#allocation10 + $0x420] sm:$0xff]  ;;  %v9874_v36 = vadd.f32 %v10573_v27, %v940_v39  ;;  %v4326_v42 = vld [vmem:[#allocation10 + $0x408] sm:$0xff] }
 0x343   :  { %7482 = vmatpush1.bf16.msra.mxu1 %v9232_v46  ;;  %7319 = vmatprep.subr.bf16.mxu0 %v9239_v48  ;;  %v4285_v46 = vld [vmem:[#allocation10 + $0x2c0] sm:$0xff] }
 0x344   :  { %7483 = vmatprep.subr.bf16.mxu1 %v9241_v49  ;;  %v4289_v48 = vld [vmem:[#allocation10 + $0x2e0] sm:$0xff]  ;;  %v4286_v49 = vld [vmem:[#allocation10 + $0x2c8] sm:$0xff] }
 0x345   :  { %v9295_v56 = vcombine.high %v4285_v46, %v4289_v48  ;;  %v9294_v1 = vcombine.low %v4285_v46, %v4289_v48  ;;  %v9296_v2 = vcombine.low %v4286_v49, %v4290_v50  ;;  %v9335_v46 = vcombine.high %v4325_v6, %v4329_v28  ;;  %v4365_v39 = vld [vmem:[#allocation10 + $0x540] sm:$0xff] }
 0x346   :  { %7320 = vmatpush1.bf16.msra.mxu0 %v9238_v58  ;;  %v9297_v58 = vcombine.high %v4286_v49, %v4290_v50  ;;  %v4184_v48 = vmax.f32 %v9874_v36, 0.0  ;;  %v4333_v49 = vld [vmem:[#allocation10 + $0x440] sm:$0xff]  ;;  %v4374_v36 = vld [vmem:[#allocation10 + $0x588] sm:$0xff] }
 0x347   :  { %7484 = vmatpush1.bf16.msra.mxu1 %v9240_v59  ;;  %7321 = vmatprep.subr.bf16.mxu0 %v9247_v16  ;;  %v4293_v59 = vld [vmem:[#allocation10 + $0x300] sm:$0xff] }
 0x348   :  { %7485 = vmatprep.subr.bf16.mxu1 %v9249_v60  ;;  %v4297_v16 = vld [vmem:[#allocation10 + $0x320] sm:$0xff]  ;;  %v4294_v60 = vld [vmem:[#allocation10 + $0x308] sm:$0xff] }
 0x349   :  { %v9303_v3 = vcombine.high %v4293_v59, %v4297_v16  ;;  %v9302_v7 = vcombine.low %v4293_v59, %v4297_v16  ;;  %v9304_v8 = vcombine.low %v4294_v60, %v4298_v61  ;;  %v4337_v50 = vld [vmem:[#allocation10 + $0x460] sm:$0xff] }
 0x34a   :  { %7322 = vmatpush1.bf16.msra.mxu0 %v9246_v55  ;;  %v9305_v55 = vcombine.high %v4294_v60, %v4298_v61  ;;  %v9343_v59 = vcombine.high %v4333_v49, %v4337_v50  ;;  %v4341_v16 = vld [vmem:[#allocation10 + $0x480] sm:$0xff]  ;;  %v10594_v61 = vpack.c.bf16 %v4184_v48, %v4184_v48  ;;  %v4382_v48 = vld [vmem:[#allocation10 + $0x5c8] sm:$0xff] }
 0x34b   :  { %7486 = vmatpush1.bf16.msra.mxu1 %v9248_v23  ;;  %7323 = vmatprep.subr.bf16.mxu0 %v9255_v47  ;;  %v4301_v23 = vld [vmem:[#allocation10 + $0x340] sm:$0xff] }
 0x34c   :  { %7487 = vmatprep.subr.bf16.mxu1 %v9257_v4  ;;  %v4305_v47 = vld [vmem:[#allocation10 + $0x360] sm:$0xff]  ;;  %v4302_v4 = vld [vmem:[#allocation10 + $0x348] sm:$0xff] }
 0x34d   :  { %v9311_v30 = vcombine.high %v4301_v23, %v4305_v47  ;;  %v9310_v11 = vcombine.low %v4301_v23, %v4305_v47  ;;  %v9312_v13 = vcombine.low %v4302_v4, %v4306_v5  ;;  %v4345_v60 = vld [vmem:[#allocation10 + $0x4a0] sm:$0xff] }
 0x34e   :  { %7324 = vmatpush1.bf16.msra.mxu0 %v9254_v62  ;;  %v9313_v62 = vcombine.high %v4302_v4, %v4306_v5  ;;  %v9351_v47 = vcombine.high %v4341_v16, %v4345_v60  ;;  %v4349_v5 = vld [vmem:[#allocation10 + $0x4c0] sm:$0xff] }
 0x34f   :  { %7488 = vmatpush1.bf16.msra.mxu1 %v9256_v9  ;;  %7325 = vmatprep.subr.bf16.mxu0 %v9263_v63  ;;  %v4309_v9 = vld [vmem:[#allocation10 + $0x380] sm:$0xff] }
 0x350   :  { %7489 = vmatprep.subr.bf16.mxu1 %v9265_v10  ;;  %v4313_v63 = vld [vmem:[#allocation10 + $0x3a0] sm:$0xff]  ;;  %v4310_v10 = vld [vmem:[#allocation10 + $0x388] sm:$0xff] }
 0x351   :  { %v9318_v33 = vcombine.low %v4309_v9, %v4313_v63 }
 0x352   :  { %7326 = vmatpush1.bf16.msra.mxu0 %v9262_v15  ;;  %v9319_v15 = vcombine.high %v4309_v9, %v4313_v63 }
 0x353   :  { %7490 = vmatpush1.bf16.msra.mxu1 %v9264_v17  ;;  %7327 = vmatprep.subr.bf16.mxu0 %v9271_v51  ;;  %v9321_v17 = vcombine.high %v4310_v10, %v4314_v25  ;;  %v4317_v51 = vld [vmem:[#allocation10 + $0x3c0] sm:$0xff] }
 0x354   :  { %7491 = vmatprep.subr.bf16.mxu1 %v9273_v19  ;;  %v4321_v19 = vld [vmem:[#allocation10 + $0x3e0] sm:$0xff] }
 0x356   :  { %7328 = vmatpush1.bf16.msra.mxu0 %v9270_v54  ;;  %v9871_v54 = vadd.f32 %v10567_v20, %v928_v12  ;;  %v4358_v12 = vld [vmem:[#allocation10 + $0x508] sm:$0xff] }
 0x357   :  { %7492 = vmatpush1.bf16.msra.mxu1 %v9272_v34  ;;  %7329 = vmatprep.subr.bf16.mxu0 %v9279_v0  ;;  %v9320_v34 = vcombine.low %v4310_v10, %v4314_v25  ;;  %v9327_v0 = vcombine.high %v4317_v51, %v4321_v19  ;;  %v4357_v25 = vld [vmem:[#allocation10 + $0x500] sm:$0xff] }
 0x358   :  { %7493 = vmatprep.subr.bf16.mxu1 %v9281_v35  ;;  %v9329_v35 = vcombine.high %v4318_v22, %v4322_v24 }
 0x35a   :  { %7330 = vmatpush1.bf16.msra.mxu0 %v9278_v37  ;;  %v4330_v37 = vld [vmem:[#allocation10 + $0x428] sm:$0xff] }
 0x35b   :  { %7494 = vmatpush1.bf16.msra.mxu1 %v9280_v38  ;;  %7331 = vmatprep.subr.bf16.mxu0 %v9287_v40  ;;  %v9326_v38 = vcombine.low %v4317_v51, %v4321_v19  ;;  %v4181_v40 = vmax.f32 %v9871_v54, 0.0  ;;  %v9337_v20 = vcombine.high %v4326_v42, %v4330_v37  ;;  %v9336_v27 = vcombine.low %v4326_v42, %v4330_v37  ;;  %v4378_v42 = vld [vmem:[#allocation10 + $0x5a8] sm:$0xff] }
 0x35c   :  { %7495 = vmatprep.subr.bf16.mxu1 %v9289_v45  ;;  %v9328_v45 = vcombine.low %v4318_v22, %v4322_v24  ;;  %v4369_v22 = vld [vmem:[#allocation10 + $0x560] sm:$0xff]  ;;  %v4366_v24 = vld [vmem:[#allocation10 + $0x548] sm:$0xff] }
 0x35d   :  { %v9374_v37 = vcombine.low %v4365_v39, %v4369_v22 }
 0x35e   :  { %7332 = vmatpush1.bf16.msra.mxu0 %v9286_v52  ;;  %v9334_v52 = vcombine.low %v4325_v6, %v4329_v28  ;;  %v4373_v6 = vld [vmem:[#allocation10 + $0x580] sm:$0xff] }
 0x35f   :  { %7496 = vmatpush1.bf16.msra.mxu1 %v9288_v53  ;;  %7333 = vmatprep.subr.bf16.mxu0 %v9295_v56  ;;  %v4334_v53 = vld [vmem:[#allocation10 + $0x448] sm:$0xff]  ;;  %v4377_v28 = vld [vmem:[#allocation10 + $0x5a0] sm:$0xff] }
 0x360   :  { %7497 = vmatprep.subr.bf16.mxu1 %v9297_v58  ;;  %v4338_v56 = vld [vmem:[#allocation10 + $0x468] sm:$0xff]  ;;  %v10592_v58 = vpack.c.bf16 %v4181_v40, %v4181_v40  ;;  %v9383_v40 = vcombine.high %v4373_v6, %v4377_v28 }
 0x361   :  { %v9344_v23 = vcombine.low %v4334_v53, %v4338_v56 }
 0x362   :  { %7334 = vmatpush1.bf16.msra.mxu0 %v9294_v1  ;;  %v9345_v1 = vcombine.high %v4334_v53, %v4338_v56 }
 0x363   :  { %7498 = vmatpush1.bf16.msra.mxu1 %v9296_v2  ;;  %7335 = vmatprep.subr.bf16.mxu0 %v9303_v3  ;;  %v4342_v2 = vld [vmem:[#allocation10 + $0x488] sm:$0xff] }
 0x364   :  { %7499 = vmatprep.subr.bf16.mxu1 %v9305_v55  ;;  %v4346_v3 = vld [vmem:[#allocation10 + $0x4a8] sm:$0xff]  ;;  %v9342_v55 = vcombine.low %v4333_v49, %v4337_v50  ;;  %v9382_v50 = vcombine.low %v4373_v6, %v4377_v28 }
 0x365   :  { %v9353_v4 = vcombine.high %v4342_v2, %v4346_v3  ;;  %v9352_v9 = vcombine.low %v4342_v2, %v4346_v3  ;;  %v4386_v49 = vld [vmem:[#allocation10 + $0x5e8] sm:$0xff] }
 0x366   :  { %7336 = vmatpush1.bf16.msra.mxu0 %v9302_v7  ;;  %v4353_v7 = vld [vmem:[#allocation10 + $0x4e0] sm:$0xff]  ;;  %v9393_v56 = vcombine.high %v4382_v48, %v4386_v49  ;;  %v9392_v2 = vcombine.low %v4382_v48, %v4386_v49  ;;  %v4426_v6 = vld [vmem:[#allocation10 + $0x728] sm:$0xff] }
 0x367   :  { %7500 = vmatpush1.bf16.msra.mxu1 %v9304_v8  ;;  %7337 = vmatprep.subr.bf16.mxu0 %v9311_v30  ;;  %v4350_v8 = vld [vmem:[#allocation10 + $0x4c8] sm:$0xff]  ;;  %v9359_v63 = vcombine.high %v4349_v5, %v4353_v7 }
 0x368   :  { %7501 = vmatprep.subr.bf16.mxu1 %v9313_v62  ;;  %v4354_v30 = vld [vmem:[#allocation10 + $0x4e8] sm:$0xff]  ;;  %v9350_v62 = vcombine.low %v4341_v16, %v4345_v60 }
 0x369   :  { %v9361_v10 = vcombine.high %v4350_v8, %v4354_v30  ;;  %v4390_v16 = vld [vmem:[#allocation10 + $0x608] sm:$0xff] }
 0x36a   :  { %7338 = vmatpush1.bf16.msra.mxu0 %v9310_v11  ;;  %v4361_v11 = vld [vmem:[#allocation10 + $0x520] sm:$0xff]  ;;  %v4394_v60 = vld [vmem:[#allocation10 + $0x628] sm:$0xff] }
 0x36b   :  { %7502 = vmatpush1.bf16.msra.mxu1 %v9312_v13  ;;  %7339 = vmatprep.subr.bf16.mxu0 %v9319_v15  ;;  %v4362_v13 = vld [vmem:[#allocation10 + $0x528] sm:$0xff]  ;;  %v9358_v15 = vcombine.low %v4349_v5, %v4353_v7  ;;  %v9367_v51 = vcombine.high %v4357_v25, %v4361_v11  ;;  %v9366_v54 = vcombine.low %v4357_v25, %v4361_v11 }
 0x36c   :  { %7503 = vmatprep.subr.bf16.mxu1 %v9321_v17  ;;  %v9360_v17 = vcombine.low %v4350_v8, %v4354_v30  ;;  %v9369_v19 = vcombine.high %v4358_v12, %v4362_v13  ;;  %v4402_v5 = vld [vmem:[#allocation10 + $0x668] sm:$0xff]  ;;  %v9400_v8 = vcombine.low %v4390_v16, %v4394_v60 }
 0x36d   :  { %v4410_v25 = vld [vmem:[#allocation10 + $0x6a8] sm:$0xff] }
 0x36e   :  { %7340 = vmatpush1.bf16.msra.mxu0 %v9318_v33  ;;  %v4370_v33 = vld [vmem:[#allocation10 + $0x568] sm:$0xff] }
 0x36f   :  { %7504 = vmatpush1.bf16.msra.mxu1 %v9320_v34  ;;  %7341 = vmatprep.subr.bf16.mxu0 %v9327_v0  ;;  %v9368_v34 = vcombine.low %v4358_v12, %v4362_v13  ;;  %v9375_v0 = vcombine.high %v4365_v39, %v4369_v22  ;;  %v4418_v39 = vld [vmem:[#allocation10 + $0x6e8] sm:$0xff] }
 0x370   :  { %7505 = vmatprep.subr.bf16.mxu1 %v9329_v35  ;;  %v9377_v35 = vcombine.high %v4366_v24, %v4370_v33 }
 0x372   :  { %7342 = vmatpush1.bf16.msra.mxu0 %v9326_v38  ;;  %v9376_v38 = vcombine.low %v4366_v24, %v4370_v33 }
 0x373   :  { %7506 = vmatpush1.bf16.msra.mxu1 %v9328_v45  ;;  %7352 = vmatprep.subr.bf16.mxu0 %v9335_v46  ;;  %v9385_v45 = vcombine.high %v4374_v36, %v4378_v42  ;;  %v4381_v46 = vld [vmem:[#allocation10 + $0x5c0] sm:$0xff] }
 0x374   :  { %7516 = vmatprep.subr.bf16.mxu1 %v9337_v20  ;;  %v4385_v20 = vld [vmem:[#allocation10 + $0x5e0] sm:$0xff] }
 0x375   :  { %7344 = vmatmul.mubr.bf16.vlgmr.msra.gmra.mrb[16].mxu0 %v10592_v58  ;;  %v9391_v53 = vcombine.high %v4381_v46, %v4385_v20 }
 0x376   :  { %7508 = vmatmul.mubr.bf16.vlgmr.msra.gmra.mrb[16].mxu1 %v10592_v58  ;;  %7353 = vmatpush1.bf16.msra.mxu0 %v9334_v52  ;;  %v9384_v52 = vcombine.low %v4374_v36, %v4378_v42 }
 0x377   :  { %7384 = vmatprep.mubr.bf16.mxu0 %v10594_v61  ;;  %7517 = vmatpush1.bf16.msra.mxu1 %v9336_v27  ;;  %v4389_v27 = vld [vmem:[#allocation10 + $0x600] sm:$0xff] }
 0x378   :  { %7548 = vmatprep.mubr.bf16.mxu1 %v10594_v61  ;;  %7354 = vmatprep.subr.bf16.mxu0 %v9343_v59  ;;  %v4393_v59 = vld [vmem:[#allocation10 + $0x620] sm:$0xff] }
 0x379   :  { %7518 = vmatprep.subr.bf16.mxu1 %v9345_v1  ;;  %v9390_v1 = vcombine.low %v4381_v46, %v4385_v20  ;;  %v9399_v3 = vcombine.high %v4389_v27, %v4393_v59  ;;  %v9398_v7 = vcombine.low %v4389_v27, %v4393_v59  ;;  %v4434_v46 = vld [vmem:[#allocation10 + $0x768] sm:$0xff] }
 0x37a   :  { %7355 = vmatpush1.bf16.msra.mxu0 %v9342_v55  ;;  %v9401_v55 = vcombine.high %v4390_v16, %v4394_v60  ;;  %v4442_v27 = vld [vmem:[#allocation10 + $0x7a8] sm:$0xff]  ;;  %v936_v16 = vrot.slane %v10575_v43, %v10501_v44 }
 0x37b   :  { %7519 = vmatpush1.bf16.msra.mxu1 %v9344_v23  ;;  %7356 = vmatprep.subr.bf16.mxu0 %v9351_v47  ;;  %v4397_v23 = vld [vmem:[#allocation10 + $0x640] sm:$0xff] }
 0x37c   :  { %7520 = vmatprep.subr.bf16.mxu1 %v9353_v4  ;;  %v4401_v47 = vld [vmem:[#allocation10 + $0x660] sm:$0xff]  ;;  %v4398_v4 = vld [vmem:[#allocation10 + $0x648] sm:$0xff] }
 0x37d   :  { %v9407_v30 = vcombine.high %v4397_v23, %v4401_v47  ;;  %v9406_v11 = vcombine.low %v4397_v23, %v4401_v47  ;;  %v9408_v12 = vcombine.low %v4398_v4, %v4402_v5  ;;  %v4446_v23 = vld [vmem:[#allocation10 + $0x7c8] sm:$0xff] }
 0x37e   :  { %7357 = vmatpush1.bf16.msra.mxu0 %v9350_v62  ;;  %v9409_v62 = vcombine.high %v4398_v4, %v4402_v5  ;;  %v4450_v47 = vld [vmem:[#allocation10 + $0x7e8] sm:$0xff]  ;;  %v9873_v5 = vadd.f32 %v10569_v21, %v936_v16  ;;  %v4461_v21 = vld [vmem:[#allocation10 + $0x840] sm:$0xff] }
 0x37f   :  { %7521 = vmatpush1.bf16.msra.mxu1 %v9352_v9  ;;  %7358 = vmatprep.subr.bf16.mxu0 %v9359_v63  ;;  %v4405_v9 = vld [vmem:[#allocation10 + $0x680] sm:$0xff]  ;;  %v9457_v43 = vcombine.high %v4446_v23, %v4450_v47 }
 0x380   :  { %7522 = vmatprep.subr.bf16.mxu1 %v9361_v10  ;;  %v4409_v63 = vld [vmem:[#allocation10 + $0x6a0] sm:$0xff]  ;;  %v4406_v10 = vld [vmem:[#allocation10 + $0x688] sm:$0xff] }
 0x381   :  { %v9415_v13 = vcombine.high %v4405_v9, %v4409_v63  ;;  %v9414_v22 = vcombine.low %v4405_v9, %v4409_v63  ;;  %v9416_v24 = vcombine.low %v4406_v10, %v4410_v25  ;;  %v4454_v9 = vld [vmem:[#allocation10 + $0x808] sm:$0xff] }
 0x382   :  { %7359 = vmatpush1.bf16.msra.mxu0 %v9358_v15  ;;  %v9417_v15 = vcombine.high %v4406_v10, %v4410_v25  ;;  %v4458_v63 = vld [vmem:[#allocation10 + $0x828] sm:$0xff]  ;;  %v4183_v25 = vmax.f32 %v9873_v5, 0.0 }
 0x383   :  { %7523 = vmatpush1.bf16.msra.mxu1 %v9360_v17  ;;  %7360 = vmatprep.subr.bf16.mxu0 %v9367_v51  ;;  %v4413_v17 = vld [vmem:[#allocation10 + $0x6c0] sm:$0xff] }
 0x384   :  { %7524 = vmatprep.subr.bf16.mxu1 %v9369_v19  ;;  %v4417_v51 = vld [vmem:[#allocation10 + $0x6e0] sm:$0xff]  ;;  %v4414_v19 = vld [vmem:[#allocation10 + $0x6c8] sm:$0xff] }
 0x385   :  { %v9423_v33 = vcombine.high %v4413_v17, %v4417_v51  ;;  %v9422_v28 = vcombine.low %v4413_v17, %v4417_v51  ;;  %v9424_v36 = vcombine.low %v4414_v19, %v4418_v39  ;;  %v4462_v17 = vld [vmem:[#allocation10 + $0x848] sm:$0xff] }
 0x386   :  { %7361 = vmatpush1.bf16.msra.mxu0 %v9366_v54  ;;  %v9425_v54 = vcombine.high %v4414_v19, %v4418_v39  ;;  %v4466_v51 = vld [vmem:[#allocation10 + $0x868] sm:$0xff]  ;;  %v10603_v39 = vpack.c.bf16 %v4183_v25, %v4183_v25  ;;  %v4509_v25 = vld [vmem:[#allocation10 + $0x9c0] sm:$0xff] }
 0x387   :  { %7525 = vmatpush1.bf16.msra.mxu1 %v9368_v34  ;;  %7362 = vmatprep.subr.bf16.mxu0 %v9375_v0  ;;  %v4421_v34 = vld [vmem:[#allocation10 + $0x700] sm:$0xff] }
 0x388   :  { %7526 = vmatprep.subr.bf16.mxu1 %v9377_v35  ;;  %v4425_v0 = vld [vmem:[#allocation10 + $0x720] sm:$0xff]  ;;  %v4422_v35 = vld [vmem:[#allocation10 + $0x708] sm:$0xff] }
 0x389   :  { %v9431_v42 = vcombine.high %v4421_v34, %v4425_v0  ;;  %v9430_v20 = vcombine.low %v4421_v34, %v4425_v0  ;;  %v9432_v48 = vcombine.low %v4422_v35, %v4426_v6  ;;  %v4473_v34 = vld [vmem:[#allocation10 + $0x8a0] sm:$0xff]  ;;  %v4470_v0 = vld [vmem:[#allocation10 + $0x888] sm:$0xff] }
 0x38a   :  { %7363 = vmatpush1.bf16.msra.mxu0 %v9374_v37  ;;  %v9433_v37 = vcombine.high %v4422_v35, %v4426_v6  ;;  %v4474_v35 = vld [vmem:[#allocation10 + $0x8a8] sm:$0xff] }
 0x38b   :  { %7527 = vmatpush1.bf16.msra.mxu1 %v9376_v38  ;;  %7364 = vmatprep.subr.bf16.mxu0 %v9383_v40  ;;  %v4429_v38 = vld [vmem:[#allocation10 + $0x740] sm:$0xff] }
 0x38c   :  { %7528 = vmatprep.subr.bf16.mxu1 %v9385_v45  ;;  %v4433_v40 = vld [vmem:[#allocation10 + $0x760] sm:$0xff]  ;;  %v4430_v45 = vld [vmem:[#allocation10 + $0x748] sm:$0xff] }
 0x38d   :  { %v9439_v49 = vcombine.high %v4429_v38, %v4433_v40  ;;  %v9438_v59 = vcombine.low %v4429_v38, %v4433_v40  ;;  %v9440_v60 = vcombine.low %v4430_v45, %v4434_v46  ;;  %v4481_v38 = vld [vmem:[#allocation10 + $0x8e0] sm:$0xff]  ;;  %v4478_v40 = vld [vmem:[#allocation10 + $0x8c8] sm:$0xff] }
 0x38e   :  { %7365 = vmatpush1.bf16.msra.mxu0 %v9382_v50  ;;  %v9441_v50 = vcombine.high %v4430_v45, %v4434_v46  ;;  %v4482_v45 = vld [vmem:[#allocation10 + $0x8e8] sm:$0xff] }
 0x38f   :  { %7529 = vmatpush1.bf16.msra.mxu1 %v9384_v52  ;;  %7366 = vmatprep.subr.bf16.mxu0 %v9391_v53  ;;  %v4437_v52 = vld [vmem:[#allocation10 + $0x780] sm:$0xff] }
 0x390   :  { %7530 = vmatprep.subr.bf16.mxu1 %v9393_v56  ;;  %v4441_v53 = vld [vmem:[#allocation10 + $0x7a0] sm:$0xff]  ;;  %v4438_v56 = vld [vmem:[#allocation10 + $0x788] sm:$0xff] }
 0x391   :  { %v9446_v4 = vcombine.low %v4437_v52, %v4441_v53 }
 0x392   :  { %7367 = vmatpush1.bf16.msra.mxu0 %v9390_v1  ;;  %v9447_v1 = vcombine.high %v4437_v52, %v4441_v53  ;;  %v4489_v52 = vld [vmem:[#allocation10 + $0x920] sm:$0xff]  ;;  %v4486_v53 = vld [vmem:[#allocation10 + $0x908] sm:$0xff] }
 0x393   :  { %7531 = vmatpush1.bf16.msra.mxu1 %v9392_v2  ;;  %7368 = vmatprep.subr.bf16.mxu0 %v9399_v3  ;;  %v9449_v2 = vcombine.high %v4438_v56, %v4442_v27  ;;  %v4445_v3 = vld [vmem:[#allocation10 + $0x7c0] sm:$0xff] }
 0x394   :  { %7532 = vmatprep.subr.bf16.mxu1 %v9401_v55  ;;  %v4449_v55 = vld [vmem:[#allocation10 + $0x7e0] sm:$0xff] }
 0x395   :  { %v9454_v10 = vcombine.low %v4445_v3, %v4449_v55 }
 0x396   :  { %7369 = vmatpush1.bf16.msra.mxu0 %v9398_v7  ;;  %v9448_v7 = vcombine.low %v4438_v56, %v4442_v27  ;;  %v4490_v56 = vld [vmem:[#allocation10 + $0x928] sm:$0xff] }
 0x397   :  { %7533 = vmatpush1.bf16.msra.mxu1 %v9400_v8  ;;  %7370 = vmatprep.subr.bf16.mxu0 %v9407_v30  ;;  %v9455_v8 = vcombine.high %v4445_v3, %v4449_v55  ;;  %v4453_v30 = vld [vmem:[#allocation10 + $0x800] sm:$0xff]  ;;  %v4494_v3 = vld [vmem:[#allocation10 + $0x948] sm:$0xff] }
 0x398   :  { %7534 = vmatprep.subr.bf16.mxu1 %v9409_v62  ;;  %v4457_v62 = vld [vmem:[#allocation10 + $0x820] sm:$0xff]  ;;  %v4498_v55 = vld [vmem:[#allocation10 + $0x968] sm:$0xff] }
 0x399   :  { %v9462_v19 = vcombine.low %v4453_v30, %v4457_v62  ;;  %v9505_v5 = vcombine.high %v4494_v3, %v4498_v55 }
 0x39a   :  { %7371 = vmatpush1.bf16.msra.mxu0 %v9406_v11  ;;  %v9456_v11 = vcombine.low %v4446_v23, %v4450_v47  ;;  %v9496_v47 = vcombine.low %v4486_v53, %v4490_v56 }
 0x39b   :  { %7535 = vmatpush1.bf16.msra.mxu1 %v9408_v12  ;;  %7372 = vmatprep.subr.bf16.mxu0 %v9415_v13  ;;  %v9463_v12 = vcombine.high %v4453_v30, %v4457_v62  ;;  %v9465_v13 = vcombine.high %v4454_v9, %v4458_v63  ;;  %v4506_v30 = vld [vmem:[#allocation10 + $0x9a8] sm:$0xff] }
 0x39c   :  { %7536 = vmatprep.subr.bf16.mxu1 %v9417_v15  ;;  %v4465_v15 = vld [vmem:[#allocation10 + $0x860] sm:$0xff] }
 0x39d   :  { %v9470_v6 = vcombine.low %v4461_v21, %v4465_v15 }
 0x39e   :  { %7373 = vmatpush1.bf16.msra.mxu0 %v9414_v22  ;;  %v9464_v22 = vcombine.low %v4454_v9, %v4458_v63  ;;  %v9504_v9 = vcombine.low %v4494_v3, %v4498_v55 }
 0x39f   :  { %7537 = vmatpush1.bf16.msra.mxu1 %v9416_v24  ;;  %7374 = vmatprep.subr.bf16.mxu0 %v9423_v33  ;;  %v9471_v24 = vcombine.high %v4461_v21, %v4465_v15  ;;  %v9473_v33 = vcombine.high %v4462_v17, %v4466_v51 }
 0x3a0   :  { %7538 = vmatprep.subr.bf16.mxu1 %v9425_v54  ;;  %v4469_v54 = vld [vmem:[#allocation10 + $0x880] sm:$0xff] }
 0x3a1   :  { %v9478_v46 = vcombine.low %v4469_v54, %v4473_v34 }
 0x3a2   :  { %7375 = vmatpush1.bf16.msra.mxu0 %v9422_v28  ;;  %v9472_v28 = vcombine.low %v4462_v17, %v4466_v51 }
 0x3a3   :  { %7539 = vmatpush1.bf16.msra.mxu1 %v9424_v36  ;;  %7376 = vmatprep.subr.bf16.mxu0 %v9431_v42  ;;  %v9479_v36 = vcombine.high %v4469_v54, %v4473_v34  ;;  %v9481_v42 = vcombine.high %v4470_v0, %v4474_v35 }
 0x3a4   :  { %7540 = vmatprep.subr.bf16.mxu1 %v9433_v37  ;;  %v4477_v37 = vld [vmem:[#allocation10 + $0x8c0] sm:$0xff] }
 0x3a5   :  { %v9486_v27 = vcombine.low %v4477_v37, %v4481_v38 }
 0x3a6   :  { %7377 = vmatpush1.bf16.msra.mxu0 %v9430_v20  ;;  %v9480_v20 = vcombine.low %v4470_v0, %v4474_v35 }
 0x3a7   :  { %7541 = vmatpush1.bf16.msra.mxu1 %v9432_v48  ;;  %7378 = vmatprep.subr.bf16.mxu0 %v9439_v49  ;;  %v9487_v48 = vcombine.high %v4477_v37, %v4481_v38  ;;  %v9489_v49 = vcombine.high %v4478_v40, %v4482_v45 }
 0x3a8   :  { %7542 = vmatprep.subr.bf16.mxu1 %v9441_v50  ;;  %v4485_v50 = vld [vmem:[#allocation10 + $0x900] sm:$0xff] }
 0x3a9   :  { %v9495_v16 = vcombine.high %v4485_v50, %v4489_v52  ;;  %v9494_v23 = vcombine.low %v4485_v50, %v4489_v52 }
 0x3aa   :  { %7379 = vmatpush1.bf16.msra.mxu0 %v9438_v59  ;;  %v9488_v59 = vcombine.low %v4478_v40, %v4482_v45 }
 0x3ab   :  { %7543 = vmatpush1.bf16.msra.mxu1 %v9440_v60  ;;  %7380 = vmatprep.subr.bf16.mxu0 %v9447_v1  ;;  %v9497_v60 = vcombine.high %v4486_v53, %v4490_v56  ;;  %v4493_v1 = vld [vmem:[#allocation10 + $0x940] sm:$0xff] }
 0x3ac   :  { %7544 = vmatprep.subr.bf16.mxu1 %v9449_v2  ;;  %v4497_v2 = vld [vmem:[#allocation10 + $0x960] sm:$0xff] }
 0x3ad   :  { %v9502_v62 = vcombine.low %v4493_v1, %v4497_v2 }
 0x3ae   :  { %7381 = vmatpush1.bf16.msra.mxu0 %v9446_v4  ;;  %v9503_v4 = vcombine.high %v4493_v1, %v4497_v2 }
 0x3af   :  { %7545 = vmatpush1.bf16.msra.mxu1 %v9448_v7  ;;  %7382 = vmatprep.subr.bf16.mxu0 %v9455_v8  ;;  %v4501_v7 = vld [vmem:[#allocation10 + $0x980] sm:$0xff] }
 0x3b0   :  { %7546 = vmatprep.subr.bf16.mxu1 %v9457_v43  ;;  %v4505_v8 = vld [vmem:[#allocation10 + $0x9a0] sm:$0xff]  ;;  %v4502_v43 = vld [vmem:[#allocation10 + $0x988] sm:$0xff] }
 0x3b1   :  { %v9511_v63 = vcombine.high %v4501_v7, %v4505_v8  ;;  %v9510_v21 = vcombine.low %v4501_v7, %v4505_v8  ;;  %v9512_v15 = vcombine.low %v4502_v43, %v4506_v30 }
 0x3b2   :  { %7383 = vmatpush1.bf16.msra.mxu0 %v9454_v10  ;;  %v9513_v10 = vcombine.high %v4502_v43, %v4506_v30 }
 0x3b3   :  { %7547 = vmatpush1.bf16.msra.mxu1 %v9456_v11  ;;  %7393 = vmatprep.subr.bf16.mxu0 %v9463_v12  ;;  %v4513_v11 = vld [vmem:[#allocation10 + $0x9e0] sm:$0xff]  ;;  %v4510_v12 = vld [vmem:[#allocation10 + $0x9c8] sm:$0xff] }
 0x3b4   :  { %7557 = vmatprep.subr.bf16.mxu1 %v9465_v13  ;;  %v4514_v13 = vld [vmem:[#allocation10 + $0x9e8] sm:$0xff]  ;;  %v9519_v17 = vcombine.high %v4509_v25, %v4513_v11  ;;  %v9518_v54 = vcombine.low %v4509_v25, %v4513_v11 }
 0x3b5   :  { %7385 = vmatmul.mubr.bf16.vlgmr.msra.gmra.mrb[16].mxu0 %v10603_v39  ;;  %v9521_v51 = vcombine.high %v4510_v12, %v4514_v13  ;;  %v9520_v34 = vcombine.low %v4510_v12, %v4514_v13 }
 0x3b6   :  { %7549 = vmatmul.mubr.bf16.vlgmr.msra.gmra.mrb[16].mxu1 %v10603_v39  ;;  %7394 = vmatpush1.bf16.msra.mxu0 %v9462_v19  ;;  %v4517_v19 = vld [vmem:[#allocation10 + $0xa00] sm:$0xff] }
 0x3b7   :  { %7558 = vmatpush1.bf16.msra.mxu1 %v9464_v22  ;;  %7395 = vmatprep.subr.bf16.mxu0 %v9471_v24  ;;  %v4521_v22 = vld [vmem:[#allocation10 + $0xa20] sm:$0xff]  ;;  %v4518_v24 = vld [vmem:[#allocation10 + $0xa08] sm:$0xff] }
 0x3b8   :  { %7559 = vmatprep.subr.bf16.mxu1 %v9473_v33  ;;  %v4522_v33 = vld [vmem:[#allocation10 + $0xa28] sm:$0xff]  ;;  %v9527_v0 = vcombine.high %v4517_v19, %v4521_v22  ;;  %v9526_v37 = vcombine.low %v4517_v19, %v4521_v22 }
 0x3b9   :  { %v9529_v35 = vcombine.high %v4518_v24, %v4522_v33  ;;  %v9528_v38 = vcombine.low %v4518_v24, %v4522_v33 }
 0x3ba   :  { %7396 = vmatpush1.bf16.msra.mxu0 %v9470_v6  ;;  %v4525_v6 = vld [vmem:[#allocation10 + $0xa40] sm:$0xff] }
 0x3bb   :  { %7560 = vmatpush1.bf16.msra.mxu1 %v9472_v28  ;;  %7397 = vmatprep.subr.bf16.mxu0 %v9479_v36  ;;  %v4529_v28 = vld [vmem:[#allocation10 + $0xa60] sm:$0xff]  ;;  %v4526_v36 = vld [vmem:[#allocation10 + $0xa48] sm:$0xff] }
 0x3bc   :  { %7561 = vmatprep.subr.bf16.mxu1 %v9481_v42  ;;  %v4530_v42 = vld [vmem:[#allocation10 + $0xa68] sm:$0xff]  ;;  %v9535_v40 = vcombine.high %v4525_v6, %v4529_v28  ;;  %v9534_v50 = vcombine.low %v4525_v6, %v4529_v28 }
 0x3bd   :  { %v9537_v45 = vcombine.high %v4526_v36, %v4530_v42  ;;  %v9536_v52 = vcombine.low %v4526_v36, %v4530_v42 }
 0x3be   :  { %7398 = vmatpush1.bf16.msra.mxu0 %v9478_v46  ;;  %v4533_v46 = vld [vmem:[#allocation10 + $0xa80] sm:$0xff] }
 0x3bf   :  { %7562 = vmatpush1.bf16.msra.mxu1 %v9480_v20  ;;  %7399 = vmatprep.subr.bf16.mxu0 %v9487_v48  ;;  %v4537_v20 = vld [vmem:[#allocation10 + $0xaa0] sm:$0xff]  ;;  %v4534_v48 = vld [vmem:[#allocation10 + $0xa88] sm:$0xff] }
 0x3c0   :  { %7563 = vmatprep.subr.bf16.mxu1 %v9489_v49  ;;  %v4538_v49 = vld [vmem:[#allocation10 + $0xaa8] sm:$0xff]  ;;  %v9543_v53 = vcombine.high %v4533_v46, %v4537_v20  ;;  %v9542_v1 = vcombine.low %v4533_v46, %v4537_v20 }
 0x3c1   :  { %v9545_v56 = vcombine.high %v4534_v48, %v4538_v49  ;;  %v9544_v2 = vcombine.low %v4534_v48, %v4538_v49 }
 0x3c2   :  { %7400 = vmatpush1.bf16.msra.mxu0 %v9486_v27  ;;  %v4541_v27 = vld [vmem:[#allocation10 + $0xac0] sm:$0xff] }
 0x3c3   :  { %7564 = vmatpush1.bf16.msra.mxu1 %v9488_v59  ;;  %7401 = vmatprep.subr.bf16.mxu0 %v9495_v16  ;;  %v4545_v59 = vld [vmem:[#allocation10 + $0xae0] sm:$0xff]  ;;  %v4542_v16 = vld [vmem:[#allocation10 + $0xac8] sm:$0xff] }
 0x3c4   :  { %7565 = vmatprep.subr.bf16.mxu1 %v9497_v60  ;;  %v4546_v60 = vld [vmem:[#allocation10 + $0xae8] sm:$0xff]  ;;  %v9551_v3 = vcombine.high %v4541_v27, %v4545_v59  ;;  %v9550_v7 = vcombine.low %v4541_v27, %v4545_v59 }
 0x3c5   :  { %v9553_v55 = vcombine.high %v4542_v16, %v4546_v60  ;;  %v9552_v8 = vcombine.low %v4542_v16, %v4546_v60 }
 0x3c6   :  { %7402 = vmatpush1.bf16.msra.mxu0 %v9494_v23  ;;  %v4549_v23 = vld [vmem:[#allocation10 + $0xb00] sm:$0xff] }
 0x3c7   :  { %7566 = vmatpush1.bf16.msra.mxu1 %v9496_v47  ;;  %7403 = vmatprep.subr.bf16.mxu0 %v9503_v4  ;;  %v4553_v47 = vld [vmem:[#allocation10 + $0xb20] sm:$0xff]  ;;  %v4550_v4 = vld [vmem:[#allocation10 + $0xb08] sm:$0xff] }
 0x3c8   :  { %7567 = vmatprep.subr.bf16.mxu1 %v9505_v5  ;;  %v4554_v5 = vld [vmem:[#allocation10 + $0xb28] sm:$0xff]  ;;  %v9559_v43 = vcombine.high %v4549_v23, %v4553_v47  ;;  %v9558_v25 = vcombine.low %v4549_v23, %v4553_v47 }
 0x3c9   :  { %v9561_v30 = vcombine.high %v4550_v4, %v4554_v5  ;;  %v9560_v11 = vcombine.low %v4550_v4, %v4554_v5 }
 0x3ca   :  { %7404 = vmatpush1.bf16.msra.mxu0 %v9502_v62  ;;  %v4557_v62 = vld [vmem:[#allocation10 + $0xb40] sm:$0xff] }
 0x3cb   :  { %7568 = vmatpush1.bf16.msra.mxu1 %v9504_v9  ;;  %7405 = vmatprep.subr.bf16.mxu0 %v9511_v63  ;;  %v4561_v9 = vld [vmem:[#allocation10 + $0xb60] sm:$0xff]  ;;  %v4558_v63 = vld [vmem:[#allocation10 + $0xb48] sm:$0xff] }
 0x3cc   :  { %7569 = vmatprep.subr.bf16.mxu1 %v9513_v10  ;;  %v4562_v10 = vld [vmem:[#allocation10 + $0xb68] sm:$0xff]  ;;  %v9567_v12 = vcombine.high %v4557_v62, %v4561_v9  ;;  %v9566_v19 = vcombine.low %v4557_v62, %v4561_v9 }
 0x3cd   :  { %v9569_v13 = vcombine.high %v4558_v63, %v4562_v10  ;;  %v9568_v22 = vcombine.low %v4558_v63, %v4562_v10  ;;  %v4590_v62 = vld [vmem:[#allocation10 + $0xc48] sm:$0xff] }
 0x3ce   :  { %7406 = vmatpush1.bf16.msra.mxu0 %v9510_v21  ;;  %v4565_v21 = vld [vmem:[#allocation10 + $0xb80] sm:$0xff]  ;;  %v4594_v9 = vld [vmem:[#allocation10 + $0xc68] sm:$0xff] }
 0x3cf   :  { %7570 = vmatpush1.bf16.msra.mxu1 %v9512_v15  ;;  %7407 = vmatprep.subr.bf16.mxu0 %v9519_v17  ;;  %v4569_v15 = vld [vmem:[#allocation10 + $0xba0] sm:$0xff]  ;;  %v4566_v17 = vld [vmem:[#allocation10 + $0xb88] sm:$0xff] }
 0x3d0   :  { %7571 = vmatprep.subr.bf16.mxu1 %v9521_v51  ;;  %v4570_v51 = vld [vmem:[#allocation10 + $0xba8] sm:$0xff]  ;;  %v9575_v24 = vcombine.high %v4565_v21, %v4569_v15  ;;  %v9574_v6 = vcombine.low %v4565_v21, %v4569_v15  ;;  %v9601_v21 = vcombine.high %v4590_v62, %v4594_v9  ;;  %v4601_v15 = vld [vmem:[#allocation10 + $0xca0] sm:$0xff] }
 0x3d1   :  { %v9577_v33 = vcombine.high %v4566_v17, %v4570_v51  ;;  %v9576_v28 = vcombine.low %v4566_v17, %v4570_v51  ;;  %v4598_v17 = vld [vmem:[#allocation10 + $0xc88] sm:$0xff] }
 0x3d2   :  { %7408 = vmatpush1.bf16.msra.mxu0 %v9518_v54  ;;  %v4573_v54 = vld [vmem:[#allocation10 + $0xbc0] sm:$0xff]  ;;  %v4602_v51 = vld [vmem:[#allocation10 + $0xca8] sm:$0xff] }
 0x3d3   :  { %7572 = vmatpush1.bf16.msra.mxu1 %v9520_v34  ;;  %7409 = vmatprep.subr.bf16.mxu0 %v9527_v0  ;;  %v4577_v34 = vld [vmem:[#allocation10 + $0xbe0] sm:$0xff]  ;;  %v4574_v0 = vld [vmem:[#allocation10 + $0xbc8] sm:$0xff] }
 0x3d4   :  { %7573 = vmatprep.subr.bf16.mxu1 %v9529_v35  ;;  %v4578_v35 = vld [vmem:[#allocation10 + $0xbe8] sm:$0xff]  ;;  %v9583_v36 = vcombine.high %v4573_v54, %v4577_v34  ;;  %v9582_v46 = vcombine.low %v4573_v54, %v4577_v34  ;;  %v9609_v54 = vcombine.high %v4598_v17, %v4602_v51  ;;  %v4605_v34 = vld [vmem:[#allocation10 + $0xcc0] sm:$0xff] }
 0x3d5   :  { %v9585_v42 = vcombine.high %v4574_v0, %v4578_v35  ;;  %v9584_v20 = vcombine.low %v4574_v0, %v4578_v35  ;;  %v4609_v0 = vld [vmem:[#allocation10 + $0xce0] sm:$0xff]  ;;  %v4606_v35 = vld [vmem:[#allocation10 + $0xcc8] sm:$0xff] }
 0x3d6   :  { %7410 = vmatpush1.bf16.msra.mxu0 %v9526_v37  ;;  %v4581_v37 = vld [vmem:[#allocation10 + $0xc00] sm:$0xff] }
 0x3d7   :  { %7574 = vmatpush1.bf16.msra.mxu1 %v9528_v38  ;;  %7411 = vmatprep.subr.bf16.mxu0 %v9535_v40  ;;  %v4585_v38 = vld [vmem:[#allocation10 + $0xc20] sm:$0xff]  ;;  %v4582_v40 = vld [vmem:[#allocation10 + $0xc08] sm:$0xff] }
 0x3d8   :  { %7575 = vmatprep.subr.bf16.mxu1 %v9537_v45  ;;  %v4586_v45 = vld [vmem:[#allocation10 + $0xc28] sm:$0xff]  ;;  %v9591_v48 = vcombine.high %v4581_v37, %v4585_v38  ;;  %v9590_v10 = vcombine.low %v4581_v37, %v4585_v38  ;;  %v4613_v38 = vld [vmem:[#allocation10 + $0xd00] sm:$0xff] }
 0x3d9   :  { %v9593_v49 = vcombine.high %v4582_v40, %v4586_v45 }
 0x3da   :  { %7412 = vmatpush1.bf16.msra.mxu0 %v9534_v50  ;;  %v10607_v50 = vld [vmem:[#allocation8] sm:$0xff] }
 0x3db   :  { %7576 = vmatpush1.bf16.msra.mxu1 %v9536_v52  ;;  %7413 = vmatprep.subr.bf16.mxu0 %v9543_v53  ;;  %v944_v52 = vrot.slane %v10607_v50, %v10525_v26  ;;  %v948_v53 = vrot.slane %v10607_v50, %v10508_v57 }
 0x3dc   :  { %7577 = vmatprep.subr.bf16.mxu1 %v9545_v56  ;;  %v956_v56 = vrot.slane %v10607_v50, %v10528_v41 }
 0x3de   :  { %7414 = vmatpush1.bf16.msra.mxu0 %v9542_v1 }
 0x3df   :  { %7578 = vmatpush1.bf16.msra.mxu1 %v9544_v2  ;;  %7415 = vmatprep.subr.bf16.mxu0 %v9551_v3 }
 0x3e0   :  { %7579 = vmatprep.subr.bf16.mxu1 %v9553_v55 }
 0x3e2   :  { %7416 = vmatpush1.bf16.msra.mxu0 %v9550_v7 }
 0x3e3   :  { %7580 = vmatpush1.bf16.msra.mxu1 %v9552_v8  ;;  %7417 = vmatprep.subr.bf16.mxu0 %v9559_v43  ;;  %v4589_v8 = vld [vmem:[#allocation10 + $0xc40] sm:$0xff] }
 0x3e4   :  { %7581 = vmatprep.subr.bf16.mxu1 %v9561_v30  ;;  %v4593_v30 = vld [vmem:[#allocation10 + $0xc60] sm:$0xff] }
 0x3e6   :  { %7418 = vmatpush1.bf16.msra.mxu0 %v9558_v25  ;;  %v9592_v25 = vcombine.low %v4582_v40, %v4586_v45  ;;  %v4617_v40 = vld [vmem:[#allocation10 + $0xd20] sm:$0xff]  ;;  %v4614_v45 = vld [vmem:[#allocation10 + $0xd08] sm:$0xff] }
 0x3e7   :  { %7582 = vmatpush1.bf16.msra.mxu1 %v9560_v11  ;;  %7419 = vmatprep.subr.bf16.mxu0 %v9567_v12  ;;  %v4597_v12 = vld [vmem:[#allocation10 + $0xc80] sm:$0xff] }
 0x3e8   :  { %7583 = vmatprep.subr.bf16.mxu1 %v9569_v13  ;;  %v9599_v13 = vcombine.high %v4589_v8, %v4593_v30 }
 0x3ea   :  { %7420 = vmatpush1.bf16.msra.mxu0 %v9566_v19 }
 0x3eb   :  { %7584 = vmatpush1.bf16.msra.mxu1 %v9568_v22  ;;  %7421 = vmatprep.subr.bf16.mxu0 %v9575_v24  ;;  %v9598_v22 = vcombine.low %v4589_v8, %v4593_v30  ;;  %v9600_v24 = vcombine.low %v4590_v62, %v4594_v9  ;;  %v4637_v30 = vld [vmem:[#allocation10 + $0xdc0] sm:$0xff]  ;;  %v4638_v9 = vld [vmem:[#allocation10 + $0xdc8] sm:$0xff] }
 0x3ec   :  { %7585 = vmatprep.subr.bf16.mxu1 %v9577_v33  ;;  %v9607_v33 = vcombine.high %v4597_v12, %v4601_v15  ;;  %v4641_v62 = vld [vmem:[#allocation10 + $0xde0] sm:$0xff] }
 0x3ee   :  { %7422 = vmatpush1.bf16.msra.mxu0 %v9574_v6  ;;  %v4610_v6 = vld [vmem:[#allocation10 + $0xce8] sm:$0xff] }
 0x3ef   :  { %7586 = vmatpush1.bf16.msra.mxu1 %v9576_v28  ;;  %7423 = vmatprep.subr.bf16.mxu0 %v9583_v36  ;;  %v9606_v28 = vcombine.low %v4597_v12, %v4601_v15  ;;  %v9608_v36 = vcombine.low %v4598_v17, %v4602_v51  ;;  %v9617_v37 = vcombine.high %v4606_v35, %v4610_v6  ;;  %v4645_v15 = vld [vmem:[#allocation10 + $0xe00] sm:$0xff]  ;;  %v4646_v51 = vld [vmem:[#allocation10 + $0xe08] sm:$0xff] }
 0x3f0   :  { %7587 = vmatprep.subr.bf16.mxu1 %v9585_v42  ;;  %v9615_v42 = vcombine.high %v4605_v34, %v4609_v0  ;;  %v4649_v17 = vld [vmem:[#allocation10 + $0xe20] sm:$0xff] }
 0x3f2   :  { %7424 = vmatpush1.bf16.msra.mxu0 %v9582_v46  ;;  %v4618_v46 = vld [vmem:[#allocation10 + $0xd28] sm:$0xff] }
 0x3f3   :  { %7588 = vmatpush1.bf16.msra.mxu1 %v9584_v20  ;;  %7434 = vmatprep.subr.bf16.mxu0 %v9591_v48  ;;  %v9614_v20 = vcombine.low %v4605_v34, %v4609_v0  ;;  %v9616_v48 = vcombine.low %v4606_v35, %v4610_v6  ;;  %v4653_v0 = vld [vmem:[#allocation10 + $0xe40] sm:$0xff]  ;;  %v4654_v6 = vld [vmem:[#allocation10 + $0xe48] sm:$0xff] }
 0x3f4   :  { %7598 = vmatprep.subr.bf16.mxu1 %v9593_v49  ;;  %v9623_v49 = vcombine.high %v4613_v38, %v4617_v40  ;;  %v4657_v35 = vld [vmem:[#allocation10 + $0xe60] sm:$0xff] }
 0x408   :  { %v4010_v27 = vpop.f32.mrb[12].mxu0 }
 0x409   :  { %v9875_v59 = vadd.f32 %v4010_v27, %v944_v52  ;;  %v10615_v16 = vpop.f32.mrb[12].mxu1  ;;  %v4012_v60 = vpop.f32.mrb[13].mxu0  ;;  %v9625_v52 = vcombine.high %v4614_v45, %v4618_v46  ;;  %v4622_v27 = vld [vmem:[#allocation10 + $0xd48] sm:$0xff] }
 0x40a   :  { %v9876_v1 = vadd.f32 %v4012_v60, %v948_v53  ;;  %v4176_v2 = vpop.f32.mrb[13].mxu1  ;;  %v4014_v3 = vpop.f32.mrb[14].mxu0  ;;  %v4621_v53 = vld [vmem:[#allocation10 + $0xd40] sm:$0xff]  ;;  %v9622_v60 = vcombine.low %v4613_v38, %v4617_v40 }
 0x40b   :  { %v4185_v55 = vmax.f32 %v9875_v59, 0.0  ;;  %v9878_v23 = vadd.f32 %v4176_v2, %v956_v56  ;;  %v4178_v47 = vpop.f32.mrb[14].mxu1  ;;  %v4015_v4 = vpop.f32.mrb[15].mxu0  ;;  %v4625_v56 = vld [vmem:[#allocation10 + $0xd60] sm:$0xff]  ;;  %v4626_v59 = vld [vmem:[#allocation10 + $0xd68] sm:$0xff] }
 0x40c   :  { %v4186_v5 = vmax.f32 %v9876_v1, 0.0  ;;  %v4179_v7 = vpop.f32.mrb[15].mxu1  ;;  %v9624_v1 = vcombine.low %v4614_v45, %v4618_v46  ;;  %v9631_v2 = vcombine.high %v4621_v53, %v4625_v56  ;;  %v9633_v3 = vcombine.high %v4622_v27, %v4626_v59  ;;  %v4630_v47 = vld [vmem:[#allocation10 + $0xd88] sm:$0xff]  ;;  %v4661_v40 = vld [vmem:[#allocation10 + $0xe80] sm:$0xff] }
 0x40d   :  { %v4188_v43 = vmax.f32 %v9878_v23, 0.0  ;;  %v10619_v11 = vpack.c.bf16 %v4185_v55, %v4185_v55  ;;  %v4629_v55 = vld [vmem:[#allocation10 + $0xd80] sm:$0xff]  ;;  %v4634_v4 = vld [vmem:[#allocation10 + $0xda8] sm:$0xff]  ;;  %v9632_v7 = vcombine.low %v4622_v27, %v4626_v59 }
 0x40e   :  { %v10617_v63 = vpack.c.bf16 %v4186_v5, %v4186_v5  ;;  %v4633_v23 = vld [vmem:[#allocation10 + $0xda0] sm:$0xff]  ;;  %v9630_v5 = vcombine.low %v4621_v53, %v4625_v56  ;;  %v9640_v12 = vcombine.low %v4630_v47, %v4634_v4  ;;  %v4662_v46 = vld [vmem:[#allocation10 + $0xe88] sm:$0xff] }
 0x40f   :  { %v10623_v19 = vpack.c.bf16 %v4188_v43, %v4188_v43  ;;  %v9639_v8 = vcombine.high %v4629_v55, %v4633_v23  ;;  %v9641_v43 = vcombine.high %v4630_v47, %v4634_v4  ;;  %v4665_v45 = vld [vmem:[#allocation10 + $0xea0] sm:$0xff]  ;;  %v4670_v59 = vld [vmem:[#allocation10 + $0xec8] sm:$0xff] }
 0x410   :  { %7425 = vmatprep.mubr.bf16.mxu0 %v10617_v63  ;;  %7589 = vmatprep.mubr.bf16.mxu1 %v10617_v63  ;;  %v4669_v56 = vld [vmem:[#allocation10 + $0xec0] sm:$0xff]  ;;  %v4678_v4 = vld [vmem:[#allocation10 + $0xf08] sm:$0xff] }
 0x411   :  { %7426 = vmatmul.mubr.bf16.vlgmr.msra.gmra.mrb[16].mxu0 %v10619_v11  ;;  %7590 = vmatmul.mubr.bf16.vlgmr.msra.gmra.mrb[16].mxu1 %v10619_v11  ;;  %v4673_v27 = vld [vmem:[#allocation10 + $0xee0] sm:$0xff] }
 0x412   :  { %7435 = vmatpush1.bf16.msra.mxu0 %v9590_v10  ;;  %7599 = vmatpush1.bf16.msra.mxu1 %v9592_v25  ;;  %v4642_v10 = vld [vmem:[#allocation10 + $0xde8] sm:$0xff]  ;;  %v9638_v25 = vcombine.low %v4629_v55, %v4633_v23  ;;  %v4677_v23 = vld [vmem:[#allocation10 + $0xf00] sm:$0xff] }
 0x413   :  { %7466 = vmatprep.mubr.bf16.mxu0 %v10623_v19  ;;  %7630 = vmatprep.mubr.bf16.mxu1 %v10623_v19  ;;  %v4681_v47 = vld [vmem:[#allocation10 + $0xf20] sm:$0xff] }
 0x414   :  { %7436 = vmatprep.subr.bf16.mxu0 %v9599_v13  ;;  %7600 = vmatprep.subr.bf16.mxu1 %v9601_v21  ;;  %v9647_v13 = vcombine.high %v4637_v30, %v4641_v62  ;;  %v9649_v21 = vcombine.high %v4638_v9, %v4642_v10 }
 0x416   :  { %7437 = vmatpush1.bf16.msra.mxu0 %v9598_v22  ;;  %7601 = vmatpush1.bf16.msra.mxu1 %v9600_v24  ;;  %v4650_v22 = vld [vmem:[#allocation10 + $0xe28] sm:$0xff]  ;;  %v9646_v24 = vcombine.low %v4637_v30, %v4641_v62  ;;  %v4685_v62 = vld [vmem:[#allocation10 + $0xf40] sm:$0xff] }
 0x417   :  { %7438 = vmatprep.subr.bf16.mxu0 %v9607_v33  ;;  %7602 = vmatprep.subr.bf16.mxu1 %v9609_v54  ;;  %v9648_v33 = vcombine.low %v4638_v9, %v4642_v10  ;;  %v9655_v54 = vcombine.high %v4645_v15, %v4649_v17  ;;  %v9657_v34 = vcombine.high %v4646_v51, %v4650_v22  ;;  %v4689_v9 = vld [vmem:[#allocation10 + $0xf60] sm:$0xff]  ;;  %v4686_v10 = vld [vmem:[#allocation10 + $0xf48] sm:$0xff] }
 0x41a   :  { %7439 = vmatpush1.bf16.msra.mxu0 %v9606_v28  ;;  %7603 = vmatpush1.bf16.msra.mxu1 %v9608_v36  ;;  %v4658_v28 = vld [vmem:[#allocation10 + $0xe68] sm:$0xff]  ;;  %v9654_v36 = vcombine.low %v4645_v15, %v4649_v17  ;;  %v4693_v17 = vld [vmem:[#allocation10 + $0xf80] sm:$0xff] }
 0x41b   :  { %7440 = vmatprep.subr.bf16.mxu0 %v9615_v42  ;;  %7604 = vmatprep.subr.bf16.mxu1 %v9617_v37  ;;  %v9656_v42 = vcombine.low %v4646_v51, %v4650_v22  ;;  %v9663_v37 = vcombine.high %v4653_v0, %v4657_v35  ;;  %v9665_v38 = vcombine.high %v4654_v6, %v4658_v28  ;;  %v4697_v51 = vld [vmem:[#allocation10 + $0xfa0] sm:$0xff]  ;;  %v4694_v22 = vld [vmem:[#allocation10 + $0xf88] sm:$0xff] }
 0x41e   :  { %7441 = vmatpush1.bf16.msra.mxu0 %v9614_v20  ;;  %7605 = vmatpush1.bf16.msra.mxu1 %v9616_v48  ;;  %v4666_v20 = vld [vmem:[#allocation10 + $0xea8] sm:$0xff]  ;;  %v9662_v48 = vcombine.low %v4653_v0, %v4657_v35  ;;  %v9703_v0 = vcombine.high %v4693_v17, %v4697_v51 }
 0x41f   :  { %7442 = vmatprep.subr.bf16.mxu0 %v9623_v49  ;;  %7606 = vmatprep.subr.bf16.mxu1 %v9625_v52  ;;  %v9664_v49 = vcombine.low %v4654_v6, %v4658_v28  ;;  %v9671_v52 = vcombine.high %v4661_v40, %v4665_v45  ;;  %v9673_v53 = vcombine.high %v4662_v46, %v4666_v20  ;;  %v4701_v6 = vld [vmem:[#allocation10 + $0xfc0] sm:$0xff] }
 0x420   :  { %v4705_v28 = vld [vmem:[#allocation10 + $0xfe0] sm:$0xff] }
 0x422   :  { %7443 = vmatpush1.bf16.msra.mxu0 %v9622_v60  ;;  %7607 = vmatpush1.bf16.msra.mxu1 %v9624_v1  ;;  %v4674_v60 = vld [vmem:[#allocation10 + $0xee8] sm:$0xff]  ;;  %v9670_v1 = vcombine.low %v4661_v40, %v4665_v45  ;;  %v9711_v45 = vcombine.high %v4701_v6, %v4705_v28 }
 0x423   :  { %7444 = vmatprep.subr.bf16.mxu0 %v9631_v2  ;;  %7608 = vmatprep.subr.bf16.mxu1 %v9633_v3  ;;  %v9672_v2 = vcombine.low %v4662_v46, %v4666_v20  ;;  %v9679_v3 = vcombine.high %v4669_v56, %v4673_v27  ;;  %v9681_v55 = vcombine.high %v4670_v59, %v4674_v60  ;;  %v4199_v20 = vld [vmem:[#allocation10 + $0x10] sm:$0xff] }
 0x426   :  { %7445 = vmatpush1.bf16.msra.mxu0 %v9630_v5  ;;  %7609 = vmatpush1.bf16.msra.mxu1 %v9632_v7  ;;  %v4682_v5 = vld [vmem:[#allocation10 + $0xf28] sm:$0xff]  ;;  %v9678_v7 = vcombine.low %v4669_v56, %v4673_v27 }
 0x427   :  { %7446 = vmatprep.subr.bf16.mxu0 %v9639_v8  ;;  %7610 = vmatprep.subr.bf16.mxu1 %v9641_v43  ;;  %v9680_v8 = vcombine.low %v4670_v59, %v4674_v60  ;;  %v9687_v43 = vcombine.high %v4677_v23, %v4681_v47  ;;  %v9689_v30 = vcombine.high %v4678_v4, %v4682_v5  ;;  %v4207_v60 = vld [vmem:[#allocation10 + $0x50] sm:$0xff] }
 0x42a   :  { %7447 = vmatpush1.bf16.msra.mxu0 %v9638_v25  ;;  %7611 = vmatpush1.bf16.msra.mxu1 %v9640_v12  ;;  %v4690_v25 = vld [vmem:[#allocation10 + $0xf68] sm:$0xff]  ;;  %v9686_v12 = vcombine.low %v4677_v23, %v4681_v47 }
 0x42b   :  { %7448 = vmatprep.subr.bf16.mxu0 %v9647_v13  ;;  %7612 = vmatprep.subr.bf16.mxu1 %v9649_v21  ;;  %v9688_v13 = vcombine.low %v4678_v4, %v4682_v5  ;;  %v9695_v21 = vcombine.high %v4685_v62, %v4689_v9  ;;  %v9697_v15 = vcombine.high %v4686_v10, %v4690_v25  ;;  %v4215_v5 = vld [vmem:[#allocation10 + $0x90] sm:$0xff] }
 0x42e   :  { %7449 = vmatpush1.bf16.msra.mxu0 %v9646_v24  ;;  %7613 = vmatpush1.bf16.msra.mxu1 %v9648_v33  ;;  %v4698_v24 = vld [vmem:[#allocation10 + $0xfa8] sm:$0xff]  ;;  %v9694_v33 = vcombine.low %v4685_v62, %v4689_v9 }
 0x42f   :  { %7450 = vmatprep.subr.bf16.mxu0 %v9655_v54  ;;  %7614 = vmatprep.subr.bf16.mxu1 %v9657_v34  ;;  %v9696_v54 = vcombine.low %v4686_v10, %v4690_v25  ;;  %v952_v34 = vrot.slane %v10607_v50, %v10545_v18  ;;  %v9705_v35 = vcombine.high %v4694_v22, %v4698_v24  ;;  %v4203_v50 = vld [vmem:[#allocation10 + $0x30] sm:$0xff] }
 0x430   :  { %v9211_v27 = vcombine.high %v4199_v20, %v4203_v50  ;;  %v4223_v25 = vld [vmem:[#allocation10 + $0xd0] sm:$0xff] }
 0x431   :  { %v9877_v40 = vadd.f32 %v10615_v16, %v952_v34  ;;  %v4208_v16 = vld [vmem:[#allocation10 + $0x58] sm:$0xff] }
 0x432   :  { %7451 = vmatpush1.bf16.msra.mxu0 %v9654_v36  ;;  %7615 = vmatpush1.bf16.msra.mxu1 %v9656_v42  ;;  %v4702_v36 = vld [vmem:[#allocation10 + $0xfc8] sm:$0xff] }
 0x433   :  { %7452 = vmatprep.subr.bf16.mxu0 %v9663_v37  ;;  %7616 = vmatprep.subr.bf16.mxu1 %v9665_v38  ;;  %v4706_v42 = vld [vmem:[#allocation10 + $0xfe8] sm:$0xff]  ;;  %v9702_v37 = vcombine.low %v4693_v17, %v4697_v51  ;;  %v9704_v38 = vcombine.low %v4694_v22, %v4698_v24  ;;  %v4187_v56 = vmax.f32 %v9877_v40, 0.0  ;;  %v4231_v24 = vld [vmem:[#allocation10 + $0x110] sm:$0xff] }
 0x434   :  { %v9713_v46 = vcombine.high %v4702_v36, %v4706_v42 }
 0x436   :  { %7453 = vmatpush1.bf16.msra.mxu0 %v9662_v48  ;;  %7617 = vmatpush1.bf16.msra.mxu1 %v9664_v49  ;;  %v4200_v48 = vld [vmem:[#allocation10 + $0x18] sm:$0xff] }
 0x437   :  { %7454 = vmatprep.subr.bf16.mxu0 %v9671_v52  ;;  %7618 = vmatprep.subr.bf16.mxu1 %v9673_v53  ;;  %v4204_v49 = vld [vmem:[#allocation10 + $0x38] sm:$0xff]  ;;  %v9710_v52 = vcombine.low %v4701_v6, %v4705_v28  ;;  %v9712_v53 = vcombine.low %v4702_v36, %v4706_v42  ;;  %v4239_v28 = vld [vmem:[#allocation10 + $0x150] sm:$0xff] }
 0x438   :  { %v9213_v59 = vcombine.high %v4200_v48, %v4204_v49  ;;  %v9212_v23 = vcombine.low %v4200_v48, %v4204_v49  ;;  %v4243_v36 = vld [vmem:[#allocation10 + $0x170] sm:$0xff]  ;;  %v4240_v42 = vld [vmem:[#allocation10 + $0x158] sm:$0xff] }
 0x439   :  { %v4248_v48 = vld [vmem:[#allocation10 + $0x198] sm:$0xff] }
 0x43a   :  { %7455 = vmatpush1.bf16.msra.mxu0 %v9670_v1  ;;  %7619 = vmatpush1.bf16.msra.mxu1 %v9672_v2  ;;  %v4211_v1 = vld [vmem:[#allocation10 + $0x70] sm:$0xff]  ;;  %v4212_v2 = vld [vmem:[#allocation10 + $0x78] sm:$0xff] }
 0x43b   :  { %7456 = vmatprep.subr.bf16.mxu0 %v9679_v3  ;;  %7620 = vmatprep.subr.bf16.mxu1 %v9681_v55  ;;  %v9210_v3 = vcombine.low %v4199_v20, %v4203_v50  ;;  %v10632_v55 = vpack.c.bf16 %v4187_v56, %v4187_v56  ;;  %v9219_v47 = vcombine.high %v4207_v60, %v4211_v1  ;;  %v4247_v20 = vld [vmem:[#allocation10 + $0x190] sm:$0xff]  ;;  %v4252_v49 = vld [vmem:[#allocation10 + $0x1b8] sm:$0xff] }
 0x43c   :  { %v9221_v4 = vcombine.high %v4208_v16, %v4212_v2  ;;  %v9220_v62 = vcombine.low %v4208_v16, %v4212_v2  ;;  %v4251_v50 = vld [vmem:[#allocation10 + $0x1b0] sm:$0xff]  ;;  %v4260_v16 = vld [vmem:[#allocation10 + $0x1f8] sm:$0xff] }
 0x43d   :  { %v9259_v56 = vcombine.high %v4247_v20, %v4251_v50  ;;  %v9258_v2 = vcombine.low %v4247_v20, %v4251_v50  ;;  %v4299_v20 = vld [vmem:[#allocation10 + $0x330] sm:$0xff]  ;;  %v4296_v50 = vld [vmem:[#allocation10 + $0x318] sm:$0xff] }
 0x43e   :  { %7457 = vmatpush1.bf16.msra.mxu0 %v9678_v7  ;;  %7621 = vmatpush1.bf16.msra.mxu1 %v9680_v8  ;;  %v4219_v7 = vld [vmem:[#allocation10 + $0xb0] sm:$0xff]  ;;  %v4216_v8 = vld [vmem:[#allocation10 + $0x98] sm:$0xff] }
 0x43f   :  { %7458 = vmatprep.subr.bf16.mxu0 %v9687_v43  ;;  %7622 = vmatprep.subr.bf16.mxu1 %v9689_v30  ;;  %v4220_v43 = vld [vmem:[#allocation10 + $0xb8] sm:$0xff]  ;;  %v9218_v30 = vcombine.low %v4207_v60, %v4211_v1  ;;  %v9227_v9 = vcombine.high %v4215_v5, %v4219_v7  ;;  %v4259_v60 = vld [vmem:[#allocation10 + $0x1f0] sm:$0xff] }
 0x440   :  { %v9229_v10 = vcombine.high %v4216_v8, %v4220_v43  ;;  %v9228_v17 = vcombine.low %v4216_v8, %v4220_v43  ;;  %v4256_v1 = vld [vmem:[#allocation10 + $0x1d8] sm:$0xff] }
 0x441   :  { %v4268_v8 = vld [vmem:[#allocation10 + $0x238] sm:$0xff] }
 0x442   :  { %7459 = vmatpush1.bf16.msra.mxu0 %v9686_v12  ;;  %7623 = vmatpush1.bf16.msra.mxu1 %v9688_v13  ;;  %v4227_v12 = vld [vmem:[#allocation10 + $0xf0] sm:$0xff]  ;;  %v4224_v13 = vld [vmem:[#allocation10 + $0xd8] sm:$0xff] }
 0x443   :  { %7460 = vmatprep.subr.bf16.mxu0 %v9695_v21  ;;  %7624 = vmatprep.subr.bf16.mxu1 %v9697_v15  ;;  %v4228_v21 = vld [vmem:[#allocation10 + $0xf8] sm:$0xff]  ;;  %v9226_v15 = vcombine.low %v4215_v5, %v4219_v7  ;;  %v9235_v51 = vcombine.high %v4223_v25, %v4227_v12  ;;  %v9234_v34 = vcombine.low %v4223_v25, %v4227_v12  ;;  %v4267_v5 = vld [vmem:[#allocation10 + $0x230] sm:$0xff] }
 0x444   :  { %v9237_v22 = vcombine.high %v4224_v13, %v4228_v21  ;;  %v4264_v7 = vld [vmem:[#allocation10 + $0x218] sm:$0xff]  ;;  %v4275_v25 = vld [vmem:[#allocation10 + $0x270] sm:$0xff] }
 0x445   :  { %v4272_v12 = vld [vmem:[#allocation10 + $0x258] sm:$0xff] }
 0x446   :  { %7461 = vmatpush1.bf16.msra.mxu0 %v9694_v33  ;;  %7625 = vmatpush1.bf16.msra.mxu1 %v9696_v54  ;;  %v4235_v33 = vld [vmem:[#allocation10 + $0x130] sm:$0xff]  ;;  %v4236_v54 = vld [vmem:[#allocation10 + $0x138] sm:$0xff] }
 0x447   :  { %7462 = vmatprep.subr.bf16.mxu0 %v9703_v0  ;;  %7626 = vmatprep.subr.bf16.mxu1 %v9705_v35  ;;  %v9236_v0 = vcombine.low %v4224_v13, %v4228_v21  ;;  %v9243_v35 = vcombine.high %v4231_v24, %v4235_v33  ;;  %v4276_v13 = vld [vmem:[#allocation10 + $0x278] sm:$0xff] }
 0x44a   :  { %7463 = vmatpush1.bf16.msra.mxu0 %v9702_v37  ;;  %7627 = vmatpush1.bf16.msra.mxu1 %v9704_v38  ;;  %v4244_v37 = vld [vmem:[#allocation10 + $0x178] sm:$0xff]  ;;  %v9242_v38 = vcombine.low %v4231_v24, %v4235_v33  ;;  %v4283_v24 = vld [vmem:[#allocation10 + $0x2b0] sm:$0xff] }
 0x44b   :  { %7464 = vmatprep.subr.bf16.mxu0 %v9711_v45  ;;  %7628 = vmatprep.subr.bf16.mxu1 %v9713_v46  ;;  %v9251_v45 = vcombine.high %v4239_v28, %v4243_v36  ;;  %v9253_v46 = vcombine.high %v4240_v42, %v4244_v37  ;;  %v4280_v33 = vld [vmem:[#allocation10 + $0x298] sm:$0xff] }
 0x44e   :  { %7465 = vmatpush1.bf16.msra.mxu0 %v9710_v52  ;;  %7629 = vmatpush1.bf16.msra.mxu1 %v9712_v53  ;;  %v9250_v52 = vcombine.low %v4239_v28, %v4243_v36  ;;  %v9252_v53 = vcombine.low %v4240_v42, %v4244_v37  ;;  %v4291_v28 = vld [vmem:[#allocation10 + $0x2f0] sm:$0xff]  ;;  %v4288_v36 = vld [vmem:[#allocation10 + $0x2d8] sm:$0xff] }
 0x44f   :  { %7639 = vmatprep.subr.bf16.mxu0 %v9211_v27  ;;  %7803 = vmatprep.subr.bf16.mxu1 %v9213_v59  ;;  %v9261_v27 = vcombine.high %v4248_v48, %v4252_v49  ;;  %v4255_v59 = vld [vmem:[#allocation10 + $0x1d0] sm:$0xff]  ;;  %v4292_v42 = vld [vmem:[#allocation10 + $0x2f8] sm:$0xff] }
 0x450   :  { %v9266_v43 = vcombine.low %v4255_v59, %v4259_v60 }
 0x451   :  { %7467 = vmatmul.mubr.bf16.vlgmr.msra.gmra.mrb[16].mxu0 %v10632_v55  ;;  %7631 = vmatmul.mubr.bf16.vlgmr.msra.gmra.mrb[16].mxu1 %v10632_v55 }
 0x452   :  { %7640 = vmatpush1.bf16.msra.mxu0 %v9210_v3  ;;  %7671 = vmatprep.mubr.bf16.mxu0 %v10580_v14  ;;  %v9260_v3 = vcombine.low %v4248_v48, %v4252_v49  ;;  %v4300_v48 = vld [vmem:[#allocation10 + $0x338] sm:$0xff] }
 0x453   :  { %7804 = vmatpush1.bf16.msra.mxu1 %v9212_v23  ;;  %7835 = vmatprep.mubr.bf16.mxu1 %v10580_v14  ;;  %v4232_v14 = vld [vmem:[#allocation10 + $0x118] sm:$0xff]  ;;  %v9267_v23 = vcombine.high %v4255_v59, %v4259_v60  ;;  %v4307_v59 = vld [vmem:[#allocation10 + $0x370] sm:$0xff] }
 0x454   :  { %7641 = vmatprep.subr.bf16.mxu0 %v9219_v47  ;;  %7805 = vmatprep.subr.bf16.mxu1 %v9221_v4  ;;  %v9245_v6 = vcombine.high %v4232_v14, %v4236_v54  ;;  %v9244_v40 = vcombine.low %v4232_v14, %v4236_v54  ;;  %v9269_v47 = vcombine.high %v4256_v1, %v4260_v16  ;;  %v4263_v4 = vld [vmem:[#allocation10 + $0x210] sm:$0xff]  ;;  %v4284_v14 = vld [vmem:[#allocation10 + $0x2b8] sm:$0xff] }
 0x455   :  { %v9274_v21 = vcombine.low %v4263_v4, %v4267_v5  ;;  %v4304_v60 = vld [vmem:[#allocation10 + $0x358] sm:$0xff] }
 0x456   :  { %7642 = vmatpush1.bf16.msra.mxu0 %v9218_v30  ;;  %v9268_v30 = vcombine.low %v4256_v1, %v4260_v16  ;;  %v4308_v1 = vld [vmem:[#allocation10 + $0x378] sm:$0xff] }
 0x457   :  { %7806 = vmatpush1.bf16.msra.mxu1 %v9220_v62  ;;  %7643 = vmatprep.subr.bf16.mxu0 %v9227_v9  ;;  %v9275_v62 = vcombine.high %v4263_v4, %v4267_v5  ;;  %v9277_v9 = vcombine.high %v4264_v7, %v4268_v8  ;;  %v4315_v4 = vld [vmem:[#allocation10 + $0x3b0] sm:$0xff]  ;;  %v4312_v5 = vld [vmem:[#allocation10 + $0x398] sm:$0xff] }
 0x458   :  { %7807 = vmatprep.subr.bf16.mxu1 %v9229_v10  ;;  %v4271_v10 = vld [vmem:[#allocation10 + $0x250] sm:$0xff] }
 0x459   :  { %v9282_v54 = vcombine.low %v4271_v10, %v4275_v25 }
 0x45a   :  { %7644 = vmatpush1.bf16.msra.mxu0 %v9226_v15  ;;  %v9276_v15 = vcombine.low %v4264_v7, %v4268_v8  ;;  %v4316_v7 = vld [vmem:[#allocation10 + $0x3b8] sm:$0xff] }
 0x45b   :  { %7808 = vmatpush1.bf16.msra.mxu1 %v9228_v17  ;;  %7645 = vmatprep.subr.bf16.mxu0 %v9235_v51  ;;  %v9283_v17 = vcombine.high %v4271_v10, %v4275_v25  ;;  %v9285_v51 = vcombine.high %v4272_v12, %v4276_v13  ;;  %v4323_v10 = vld [vmem:[#allocation10 + $0x3f0] sm:$0xff]  ;;  %v4320_v25 = vld [vmem:[#allocation10 + $0x3d8] sm:$0xff] }
 0x45c   :  { %7809 = vmatprep.subr.bf16.mxu1 %v9237_v22  ;;  %v4279_v22 = vld [vmem:[#allocation10 + $0x290] sm:$0xff] }
 0x45d   :  { %v9290_v37 = vcombine.low %v4279_v22, %v4283_v24 }
 0x45e   :  { %7646 = vmatpush1.bf16.msra.mxu0 %v9234_v34  ;;  %v9284_v34 = vcombine.low %v4272_v12, %v4276_v13  ;;  %v4324_v12 = vld [vmem:[#allocation10 + $0x3f8] sm:$0xff] }
 0x45f   :  { %7810 = vmatpush1.bf16.msra.mxu1 %v9236_v0  ;;  %7647 = vmatprep.subr.bf16.mxu0 %v9243_v35  ;;  %v9291_v0 = vcombine.high %v4279_v22, %v4283_v24  ;;  %v9293_v35 = vcombine.high %v4280_v33, %v4284_v14  ;;  %v4331_v22 = vld [vmem:[#allocation10 + $0x430] sm:$0xff]  ;;  %v4328_v24 = vld [vmem:[#allocation10 + $0x418] sm:$0xff] }
 0x460   :  { %7811 = vmatprep.subr.bf16.mxu1 %v9245_v6  ;;  %v4287_v6 = vld [vmem:[#allocation10 + $0x2d0] sm:$0xff] }
 0x461   :  { %v9298_v49 = vcombine.low %v4287_v6, %v4291_v28 }
 0x462   :  { %7648 = vmatpush1.bf16.msra.mxu0 %v9242_v38  ;;  %v9292_v38 = vcombine.low %v4280_v33, %v4284_v14  ;;  %v4332_v33 = vld [vmem:[#allocation10 + $0x438] sm:$0xff] }
 0x463   :  { %7812 = vmatpush1.bf16.msra.mxu1 %v9244_v40  ;;  %7649 = vmatprep.subr.bf16.mxu0 %v9251_v45  ;;  %v9299_v40 = vcombine.high %v4287_v6, %v4291_v28  ;;  %v9301_v45 = vcombine.high %v4288_v36, %v4292_v42  ;;  %v4339_v6 = vld [vmem:[#allocation10 + $0x470] sm:$0xff] }
 0x464   :  { %7813 = vmatprep.subr.bf16.mxu1 %v9253_v46  ;;  %v4295_v46 = vld [vmem:[#allocation10 + $0x310] sm:$0xff] }
 0x465   :  { %v9306_v16 = vcombine.low %v4295_v46, %v4299_v20 }
 0x466   :  { %7650 = vmatpush1.bf16.msra.mxu0 %v9250_v52  ;;  %v9300_v52 = vcombine.low %v4288_v36, %v4292_v42  ;;  %v4336_v36 = vld [vmem:[#allocation10 + $0x458] sm:$0xff] }
 0x467   :  { %7814 = vmatpush1.bf16.msra.mxu1 %v9252_v53  ;;  %7651 = vmatprep.subr.bf16.mxu0 %v9259_v56  ;;  %v9307_v53 = vcombine.high %v4295_v46, %v4299_v20  ;;  %v9309_v56 = vcombine.high %v4296_v50, %v4300_v48  ;;  %v4340_v42 = vld [vmem:[#allocation10 + $0x478] sm:$0xff] }
 0x468   :  { %7815 = vmatprep.subr.bf16.mxu1 %v9261_v27  ;;  %v4303_v27 = vld [vmem:[#allocation10 + $0x350] sm:$0xff]  ;;  %v9349_v46 = vcombine.high %v4336_v36, %v4340_v42  ;;  %v4344_v20 = vld [vmem:[#allocation10 + $0x498] sm:$0xff] }
 0x469   :  { %v9314_v8 = vcombine.low %v4303_v27, %v4307_v59 }
 0x46a   :  { %7652 = vmatpush1.bf16.msra.mxu0 %v9258_v2  ;;  %v9308_v2 = vcombine.low %v4296_v50, %v4300_v48  ;;  %v4348_v50 = vld [vmem:[#allocation10 + $0x4b8] sm:$0xff] }
 0x46b   :  { %7816 = vmatpush1.bf16.msra.mxu1 %v9260_v3  ;;  %7653 = vmatprep.subr.bf16.mxu0 %v9267_v23  ;;  %v9315_v3 = vcombine.high %v4303_v27, %v4307_v59  ;;  %v9317_v23 = vcombine.high %v4304_v60, %v4308_v1  ;;  %v4355_v27 = vld [vmem:[#allocation10 + $0x4f0] sm:$0xff]  ;;  %v4352_v59 = vld [vmem:[#allocation10 + $0x4d8] sm:$0xff] }
 0x46c   :  { %7817 = vmatprep.subr.bf16.mxu1 %v9269_v47  ;;  %v4311_v47 = vld [vmem:[#allocation10 + $0x390] sm:$0xff] }
 0x46d   :  { %v9322_v13 = vcombine.low %v4311_v47, %v4315_v4 }
 0x46e   :  { %7654 = vmatpush1.bf16.msra.mxu0 %v9266_v43  ;;  %v9316_v43 = vcombine.low %v4304_v60, %v4308_v1  ;;  %v4356_v60 = vld [vmem:[#allocation10 + $0x4f8] sm:$0xff] }
 0x46f   :  { %7818 = vmatpush1.bf16.msra.mxu1 %v9268_v30  ;;  %7655 = vmatprep.subr.bf16.mxu0 %v9275_v62  ;;  %v9323_v30 = vcombine.high %v4311_v47, %v4315_v4  ;;  %v9325_v62 = vcombine.high %v4312_v5, %v4316_v7  ;;  %v4360_v47 = vld [vmem:[#allocation10 + $0x518] sm:$0xff] }
 0x470   :  { %7819 = vmatprep.subr.bf16.mxu1 %v9277_v9  ;;  %v4319_v9 = vld [vmem:[#allocation10 + $0x3d0] sm:$0xff]  ;;  %v4364_v4 = vld [vmem:[#allocation10 + $0x538] sm:$0xff] }
 0x471   :  { %v9330_v14 = vcombine.low %v4319_v9, %v4323_v10 }
 0x472   :  { %7656 = vmatpush1.bf16.msra.mxu0 %v9274_v21  ;;  %v9324_v21 = vcombine.low %v4312_v5, %v4316_v7  ;;  %v9364_v5 = vcombine.low %v4352_v59, %v4356_v60 }
 0x473   :  { %7820 = vmatpush1.bf16.msra.mxu1 %v9276_v15  ;;  %7657 = vmatprep.subr.bf16.mxu0 %v9283_v17  ;;  %v9331_v15 = vcombine.high %v4319_v9, %v4323_v10  ;;  %v9333_v17 = vcombine.high %v4320_v25, %v4324_v12  ;;  %v4372_v9 = vld [vmem:[#allocation10 + $0x578] sm:$0xff] }
 0x474   :  { %7821 = vmatprep.subr.bf16.mxu1 %v9285_v51  ;;  %v4327_v51 = vld [vmem:[#allocation10 + $0x410] sm:$0xff] }
 0x475   :  { %v9338_v28 = vcombine.low %v4327_v51, %v4331_v22 }
 0x476   :  { %7658 = vmatpush1.bf16.msra.mxu0 %v9282_v54  ;;  %v9332_v54 = vcombine.low %v4320_v25, %v4324_v12  ;;  %v9372_v25 = vcombine.low %v4360_v47, %v4364_v4 }
 0x477   :  { %7822 = vmatpush1.bf16.msra.mxu1 %v9284_v34  ;;  %7659 = vmatprep.subr.bf16.mxu0 %v9291_v0  ;;  %v9339_v34 = vcombine.high %v4327_v51, %v4331_v22  ;;  %v9341_v0 = vcombine.high %v4328_v24, %v4332_v33  ;;  %v4380_v51 = vld [vmem:[#allocation10 + $0x5b8] sm:$0xff] }
 0x478   :  { %7823 = vmatprep.subr.bf16.mxu1 %v9293_v35  ;;  %v4335_v35 = vld [vmem:[#allocation10 + $0x450] sm:$0xff] }
 0x479   :  { %v9346_v48 = vcombine.low %v4335_v35, %v4339_v6 }
 0x47a   :  { %7660 = vmatpush1.bf16.msra.mxu0 %v9290_v37  ;;  %v9340_v37 = vcombine.low %v4328_v24, %v4332_v33 }
 0x47b   :  { %7824 = vmatpush1.bf16.msra.mxu1 %v9292_v38  ;;  %7661 = vmatprep.subr.bf16.mxu0 %v9299_v40  ;;  %v9347_v38 = vcombine.high %v4335_v35, %v4339_v6  ;;  %v4343_v40 = vld [vmem:[#allocation10 + $0x490] sm:$0xff]  ;;  %v4388_v35 = vld [vmem:[#allocation10 + $0x5f8] sm:$0xff] }
 0x47c   :  { %7825 = vmatprep.subr.bf16.mxu1 %v9301_v45  ;;  %v4347_v45 = vld [vmem:[#allocation10 + $0x4b0] sm:$0xff] }
 0x47d   :  { %v9354_v1 = vcombine.low %v4343_v40, %v4347_v45 }
 0x47e   :  { %7662 = vmatpush1.bf16.msra.mxu0 %v9298_v49  ;;  %v9348_v49 = vcombine.low %v4336_v36, %v4340_v42 }
 0x47f   :  { %7826 = vmatpush1.bf16.msra.mxu1 %v9300_v52  ;;  %7663 = vmatprep.subr.bf16.mxu0 %v9307_v53  ;;  %v9355_v52 = vcombine.high %v4343_v40, %v4347_v45  ;;  %v9357_v53 = vcombine.high %v4344_v20, %v4348_v50  ;;  %v4392_v40 = vld [vmem:[#allocation10 + $0x618] sm:$0xff] }
 0x480   :  { %7827 = vmatprep.subr.bf16.mxu1 %v9309_v56  ;;  %v4351_v56 = vld [vmem:[#allocation10 + $0x4d0] sm:$0xff]  ;;  %v4396_v45 = vld [vmem:[#allocation10 + $0x638] sm:$0xff] }
 0x482   :  { %7664 = vmatpush1.bf16.msra.mxu0 %v9306_v16  ;;  %v9363_v16 = vcombine.high %v4351_v56, %v4355_v27 }
 0x483   :  { %7828 = vmatpush1.bf16.msra.mxu1 %v9308_v2  ;;  %7665 = vmatprep.subr.bf16.mxu0 %v9315_v3  ;;  %v9365_v2 = vcombine.high %v4352_v59, %v4356_v60  ;;  %v4359_v3 = vld [vmem:[#allocation10 + $0x510] sm:$0xff]  ;;  %v9404_v59 = vcombine.low %v4392_v40, %v4396_v45 }
 0x484   :  { %7829 = vmatprep.subr.bf16.mxu1 %v9317_v23  ;;  %v4363_v23 = vld [vmem:[#allocation10 + $0x530] sm:$0xff] }
 0x485   :  { %v9371_v7 = vcombine.high %v4359_v3, %v4363_v23  ;;  %v9370_v10 = vcombine.low %v4359_v3, %v4363_v23  ;;  %v4412_v3 = vld [vmem:[#allocation10 + $0x6b8] sm:$0xff] }
 0x486   :  { %7666 = vmatpush1.bf16.msra.mxu0 %v9314_v8  ;;  %v9373_v8 = vcombine.high %v4360_v47, %v4364_v4 }
 0x487   :  { %7830 = vmatpush1.bf16.msra.mxu1 %v9316_v43  ;;  %7667 = vmatprep.subr.bf16.mxu0 %v9323_v30  ;;  %v4367_v43 = vld [vmem:[#allocation10 + $0x550] sm:$0xff] }
 0x488   :  { %7831 = vmatprep.subr.bf16.mxu1 %v9325_v62  ;;  %v4371_v30 = vld [vmem:[#allocation10 + $0x570] sm:$0xff]  ;;  %v4368_v62 = vld [vmem:[#allocation10 + $0x558] sm:$0xff] }
 0x489   :  { %v9379_v12 = vcombine.high %v4367_v43, %v4371_v30  ;;  %v9378_v22 = vcombine.low %v4367_v43, %v4371_v30  ;;  %v9380_v24 = vcombine.low %v4368_v62, %v4372_v9  ;;  %v4420_v43 = vld [vmem:[#allocation10 + $0x6f8] sm:$0xff] }
 0x48a   :  { %7668 = vmatpush1.bf16.msra.mxu0 %v9322_v13  ;;  %v9381_v13 = vcombine.high %v4368_v62, %v4372_v9 }
 0x48b   :  { %7832 = vmatpush1.bf16.msra.mxu1 %v9324_v21  ;;  %7669 = vmatprep.subr.bf16.mxu0 %v9331_v15  ;;  %v4375_v21 = vld [vmem:[#allocation10 + $0x590] sm:$0xff] }
 0x48c   :  { %7833 = vmatprep.subr.bf16.mxu1 %v9333_v17  ;;  %v4379_v15 = vld [vmem:[#allocation10 + $0x5b0] sm:$0xff]  ;;  %v4376_v17 = vld [vmem:[#allocation10 + $0x598] sm:$0xff] }
 0x48d   :  { %v9387_v33 = vcombine.high %v4375_v21, %v4379_v15  ;;  %v9386_v6 = vcombine.low %v4375_v21, %v4379_v15  ;;  %v4428_v21 = vld [vmem:[#allocation10 + $0x738] sm:$0xff] }
 0x48e   :  { %7670 = vmatpush1.bf16.msra.mxu0 %v9330_v14  ;;  %v9389_v14 = vcombine.high %v4376_v17, %v4380_v51 }
 0x48f   :  { %7834 = vmatpush1.bf16.msra.mxu1 %v9332_v54  ;;  %7680 = vmatprep.subr.bf16.mxu0 %v9339_v34  ;;  %v4383_v54 = vld [vmem:[#allocation10 + $0x5d0] sm:$0xff] }
 0x490   :  { %7844 = vmatprep.subr.bf16.mxu1 %v9341_v0  ;;  %v4387_v34 = vld [vmem:[#allocation10 + $0x5f0] sm:$0xff]  ;;  %v4384_v0 = vld [vmem:[#allocation10 + $0x5d8] sm:$0xff] }
 0x491   :  { %7672 = vmatmul.mubr.bf16.vlgmr.msra.gmra.mrb[20].mxu0 %v10592_v58  ;;  %v9395_v36 = vcombine.high %v4383_v54, %v4387_v34  ;;  %v9397_v42 = vcombine.high %v4384_v0, %v4388_v35 }
 0x492   :  { %7836 = vmatmul.mubr.bf16.vlgmr.msra.gmra.mrb[20].mxu1 %v10592_v58  ;;  %7681 = vmatpush1.bf16.msra.mxu0 %v9338_v28  ;;  %v9356_v58 = vcombine.low %v4344_v20, %v4348_v50  ;;  %v9388_v28 = vcombine.low %v4376_v17, %v4380_v51  ;;  %v9396_v20 = vcombine.low %v4384_v0, %v4388_v35 }
 0x493   :  { %7712 = vmatprep.mubr.bf16.mxu0 %v10594_v61  ;;  %7845 = vmatpush1.bf16.msra.mxu1 %v9340_v37  ;;  %v4391_v37 = vld [vmem:[#allocation10 + $0x610] sm:$0xff] }
 0x494   :  { %7876 = vmatprep.mubr.bf16.mxu1 %v10594_v61  ;;  %7682 = vmatprep.subr.bf16.mxu0 %v9347_v38  ;;  %v9362_v61 = vcombine.low %v4351_v56, %v4355_v27  ;;  %v4395_v38 = vld [vmem:[#allocation10 + $0x630] sm:$0xff]  ;;  %v4404_v56 = vld [vmem:[#allocation10 + $0x678] sm:$0xff] }
 0x495   :  { %7846 = vmatprep.subr.bf16.mxu1 %v9349_v46  ;;  %v9394_v46 = vcombine.low %v4383_v54, %v4387_v34  ;;  %v9403_v50 = vcombine.high %v4391_v37, %v4395_v38  ;;  %v9402_v27 = vcombine.low %v4391_v37, %v4395_v38  ;;  %v4436_v54 = vld [vmem:[#allocation10 + $0x778] sm:$0xff] }
 0x496   :  { %7683 = vmatpush1.bf16.msra.mxu0 %v9346_v48  ;;  %v9405_v48 = vcombine.high %v4392_v40, %v4396_v45  ;;  %v4444_v37 = vld [vmem:[#allocation10 + $0x7b8] sm:$0xff] }
 0x497   :  { %7847 = vmatpush1.bf16.msra.mxu1 %v9348_v49  ;;  %7684 = vmatprep.subr.bf16.mxu0 %v9355_v52  ;;  %v4399_v49 = vld [vmem:[#allocation10 + $0x650] sm:$0xff] }
 0x498   :  { %7848 = vmatprep.subr.bf16.mxu1 %v9357_v53  ;;  %v4403_v52 = vld [vmem:[#allocation10 + $0x670] sm:$0xff]  ;;  %v4400_v53 = vld [vmem:[#allocation10 + $0x658] sm:$0xff] }
 0x499   :  { %v9411_v60 = vcombine.high %v4399_v49, %v4403_v52  ;;  %v9410_v23 = vcombine.low %v4399_v49, %v4403_v52  ;;  %v9412_v47 = vcombine.low %v4400_v53, %v4404_v56  ;;  %v4452_v49 = vld [vmem:[#allocation10 + $0x7f8] sm:$0xff] }
 0x49a   :  { %7685 = vmatpush1.bf16.msra.mxu0 %v9354_v1  ;;  %v9413_v1 = vcombine.high %v4400_v53, %v4404_v56 }
 0x49b   :  { %7849 = vmatpush1.bf16.msra.mxu1 %v9356_v58  ;;  %7686 = vmatprep.subr.bf16.mxu0 %v9363_v16  ;;  %v4407_v58 = vld [vmem:[#allocation10 + $0x690] sm:$0xff] }
 0x49c   :  { %7850 = vmatprep.subr.bf16.mxu1 %v9365_v2  ;;  %v4411_v16 = vld [vmem:[#allocation10 + $0x6b0] sm:$0xff]  ;;  %v4408_v2 = vld [vmem:[#allocation10 + $0x698] sm:$0xff] }
 0x49d   :  { %v9419_v4 = vcombine.high %v4407_v58, %v4411_v16  ;;  %v9418_v30 = vcombine.low %v4407_v58, %v4411_v16  ;;  %v9420_v62 = vcombine.low %v4408_v2, %v4412_v3  ;;  %v4460_v58 = vld [vmem:[#allocation10 + $0x838] sm:$0xff] }
 0x49e   :  { %7687 = vmatpush1.bf16.msra.mxu0 %v9362_v61  ;;  %v9421_v61 = vcombine.high %v4408_v2, %v4412_v3 }
 0x49f   :  { %7851 = vmatpush1.bf16.msra.mxu1 %v9364_v5  ;;  %7688 = vmatprep.subr.bf16.mxu0 %v9371_v7  ;;  %v4415_v5 = vld [vmem:[#allocation10 + $0x6d0] sm:$0xff] }
 0x4a0   :  { %7852 = vmatprep.subr.bf16.mxu1 %v9373_v8  ;;  %v4419_v7 = vld [vmem:[#allocation10 + $0x6f0] sm:$0xff]  ;;  %v4416_v8 = vld [vmem:[#allocation10 + $0x6d8] sm:$0xff] }
 0x4a1   :  { %v9427_v9 = vcombine.high %v4415_v5, %v4419_v7  ;;  %v9426_v15 = vcombine.low %v4415_v5, %v4419_v7  ;;  %v9428_v17 = vcombine.low %v4416_v8, %v4420_v43  ;;  %v4464_v5 = vld [vmem:[#allocation10 + $0x858] sm:$0xff] }
 0x4a2   :  { %7689 = vmatpush1.bf16.msra.mxu0 %v9370_v10  ;;  %v9429_v10 = vcombine.high %v4416_v8, %v4420_v43  ;;  %v4468_v7 = vld [vmem:[#allocation10 + $0x878] sm:$0xff] }
 0x4a3   :  { %7853 = vmatpush1.bf16.msra.mxu1 %v9372_v25  ;;  %7690 = vmatprep.subr.bf16.mxu0 %v9379_v12  ;;  %v4423_v25 = vld [vmem:[#allocation10 + $0x710] sm:$0xff] }
 0x4a4   :  { %7854 = vmatprep.subr.bf16.mxu1 %v9381_v13  ;;  %v4427_v12 = vld [vmem:[#allocation10 + $0x730] sm:$0xff]  ;;  %v4424_v13 = vld [vmem:[#allocation10 + $0x718] sm:$0xff] }
 0x4a5   :  { %v9435_v51 = vcombine.high %v4423_v25, %v4427_v12  ;;  %v9434_v34 = vcombine.low %v4423_v25, %v4427_v12  ;;  %v9436_v0 = vcombine.low %v4424_v13, %v4428_v21  ;;  %v4476_v25 = vld [vmem:[#allocation10 + $0x8b8] sm:$0xff] }
 0x4a6   :  { %7691 = vmatpush1.bf16.msra.mxu0 %v9378_v22  ;;  %v9437_v22 = vcombine.high %v4424_v13, %v4428_v21  ;;  %v9476_v13 = vcombine.low %v4464_v5, %v4468_v7 }
 0x4a7   :  { %7855 = vmatpush1.bf16.msra.mxu1 %v9380_v24  ;;  %7692 = vmatprep.subr.bf16.mxu0 %v9387_v33  ;;  %v4431_v24 = vld [vmem:[#allocation10 + $0x750] sm:$0xff] }
 0x4a8   :  { %7856 = vmatprep.subr.bf16.mxu1 %v9389_v14  ;;  %v4435_v33 = vld [vmem:[#allocation10 + $0x770] sm:$0xff]  ;;  %v4432_v14 = vld [vmem:[#allocation10 + $0x758] sm:$0xff] }
 0x4a9   :  { %v9443_v35 = vcombine.high %v4431_v24, %v4435_v33  ;;  %v9442_v38 = vcombine.low %v4431_v24, %v4435_v33  ;;  %v9444_v40 = vcombine.low %v4432_v14, %v4436_v54  ;;  %v4484_v24 = vld [vmem:[#allocation10 + $0x8f8] sm:$0xff] }
 0x4aa   :  { %7693 = vmatpush1.bf16.msra.mxu0 %v9386_v6  ;;  %v9445_v6 = vcombine.high %v4432_v14, %v4436_v54 }
 0x4ab   :  { %7857 = vmatpush1.bf16.msra.mxu1 %v9388_v28  ;;  %7694 = vmatprep.subr.bf16.mxu0 %v9395_v36  ;;  %v4439_v28 = vld [vmem:[#allocation10 + $0x790] sm:$0xff] }
 0x4ac   :  { %7858 = vmatprep.subr.bf16.mxu1 %v9397_v42  ;;  %v4443_v36 = vld [vmem:[#allocation10 + $0x7b0] sm:$0xff]  ;;  %v4440_v42 = vld [vmem:[#allocation10 + $0x798] sm:$0xff] }
 0x4ad   :  { %v9451_v45 = vcombine.high %v4439_v28, %v4443_v36  ;;  %v9450_v52 = vcombine.low %v4439_v28, %v4443_v36  ;;  %v9452_v53 = vcombine.low %v4440_v42, %v4444_v37 }
 0x4ae   :  { %7695 = vmatpush1.bf16.msra.mxu0 %v9394_v46  ;;  %v9453_v46 = vcombine.high %v4440_v42, %v4444_v37  ;;  %v4495_v37 = vld [vmem:[#allocation10 + $0x950] sm:$0xff] }
 0x4af   :  { %7859 = vmatpush1.bf16.msra.mxu1 %v9396_v20  ;;  %7696 = vmatprep.subr.bf16.mxu0 %v9403_v50  ;;  %v4447_v20 = vld [vmem:[#allocation10 + $0x7d0] sm:$0xff] }
 0x4b0   :  { %7860 = vmatprep.subr.bf16.mxu1 %v9405_v48  ;;  %v4451_v50 = vld [vmem:[#allocation10 + $0x7f0] sm:$0xff]  ;;  %v4448_v48 = vld [vmem:[#allocation10 + $0x7d8] sm:$0xff] }
 0x4b1   :  { %v9459_v56 = vcombine.high %v4447_v20, %v4451_v50  ;;  %v9458_v16 = vcombine.low %v4447_v20, %v4451_v50  ;;  %v9460_v2 = vcombine.low %v4448_v48, %v4452_v49 }
 0x4b2   :  { %7697 = vmatpush1.bf16.msra.mxu0 %v9402_v27  ;;  %v9461_v27 = vcombine.high %v4448_v48, %v4452_v49  ;;  %v4503_v49 = vld [vmem:[#allocation10 + $0x990] sm:$0xff] }
 0x4b3   :  { %7861 = vmatpush1.bf16.msra.mxu1 %v9404_v59  ;;  %7698 = vmatprep.subr.bf16.mxu0 %v9411_v60  ;;  %v4455_v59 = vld [vmem:[#allocation10 + $0x810] sm:$0xff] }
 0x4b4   :  { %7862 = vmatprep.subr.bf16.mxu1 %v9413_v1  ;;  %v4459_v60 = vld [vmem:[#allocation10 + $0x830] sm:$0xff]  ;;  %v4456_v1 = vld [vmem:[#allocation10 + $0x818] sm:$0xff] }
 0x4b5   :  { %v9467_v3 = vcombine.high %v4455_v59, %v4459_v60  ;;  %v9468_v8 = vcombine.low %v4456_v1, %v4460_v58 }
 0x4b6   :  { %7699 = vmatpush1.bf16.msra.mxu0 %v9410_v23  ;;  %v9469_v23 = vcombine.high %v4456_v1, %v4460_v58  ;;  %v4511_v58 = vld [vmem:[#allocation10 + $0x9d0] sm:$0xff] }
 0x4b7   :  { %7863 = vmatpush1.bf16.msra.mxu1 %v9412_v47  ;;  %7700 = vmatprep.subr.bf16.mxu0 %v9419_v4  ;;  %v4463_v47 = vld [vmem:[#allocation10 + $0x850] sm:$0xff] }
 0x4b8   :  { %7864 = vmatprep.subr.bf16.mxu1 %v9421_v61  ;;  %v4467_v4 = vld [vmem:[#allocation10 + $0x870] sm:$0xff]  ;;  %v9466_v61 = vcombine.low %v4455_v59, %v4459_v60 }
 0x4b9   :  { %v9475_v43 = vcombine.high %v4463_v47, %v4467_v4  ;;  %v9474_v12 = vcombine.low %v4463_v47, %v4467_v4 }
 0x4ba   :  { %7701 = vmatpush1.bf16.msra.mxu0 %v9418_v30  ;;  %v4471_v30 = vld [vmem:[#allocation10 + $0x890] sm:$0xff] }
 0x4bb   :  { %7865 = vmatpush1.bf16.msra.mxu1 %v9420_v62  ;;  %7702 = vmatprep.subr.bf16.mxu0 %v9427_v9  ;;  %v4475_v62 = vld [vmem:[#allocation10 + $0x8b0] sm:$0xff]  ;;  %v9477_v9 = vcombine.high %v4464_v5, %v4468_v7 }
 0x4bc   :  { %7866 = vmatprep.subr.bf16.mxu1 %v9429_v10  ;;  %v4472_v10 = vld [vmem:[#allocation10 + $0x898] sm:$0xff]  ;;  %v9483_v21 = vcombine.high %v4471_v30, %v4475_v62  ;;  %v9482_v33 = vcombine.low %v4471_v30, %v4475_v62  ;;  %v4519_v5 = vld [vmem:[#allocation10 + $0xa10] sm:$0xff] }
 0x4bd   :  { %v4523_v7 = vld [vmem:[#allocation10 + $0xa30] sm:$0xff] }
 0x4be   :  { %7703 = vmatpush1.bf16.msra.mxu0 %v9426_v15  ;;  %v9485_v15 = vcombine.high %v4472_v10, %v4476_v25 }
 0x4bf   :  { %7867 = vmatpush1.bf16.msra.mxu1 %v9428_v17  ;;  %7704 = vmatprep.subr.bf16.mxu0 %v9435_v51  ;;  %v4479_v17 = vld [vmem:[#allocation10 + $0x8d0] sm:$0xff] }
 0x4c0   :  { %7868 = vmatprep.subr.bf16.mxu1 %v9437_v22  ;;  %v4483_v51 = vld [vmem:[#allocation10 + $0x8f0] sm:$0xff]  ;;  %v4480_v22 = vld [vmem:[#allocation10 + $0x8d8] sm:$0xff] }
 0x4c1   :  { %v9491_v14 = vcombine.high %v4479_v17, %v4483_v51  ;;  %v9493_v54 = vcombine.high %v4480_v22, %v4484_v24  ;;  %v9492_v28 = vcombine.low %v4480_v22, %v4484_v24  ;;  %v4535_v24 = vld [vmem:[#allocation10 + $0xa90] sm:$0xff] }
 0x4c2   :  { %7705 = vmatpush1.bf16.msra.mxu0 %v9434_v34  ;;  %v4487_v34 = vld [vmem:[#allocation10 + $0x910] sm:$0xff] }
 0x4c3   :  { %7869 = vmatpush1.bf16.msra.mxu1 %v9436_v0  ;;  %7706 = vmatprep.subr.bf16.mxu0 %v9443_v35  ;;  %v4491_v0 = vld [vmem:[#allocation10 + $0x930] sm:$0xff]  ;;  %v4488_v35 = vld [vmem:[#allocation10 + $0x918] sm:$0xff] }
 0x4c4   :  { %7870 = vmatprep.subr.bf16.mxu1 %v9445_v6  ;;  %v4492_v6 = vld [vmem:[#allocation10 + $0x938] sm:$0xff]  ;;  %v9499_v36 = vcombine.high %v4487_v34, %v4491_v0 }
 0x4c5   :  { %v9501_v42 = vcombine.high %v4488_v35, %v4492_v6  ;;  %v9500_v20 = vcombine.low %v4488_v35, %v4492_v6  ;;  %v4543_v6 = vld [vmem:[#allocation10 + $0xad0] sm:$0xff] }
 0x4c6   :  { %7707 = vmatpush1.bf16.msra.mxu0 %v9442_v38  ;;  %v4499_v38 = vld [vmem:[#allocation10 + $0x970] sm:$0xff] }
 0x4c7   :  { %7871 = vmatpush1.bf16.msra.mxu1 %v9444_v40  ;;  %7708 = vmatprep.subr.bf16.mxu0 %v9451_v45  ;;  %v4496_v40 = vld [vmem:[#allocation10 + $0x958] sm:$0xff]  ;;  %v9507_v50 = vcombine.high %v4495_v37, %v4499_v38 }
 0x4c8   :  { %7872 = vmatprep.subr.bf16.mxu1 %v9453_v46  ;;  %v4500_v45 = vld [vmem:[#allocation10 + $0x978] sm:$0xff]  ;;  %v9498_v46 = vcombine.low %v4487_v34, %v4491_v0 }
 0x4c9   :  { %v9509_v48 = vcombine.high %v4496_v40, %v4500_v45  ;;  %v9508_v59 = vcombine.low %v4496_v40, %v4500_v45  ;;  %v4551_v45 = vld [vmem:[#allocation10 + $0xb10] sm:$0xff] }
 0x4ca   :  { %7709 = vmatpush1.bf16.msra.mxu0 %v9450_v52  ;;  %v4507_v52 = vld [vmem:[#allocation10 + $0x9b0] sm:$0xff] }
 0x4cb   :  { %7873 = vmatpush1.bf16.msra.mxu1 %v9452_v53  ;;  %7710 = vmatprep.subr.bf16.mxu0 %v9459_v56  ;;  %v4504_v53 = vld [vmem:[#allocation10 + $0x998] sm:$0xff]  ;;  %v9515_v60 = vcombine.high %v4503_v49, %v4507_v52 }
 0x4cc   :  { %7874 = vmatprep.subr.bf16.mxu1 %v9461_v27  ;;  %v4508_v56 = vld [vmem:[#allocation10 + $0x9b8] sm:$0xff]  ;;  %v9506_v27 = vcombine.low %v4495_v37, %v4499_v38 }
 0x4cd   :  { %v9517_v1 = vcombine.high %v4504_v53, %v4508_v56  ;;  %v9516_v47 = vcombine.low %v4504_v53, %v4508_v56  ;;  %v4559_v56 = vld [vmem:[#allocation10 + $0xb50] sm:$0xff] }
 0x4ce   :  { %7711 = vmatpush1.bf16.msra.mxu0 %v9458_v16  ;;  %v4515_v16 = vld [vmem:[#allocation10 + $0x9f0] sm:$0xff] }
 0x4cf   :  { %7875 = vmatpush1.bf16.msra.mxu1 %v9460_v2  ;;  %7721 = vmatprep.subr.bf16.mxu0 %v9467_v3  ;;  %v4512_v2 = vld [vmem:[#allocation10 + $0x9d8] sm:$0xff]  ;;  %v9523_v4 = vcombine.high %v4511_v58, %v4515_v16  ;;  %v9522_v30 = vcombine.low %v4511_v58, %v4515_v16 }
 0x4d0   :  { %7885 = vmatprep.subr.bf16.mxu1 %v9469_v23  ;;  %v4516_v3 = vld [vmem:[#allocation10 + $0x9f8] sm:$0xff]  ;;  %v9514_v23 = vcombine.low %v4503_v49, %v4507_v52 }
 0x4d1   :  { %7713 = vmatmul.mubr.bf16.vlgmr.msra.gmra.mrb[20].mxu0 %v10603_v39  ;;  %v9524_v62 = vcombine.low %v4512_v2, %v4516_v3 }
 0x4d2   :  { %7877 = vmatmul.mubr.bf16.vlgmr.msra.gmra.mrb[20].mxu1 %v10603_v39  ;;  %7722 = vmatpush1.bf16.msra.mxu0 %v9466_v61  ;;  %v9484_v39 = vcombine.low %v4472_v10, %v4476_v25  ;;  %v9525_v61 = vcombine.high %v4512_v2, %v4516_v3  ;;  %v4527_v25 = vld [vmem:[#allocation10 + $0xa50] sm:$0xff] }
 0x4d3   :  { %7753 = vmatprep.mubr.bf16.mxu0 %v10617_v63  ;;  %7886 = vmatpush1.bf16.msra.mxu1 %v9468_v8  ;;  %v4520_v8 = vld [vmem:[#allocation10 + $0xa18] sm:$0xff]  ;;  %v4567_v3 = vld [vmem:[#allocation10 + $0xb90] sm:$0xff] }
 0x4d4   :  { %7917 = vmatprep.mubr.bf16.mxu1 %v10617_v63  ;;  %7723 = vmatprep.subr.bf16.mxu0 %v9475_v43  ;;  %v9490_v63 = vcombine.low %v4479_v17, %v4483_v51  ;;  %v4524_v43 = vld [vmem:[#allocation10 + $0xa38] sm:$0xff] }
 0x4d5   :  { %7887 = vmatprep.subr.bf16.mxu1 %v9477_v9  ;;  %v9531_v9 = vcombine.high %v4519_v5, %v4523_v7  ;;  %v9533_v10 = vcombine.high %v4520_v8, %v4524_v43  ;;  %v9532_v17 = vcombine.low %v4520_v8, %v4524_v43  ;;  %v4575_v43 = vld [vmem:[#allocation10 + $0xbd0] sm:$0xff] }
 0x4d6   :  { %7724 = vmatpush1.bf16.msra.mxu0 %v9474_v12  ;;  %v4531_v12 = vld [vmem:[#allocation10 + $0xa70] sm:$0xff] }
 0x4d7   :  { %7888 = vmatpush1.bf16.msra.mxu1 %v9476_v13  ;;  %7725 = vmatprep.subr.bf16.mxu0 %v9483_v21  ;;  %v4528_v13 = vld [vmem:[#allocation10 + $0xa58] sm:$0xff]  ;;  %v9539_v51 = vcombine.high %v4527_v25, %v4531_v12 }
 0x4d8   :  { %7889 = vmatprep.subr.bf16.mxu1 %v9485_v15  ;;  %v4532_v21 = vld [vmem:[#allocation10 + $0xa78] sm:$0xff]  ;;  %v9530_v15 = vcombine.low %v4519_v5, %v4523_v7 }
 0x4d9   :  { %v9541_v22 = vcombine.high %v4528_v13, %v4532_v21  ;;  %v9540_v34 = vcombine.low %v4528_v13, %v4532_v21  ;;  %v4583_v21 = vld [vmem:[#allocation10 + $0xc10] sm:$0xff] }
 0x4da   :  { %7726 = vmatpush1.bf16.msra.mxu0 %v9482_v33  ;;  %v4539_v33 = vld [vmem:[#allocation10 + $0xab0] sm:$0xff] }
 0x4db   :  { %7890 = vmatpush1.bf16.msra.mxu1 %v9484_v39  ;;  %7727 = vmatprep.subr.bf16.mxu0 %v9491_v14  ;;  %v4536_v39 = vld [vmem:[#allocation10 + $0xa98] sm:$0xff]  ;;  %v9547_v0 = vcombine.high %v4535_v24, %v4539_v33 }
 0x4dc   :  { %7891 = vmatprep.subr.bf16.mxu1 %v9493_v54  ;;  %v4540_v14 = vld [vmem:[#allocation10 + $0xab8] sm:$0xff]  ;;  %v9538_v54 = vcombine.low %v4527_v25, %v4531_v12 }
 0x4dd   :  { %v9549_v35 = vcombine.high %v4536_v39, %v4540_v14  ;;  %v9548_v37 = vcombine.low %v4536_v39, %v4540_v14  ;;  %v4591_v14 = vld [vmem:[#allocation10 + $0xc50] sm:$0xff] }
 0x4de   :  { %7728 = vmatpush1.bf16.msra.mxu0 %v9490_v63  ;;  %v4547_v63 = vld [vmem:[#allocation10 + $0xaf0] sm:$0xff] }
 0x4df   :  { %7892 = vmatpush1.bf16.msra.mxu1 %v9492_v28  ;;  %7729 = vmatprep.subr.bf16.mxu0 %v9499_v36  ;;  %v4544_v28 = vld [vmem:[#allocation10 + $0xad8] sm:$0xff]  ;;  %v9555_v38 = vcombine.high %v4543_v6, %v4547_v63 }
 0x4e0   :  { %7893 = vmatprep.subr.bf16.mxu1 %v9501_v42  ;;  %v4548_v36 = vld [vmem:[#allocation10 + $0xaf8] sm:$0xff]  ;;  %v9546_v42 = vcombine.low %v4535_v24, %v4539_v33 }
 0x4e1   :  { %v9557_v40 = vcombine.high %v4544_v28, %v4548_v36  ;;  %v9556_v49 = vcombine.low %v4544_v28, %v4548_v36  ;;  %v4599_v28 = vld [vmem:[#allocation10 + $0xc90] sm:$0xff] }
 0x4e2   :  { %7730 = vmatpush1.bf16.msra.mxu0 %v9498_v46  ;;  %v4555_v46 = vld [vmem:[#allocation10 + $0xb30] sm:$0xff] }
 0x4e3   :  { %7894 = vmatpush1.bf16.msra.mxu1 %v9500_v20  ;;  %7731 = vmatprep.subr.bf16.mxu0 %v9507_v50  ;;  %v4552_v20 = vld [vmem:[#allocation10 + $0xb18] sm:$0xff]  ;;  %v9563_v52 = vcombine.high %v4551_v45, %v4555_v46  ;;  %v4603_v36 = vld [vmem:[#allocation10 + $0xcb0] sm:$0xff] }
 0x4e4   :  { %7895 = vmatprep.subr.bf16.mxu1 %v9509_v48  ;;  %v4556_v50 = vld [vmem:[#allocation10 + $0xb38] sm:$0xff]  ;;  %v9554_v48 = vcombine.low %v4543_v6, %v4547_v63 }
 0x4e5   :  { %v9565_v53 = vcombine.high %v4552_v20, %v4556_v50  ;;  %v9564_v58 = vcombine.low %v4552_v20, %v4556_v50  ;;  %v4607_v50 = vld [vmem:[#allocation10 + $0xcd0] sm:$0xff] }
 0x4e6   :  { %7732 = vmatpush1.bf16.msra.mxu0 %v9506_v27  ;;  %v4563_v27 = vld [vmem:[#allocation10 + $0xb70] sm:$0xff] }
 0x4e7   :  { %7896 = vmatpush1.bf16.msra.mxu1 %v9508_v59  ;;  %7733 = vmatprep.subr.bf16.mxu0 %v9515_v60  ;;  %v4560_v59 = vld [vmem:[#allocation10 + $0xb58] sm:$0xff]  ;;  %v9571_v16 = vcombine.high %v4559_v56, %v4563_v27 }
 0x4e8   :  { %7897 = vmatprep.subr.bf16.mxu1 %v9517_v1  ;;  %v4564_v60 = vld [vmem:[#allocation10 + $0xb78] sm:$0xff]  ;;  %v9562_v1 = vcombine.low %v4551_v45, %v4555_v46  ;;  %v9611_v46 = vcombine.high %v4599_v28, %v4603_v36 }
 0x4e9   :  { %v9573_v2 = vcombine.high %v4560_v59, %v4564_v60  ;;  %v9572_v5 = vcombine.low %v4560_v59, %v4564_v60  ;;  %v4615_v59 = vld [vmem:[#allocation10 + $0xd10] sm:$0xff] }
 0x4ea   :  { %7734 = vmatpush1.bf16.msra.mxu0 %v9514_v23  ;;  %v4571_v23 = vld [vmem:[#allocation10 + $0xbb0] sm:$0xff] }
 0x4eb   :  { %7898 = vmatpush1.bf16.msra.mxu1 %v9516_v47  ;;  %7735 = vmatprep.subr.bf16.mxu0 %v9523_v4  ;;  %v4568_v47 = vld [vmem:[#allocation10 + $0xb98] sm:$0xff]  ;;  %v9579_v7 = vcombine.high %v4567_v3, %v4571_v23  ;;  %v4619_v60 = vld [vmem:[#allocation10 + $0xd30] sm:$0xff] }
 0x4ec   :  { %7899 = vmatprep.subr.bf16.mxu1 %v9525_v61  ;;  %v4572_v4 = vld [vmem:[#allocation10 + $0xbb8] sm:$0xff]  ;;  %v9570_v61 = vcombine.low %v4559_v56, %v4563_v27 }
 0x4ed   :  { %v9581_v8 = vcombine.high %v4568_v47, %v4572_v4  ;;  %v9580_v25 = vcombine.low %v4568_v47, %v4572_v4  ;;  %v4627_v47 = vld [vmem:[#allocation10 + $0xd70] sm:$0xff]  ;;  %v4624_v4 = vld [vmem:[#allocation10 + $0xd58] sm:$0xff] }
 0x4ee   :  { %7736 = vmatpush1.bf16.msra.mxu0 %v9522_v30  ;;  %v4579_v30 = vld [vmem:[#allocation10 + $0xbf0] sm:$0xff] }
 0x4ef   :  { %7900 = vmatpush1.bf16.msra.mxu1 %v9524_v62  ;;  %7737 = vmatprep.subr.bf16.mxu0 %v9531_v9  ;;  %v4576_v62 = vld [vmem:[#allocation10 + $0xbd8] sm:$0xff]  ;;  %v9587_v12 = vcombine.high %v4575_v43, %v4579_v30 }
 0x4f0   :  { %7901 = vmatprep.subr.bf16.mxu1 %v9533_v10  ;;  %v4580_v9 = vld [vmem:[#allocation10 + $0xbf8] sm:$0xff]  ;;  %v9578_v10 = vcombine.low %v4567_v3, %v4571_v23  ;;  %v4623_v23 = vld [vmem:[#allocation10 + $0xd50] sm:$0xff] }
 0x4f1   :  { %v9589_v13 = vcombine.high %v4576_v62, %v4580_v9  ;;  %v9588_v24 = vcombine.low %v4576_v62, %v4580_v9  ;;  %v4635_v62 = vld [vmem:[#allocation10 + $0xdb0] sm:$0xff]  ;;  %v4632_v9 = vld [vmem:[#allocation10 + $0xd98] sm:$0xff] }
 0x4f2   :  { %7738 = vmatpush1.bf16.msra.mxu0 %v9530_v15  ;;  %v4587_v15 = vld [vmem:[#allocation10 + $0xc30] sm:$0xff] }
 0x4f3   :  { %7902 = vmatpush1.bf16.msra.mxu1 %v9532_v17  ;;  %7739 = vmatprep.subr.bf16.mxu0 %v9539_v51  ;;  %v4584_v17 = vld [vmem:[#allocation10 + $0xc18] sm:$0xff]  ;;  %v9595_v33 = vcombine.high %v4583_v21, %v4587_v15 }
 0x4f4   :  { %7903 = vmatprep.subr.bf16.mxu1 %v9541_v22  ;;  %v4588_v51 = vld [vmem:[#allocation10 + $0xc38] sm:$0xff]  ;;  %v9586_v22 = vcombine.low %v4575_v43, %v4579_v30  ;;  %v4631_v30 = vld [vmem:[#allocation10 + $0xd90] sm:$0xff] }
 0x4f5   :  { %v9597_v39 = vcombine.high %v4584_v17, %v4588_v51  ;;  %v9596_v6 = vcombine.low %v4584_v17, %v4588_v51  ;;  %v4639_v51 = vld [vmem:[#allocation10 + $0xdd0] sm:$0xff] }
 0x4f6   :  { %7740 = vmatpush1.bf16.msra.mxu0 %v9538_v54  ;;  %v4595_v54 = vld [vmem:[#allocation10 + $0xc70] sm:$0xff] }
 0x4f7   :  { %7904 = vmatpush1.bf16.msra.mxu1 %v9540_v34  ;;  %7741 = vmatprep.subr.bf16.mxu0 %v9547_v0  ;;  %v9594_v34 = vcombine.low %v4583_v21, %v4587_v15  ;;  %v4592_v0 = vld [vmem:[#allocation10 + $0xc58] sm:$0xff]  ;;  %v9603_v63 = vcombine.high %v4591_v14, %v4595_v54 }
 0x4f8   :  { %7905 = vmatprep.subr.bf16.mxu1 %v9549_v35  ;;  %v4596_v35 = vld [vmem:[#allocation10 + $0xc78] sm:$0xff] }
 0x4f9   :  { %v9604_v45 = vcombine.low %v4592_v0, %v4596_v35 }
 0x4fa   :  { %7742 = vmatpush1.bf16.msra.mxu0 %v9546_v42  ;;  %v9605_v42 = vcombine.high %v4592_v0, %v4596_v35  ;;  %v9642_v0 = vcombine.low %v4631_v30, %v4635_v62 }
 0x4fb   :  { %7906 = vmatpush1.bf16.msra.mxu1 %v9548_v37  ;;  %7743 = vmatprep.subr.bf16.mxu0 %v9555_v38  ;;  %v4600_v37 = vld [vmem:[#allocation10 + $0xc98] sm:$0xff] }
 0x4fc   :  { %7907 = vmatprep.subr.bf16.mxu1 %v9557_v40  ;;  %v4604_v38 = vld [vmem:[#allocation10 + $0xcb8] sm:$0xff]  ;;  %v9602_v40 = vcombine.low %v4591_v14, %v4595_v54 }
 0x4fd   :  { %v9613_v20 = vcombine.high %v4600_v37, %v4604_v38  ;;  %v4644_v14 = vld [vmem:[#allocation10 + $0xdf8] sm:$0xff] }
 0x4fe   :  { %7744 = vmatpush1.bf16.msra.mxu0 %v9554_v48  ;;  %v4611_v48 = vld [vmem:[#allocation10 + $0xcf0] sm:$0xff] }
 0x4ff   :  { %7908 = vmatpush1.bf16.msra.mxu1 %v9556_v49  ;;  %7745 = vmatprep.subr.bf16.mxu0 %v9563_v52  ;;  %v4608_v49 = vld [vmem:[#allocation10 + $0xcd8] sm:$0xff]  ;;  %v9619_v56 = vcombine.high %v4607_v50, %v4611_v48 }
 0x500   :  { %7909 = vmatprep.subr.bf16.mxu1 %v9565_v53  ;;  %v4612_v52 = vld [vmem:[#allocation10 + $0xcf8] sm:$0xff]  ;;  %v9610_v53 = vcombine.low %v4599_v28, %v4603_v36 }
 0x501   :  { %v9621_v27 = vcombine.high %v4608_v49, %v4612_v52 }
 0x502   :  { %7746 = vmatpush1.bf16.msra.mxu0 %v9562_v1  ;;  %v4616_v1 = vld [vmem:[#allocation10 + $0xd18] sm:$0xff] }
 0x503   :  { %7910 = vmatpush1.bf16.msra.mxu1 %v9564_v58  ;;  %7747 = vmatprep.subr.bf16.mxu0 %v9571_v16  ;;  %v4620_v58 = vld [vmem:[#allocation10 + $0xd38] sm:$0xff]  ;;  %v9620_v16 = vcombine.low %v4608_v49, %v4612_v52  ;;  %v4659_v49 = vld [vmem:[#allocation10 + $0xe70] sm:$0xff] }
 0x504   :  { %7911 = vmatprep.subr.bf16.mxu1 %v9573_v2  ;;  %v9627_v2 = vcombine.high %v4615_v59, %v4619_v60  ;;  %v9629_v3 = vcombine.high %v4616_v1, %v4620_v58  ;;  %v4656_v52 = vld [vmem:[#allocation10 + $0xe58] sm:$0xff] }
 0x506   :  { %7748 = vmatpush1.bf16.msra.mxu0 %v9570_v61  ;;  %v4628_v61 = vld [vmem:[#allocation10 + $0xd78] sm:$0xff] }
 0x507   :  { %7912 = vmatpush1.bf16.msra.mxu1 %v9572_v5  ;;  %7749 = vmatprep.subr.bf16.mxu0 %v9579_v7  ;;  %v9626_v5 = vcombine.low %v4615_v59, %v4619_v60  ;;  %v9628_v7 = vcombine.low %v4616_v1, %v4620_v58  ;;  %v9637_v43 = vcombine.high %v4624_v4, %v4628_v61  ;;  %v4663_v60 = vld [vmem:[#allocation10 + $0xe90] sm:$0xff]  ;;  %v4664_v58 = vld [vmem:[#allocation10 + $0xe98] sm:$0xff] }
 0x508   :  { %7913 = vmatprep.subr.bf16.mxu1 %v9581_v8  ;;  %v9635_v8 = vcombine.high %v4623_v23, %v4627_v47  ;;  %v4667_v1 = vld [vmem:[#allocation10 + $0xeb0] sm:$0xff] }
 0x50a   :  { %7750 = vmatpush1.bf16.msra.mxu0 %v9578_v10  ;;  %v4636_v10 = vld [vmem:[#allocation10 + $0xdb8] sm:$0xff] }
 0x50b   :  { %7914 = vmatpush1.bf16.msra.mxu1 %v9580_v25  ;;  %7751 = vmatprep.subr.bf16.mxu0 %v9587_v12  ;;  %v9634_v25 = vcombine.low %v4623_v23, %v4627_v47  ;;  %v9636_v12 = vcombine.low %v4624_v4, %v4628_v61  ;;  %v9645_v17 = vcombine.high %v4632_v9, %v4636_v10  ;;  %v4671_v47 = vld [vmem:[#allocation10 + $0xed0] sm:$0xff]  ;;  %v4672_v61 = vld [vmem:[#allocation10 + $0xed8] sm:$0xff] }
 0x50c   :  { %7915 = vmatprep.subr.bf16.mxu1 %v9589_v13  ;;  %v9643_v13 = vcombine.high %v4631_v30, %v4635_v62  ;;  %v4675_v4 = vld [vmem:[#allocation10 + $0xef0] sm:$0xff] }
 0x50d   :  { %v4679_v62 = vld [vmem:[#allocation10 + $0xf10] sm:$0xff] }
 0x50e   :  { %7752 = vmatpush1.bf16.msra.mxu0 %v9586_v22  ;;  %v4643_v22 = vld [vmem:[#allocation10 + $0xdf0] sm:$0xff] }
 0x50f   :  { %7916 = vmatpush1.bf16.msra.mxu1 %v9588_v24  ;;  %7762 = vmatprep.subr.bf16.mxu0 %v9595_v33  ;;  %v9651_v28 = vcombine.high %v4639_v51, %v4643_v22 }
 0x510   :  { %7926 = vmatprep.subr.bf16.mxu1 %v9597_v39  ;;  %v4640_v39 = vld [vmem:[#allocation10 + $0xdd8] sm:$0xff] }
 0x511   :  { %7754 = vmatmul.mubr.bf16.vlgmr.msra.gmra.mrb[20].mxu0 %v10619_v11  ;;  %v9653_v36 = vcombine.high %v4640_v39, %v4644_v14 }
 0x512   :  { %7918 = vmatmul.mubr.bf16.vlgmr.msra.gmra.mrb[20].mxu1 %v10619_v11  ;;  %7763 = vmatpush1.bf16.msra.mxu0 %v9594_v34  ;;  %v9612_v11 = vcombine.low %v4600_v37, %v4604_v38  ;;  %v4651_v37 = vld [vmem:[#allocation10 + $0xe30] sm:$0xff]  ;;  %v4648_v38 = vld [vmem:[#allocation10 + $0xe18] sm:$0xff] }
 0x513   :  { %7794 = vmatprep.mubr.bf16.mxu0 %v10623_v19  ;;  %7927 = vmatpush1.bf16.msra.mxu1 %v9596_v6 }
 0x514   :  { %7958 = vmatprep.mubr.bf16.mxu1 %v10623_v19  ;;  %7764 = vmatprep.subr.bf16.mxu0 %v9603_v63  ;;  %v9618_v19 = vcombine.low %v4607_v50, %v4611_v48  ;;  %v9644_v63 = vcombine.low %v4632_v9, %v4636_v10  ;;  %v4655_v48 = vld [vmem:[#allocation10 + $0xe50] sm:$0xff]  ;;  %v4680_v10 = vld [vmem:[#allocation10 + $0xf18] sm:$0xff] }
 0x515   :  { %7928 = vmatprep.subr.bf16.mxu1 %v9605_v42  ;;  %v4647_v42 = vld [vmem:[#allocation10 + $0xe10] sm:$0xff] }
 0x516   :  { %7765 = vmatpush1.bf16.msra.mxu0 %v9602_v40  ;;  %v4652_v40 = vld [vmem:[#allocation10 + $0xe38] sm:$0xff]  ;;  %v4683_v9 = vld [vmem:[#allocation10 + $0xf30] sm:$0xff] }
 0x517   :  { %7929 = vmatpush1.bf16.msra.mxu1 %v9604_v45  ;;  %7766 = vmatprep.subr.bf16.mxu0 %v9611_v46  ;;  %v9650_v45 = vcombine.low %v4639_v51, %v4643_v22  ;;  %v9652_v46 = vcombine.low %v4640_v39, %v4644_v14  ;;  %v9661_v50 = vcombine.high %v4648_v38, %v4652_v40  ;;  %v4687_v22 = vld [vmem:[#allocation10 + $0xf50] sm:$0xff]  ;;  %v4688_v14 = vld [vmem:[#allocation10 + $0xf58] sm:$0xff] }
 0x518   :  { %7930 = vmatprep.subr.bf16.mxu1 %v9613_v20  ;;  %v9659_v20 = vcombine.high %v4647_v42, %v4651_v37  ;;  %v4691_v39 = vld [vmem:[#allocation10 + $0xf70] sm:$0xff] }
 0x51a   :  { %7767 = vmatpush1.bf16.msra.mxu0 %v9610_v53  ;;  %v4660_v53 = vld [vmem:[#allocation10 + $0xe78] sm:$0xff] }
 0x51b   :  { %7931 = vmatpush1.bf16.msra.mxu1 %v9612_v11  ;;  %7768 = vmatprep.subr.bf16.mxu0 %v9619_v56  ;;  %v9658_v11 = vcombine.low %v4647_v42, %v4651_v37  ;;  %v9660_v56 = vcombine.low %v4648_v38, %v4652_v40  ;;  %v9669_v59 = vcombine.high %v4656_v52, %v4660_v53  ;;  %v4700_v42 = vld [vmem:[#allocation10 + $0xfb8] sm:$0xff]  ;;  %v10658_v37 = vld [vmem:[#allocation11] sm:$0xff] }
 0x51c   :  { %7932 = vmatprep.subr.bf16.mxu1 %v9621_v27  ;;  %v9667_v27 = vcombine.high %v4655_v48, %v4659_v49  ;;  %v9698_v38 = vcombine.low %v4687_v22, %v4691_v39 }
 0x51e   :  { %7769 = vmatpush1.bf16.msra.mxu0 %v9618_v19  ;;  %v4668_v19 = vld [vmem:[#allocation10 + $0xeb8] sm:$0xff] }
 0x51f   :  { %7933 = vmatpush1.bf16.msra.mxu1 %v9620_v16  ;;  %7770 = vmatprep.subr.bf16.mxu0 %v9627_v2  ;;  %v9666_v16 = vcombine.low %v4655_v48, %v4659_v49  ;;  %v9668_v2 = vcombine.low %v4656_v52, %v4660_v53  ;;  %v9677_v23 = vcombine.high %v4664_v58, %v4668_v19  ;;  %v4704_v49 = vld [vmem:[#allocation10 + $0xfd8] sm:$0xff] }
 0x520   :  { %7934 = vmatprep.subr.bf16.mxu1 %v9629_v3  ;;  %v9675_v3 = vcombine.high %v4663_v60, %v4667_v1  ;;  %v4718_v48 = vrot.slane %v10658_v37, %v10471_v31  ;;  %v4708_v52 = vld [vmem:[#allocation10 + $0xff8] sm:$0xff]  ;;  %v4726_v53 = vrot.slane %v10658_v37, %v10474_v32  ;;  %v9998_v32 = vld [vmem:[#allocation13 + $0xc0] sm:$0xff]  }
 0x521   :  { %v9716_v31 = vcombine.low %v4704_v49, %v4708_v52 }
 0x522   :  { %7771 = vmatpush1.bf16.msra.mxu0 %v9626_v5  ;;  %v4676_v5 = vld [vmem:[#allocation10 + $0xef8] sm:$0xff] }
 0x523   :  { %7935 = vmatpush1.bf16.msra.mxu1 %v9628_v7  ;;  %7772 = vmatprep.subr.bf16.mxu0 %v9635_v8  ;;  %v9674_v7 = vcombine.low %v4663_v60, %v4667_v1  ;;  %v9676_v8 = vcombine.low %v4664_v58, %v4668_v19  ;;  %v9685_v30 = vcombine.high %v4672_v61, %v4676_v5  ;;  %v9997_v19 = vld [vmem:[#allocation13 + $0x40] sm:$0xff]  }
 0x524   :  { %v10650_v21 = vpop.f32.mrb[16].mxu0  ;;  %v10652_v15 = vpop.f32.mrb[16].mxu1  ;;  %7936 = vmatprep.subr.bf16.mxu1 %v9637_v43  ;;  %v9683_v43 = vcombine.high %v4671_v47, %v4675_v4 }
 0x525   :  { %v10654_v24 = vpop.f32.mrb[17].mxu0  ;;  %v10656_v33 = vpop.f32.mrb[17].mxu1 }
 0x526   :  { %v7472_v54 = vpop.f32.mrb[18].mxu0  ;;  %v7636_v34 = vpop.f32.mrb[18].mxu1  ;;  %7773 = vmatpush1.bf16.msra.mxu0 %v9634_v25  ;;  %v4684_v25 = vld [vmem:[#allocation10 + $0xf38] sm:$0xff]  ;;  %v9880_v60 = vadd.f32 %v10654_v24, %v4718_v48  ;;  %v9882_v1 = vadd.f32 %v10656_v33, %v4726_v53  ;;  %v10002_v33 = vld [vmem:[#allocation13 + $0xc8] sm:$0xff]   ;;  %v10032_v48 = vld [vmem:[#allocation13 + $0x180] sm:$0xff]  }
 0x527   :  { %7937 = vmatpush1.bf16.msra.mxu1 %v9636_v12  ;;  %v7473_v35 = vpop.f32.mrb[19].mxu0  ;;  %v7637_v6 = vpop.f32.mrb[19].mxu1  ;;  %7774 = vmatprep.subr.bf16.mxu0 %v9643_v13  ;;  %v9682_v12 = vcombine.low %v4671_v47, %v4675_v4  ;;  %v9684_v13 = vcombine.low %v4672_v61, %v4676_v5  ;;  %v9693_v51 = vcombine.high %v4680_v10, %v4684_v25  ;;  %v4692_v54 = vld [vmem:[#allocation10 + $0xf78] sm:$0xff]  ;;  %v10001_v47 = vld [vmem:[#allocation13 + $0x48] sm:$0xff]  }
 0x528   :  { %7938 = vmatprep.subr.bf16.mxu1 %v9645_v17  ;;  %v9691_v17 = vcombine.high %v4679_v62, %v4683_v9  ;;  %v9690_v34 = vcombine.low %v4679_v62, %v4683_v9  ;;  %v9699_v35 = vcombine.high %v4687_v22, %v4691_v39  ;;  %v9701_v6 = vcombine.high %v4688_v14, %v4692_v54  ;;  %v10003_v61 = vld [vmem:[#allocation13 + $0x8] sm:$0xff]   ;;  %v10009_v62 = vld [vmem:[#allocation13 + $0x58] sm:$0xff]  }
 0x529   :  { %v9700_v40 = vcombine.low %v4688_v14, %v4692_v54  ;;  %v10004_v5 = vld [vmem:[#allocation13 + $0x88] sm:$0xff]   ;;  %v10010_v9 = vld [vmem:[#allocation13 + $0xd8] sm:$0xff]   ;;  %v4714_v14 = vrot.slane %v10658_v37, %v10466_v29 }
 0x52a   :  { %7775 = vmatpush1.bf16.msra.mxu0 %v9642_v0  ;;  %v9692_v0 = vcombine.low %v4680_v10, %v4684_v25  ;;  %v10012_v10 = vld [vmem:[#allocation13 + $0x98] sm:$0xff]   ;;  %v10013_v25 = vld [vmem:[#allocation13 + $0x60] sm:$0xff]   ;;  %v10018_v22 = vld [vmem:[#allocation13 + $0xe8] sm:$0xff]  }
 0x52b   :  { %7939 = vmatpush1.bf16.msra.mxu1 %v9644_v63  ;;  %7776 = vmatprep.subr.bf16.mxu0 %v9651_v28  ;;  %v4695_v63 = vld [vmem:[#allocation10 + $0xf90] sm:$0xff]  ;;  %v10026_v29 = vld [vmem:[#allocation13 + $0xf8] sm:$0xff]  }
 0x52c   :  { %7940 = vmatprep.subr.bf16.mxu1 %v9653_v36  ;;  %v4699_v28 = vld [vmem:[#allocation10 + $0xfb0] sm:$0xff]  ;;  %v4696_v36 = vld [vmem:[#allocation10 + $0xf98] sm:$0xff] }
 0x52d   :  { %v10019_v39 = vld [vmem:[#allocation13 + $0x28] sm:$0xff]  }
 0x52e   :  { %7777 = vmatpush1.bf16.msra.mxu0 %v9650_v45  ;;  %v9707_v45 = vcombine.high %v4695_v63, %v4699_v28  ;;  %v10020_v54 = vld [vmem:[#allocation13 + $0xa8] sm:$0xff]  }
 0x52f   :  { %7941 = vmatpush1.bf16.msra.mxu1 %v9652_v46  ;;  %7778 = vmatprep.subr.bf16.mxu0 %v9659_v20  ;;  %v9709_v46 = vcombine.high %v4696_v36, %v4700_v42  ;;  %v4703_v20 = vld [vmem:[#allocation10 + $0xfd0] sm:$0xff] }
 0x530   :  { %7942 = vmatprep.subr.bf16.mxu1 %v9661_v50  ;;  %v4707_v50 = vld [vmem:[#allocation10 + $0xff0] sm:$0xff] }
 0x531   :  { %v9714_v58 = vcombine.low %v4703_v20, %v4707_v50  ;;  %v10035_v53 = vld [vmem:[#allocation13 + $0x108] sm:$0xff]  }
 0x532   :  { %7779 = vmatpush1.bf16.msra.mxu0 %v9658_v11  ;;  %v9706_v11 = vcombine.low %v4695_v63, %v4699_v28  ;;  %v9879_v63 = vadd.f32 %v10650_v21, %v4714_v14  ;;  %v10024_v28 = vld [vmem:[#allocation13 + $0xb0] sm:$0xff]   ;;  %v10031_v21 = vld [vmem:[#allocation13 + $0x100] sm:$0xff]  }
 0x533   :  { %7943 = vmatpush1.bf16.msra.mxu1 %v9660_v56  ;;  %7780 = vmatprep.subr.bf16.mxu0 %v9667_v27  ;;  %v9708_v56 = vcombine.low %v4696_v36, %v4700_v42  ;;  %v9715_v27 = vcombine.high %v4703_v20, %v4707_v50  ;;  %v10025_v36 = vld [vmem:[#allocation13 + $0x78] sm:$0xff]   ;;  %v10030_v20 = vld [vmem:[#allocation13 + $0x1c0] sm:$0xff]  }
 0x534   :  { %7944 = vmatprep.subr.bf16.mxu1 %v9669_v59  ;;  %v9717_v59 = vcombine.high %v4704_v49, %v4708_v52  ;;  %v10033_v49 = vld [vmem:[#allocation13 + $0x148] sm:$0xff]  }
 0x535   :  { %v10034_v52 = vld [vmem:[#allocation13 + $0x1c8] sm:$0xff]  }
 0x536   :  { %7781 = vmatpush1.bf16.msra.mxu0 %v9666_v16  ;;  %v7968_v16 = vmax.f32 %v9880_v60, 0.0  ;;  %v10040_v60 = vld [vmem:[#allocation13 + $0x190] sm:$0xff]  }
 0x537   :  { %7945 = vmatpush1.bf16.msra.mxu1 %v9668_v2  ;;  %7782 = vmatprep.subr.bf16.mxu0 %v9675_v3  ;;  %v7970_v2 = vmax.f32 %v9882_v1, 0.0  ;;  %v9999_v3 = vld [vmem:[#allocation13] sm:$0xff]   ;;  %v10041_v1 = vld [vmem:[#allocation13 + $0x158] sm:$0xff]  }
 0x538   :  { %7946 = vmatprep.subr.bf16.mxu1 %v9677_v23  ;;  %v10000_v23 = vld [vmem:[#allocation13 + $0x80] sm:$0xff]   ;;  %v7976_v24 = vpack.c.bf16 %v7968_v16, %v7968_v16 }
 0x539   :  { %v7978_v4 = vpack.c.bf16 %v7970_v2, %v7970_v2  ;;  %v10046_v16 = vld [vmem:[#allocation13 + $0x1e0] sm:$0xff]  }
 0x53a   :  { %7783 = vmatpush1.bf16.msra.mxu0 %v9674_v7  ;;  %v10005_v7 = vld [vmem:[#allocation13 + $0x50] sm:$0xff]   ;;  %v10047_v2 = vld [vmem:[#allocation13 + $0x120] sm:$0xff]  }
 0x53b   :  { %7947 = vmatpush1.bf16.msra.mxu1 %v9676_v8  ;;  %7784 = vmatprep.subr.bf16.mxu0 %v9683_v43  ;;  %v10006_v8 = vld [vmem:[#allocation13 + $0xd0] sm:$0xff]  }
 0x53c   :  { %7948 = vmatprep.subr.bf16.mxu1 %v9685_v30  ;;  %v10007_v43 = vld [vmem:[#allocation13 + $0x10] sm:$0xff]  }
 0x53d   :  { %v10008_v30 = vld [vmem:[#allocation13 + $0x90] sm:$0xff]  }
 0x53e   :  { %7785 = vmatpush1.bf16.msra.mxu0 %v9682_v12  ;;  %v10014_v12 = vld [vmem:[#allocation13 + $0xe0] sm:$0xff]  }
 0x53f   :  { %7949 = vmatpush1.bf16.msra.mxu1 %v9684_v13  ;;  %7786 = vmatprep.subr.bf16.mxu0 %v9691_v17  ;;  %v10015_v13 = vld [vmem:[#allocation13 + $0x20] sm:$0xff]  }
 0x540   :  { %7950 = vmatprep.subr.bf16.mxu1 %v9693_v51  ;;  %v10016_v17 = vld [vmem:[#allocation13 + $0xa0] sm:$0xff]   ;;  %v10017_v51 = vld [vmem:[#allocation13 + $0x68] sm:$0xff]  }
 0x542   :  { %7787 = vmatpush1.bf16.msra.mxu0 %v9690_v34  ;;  %v10021_v34 = vld [vmem:[#allocation13 + $0x70] sm:$0xff]  }
 0x543   :  { %7951 = vmatpush1.bf16.msra.mxu1 %v9692_v0  ;;  %7788 = vmatprep.subr.bf16.mxu0 %v9699_v35  ;;  %v4722_v0 = vrot.slane %v10658_v37, %v10501_v44  ;;  %v10022_v35 = vld [vmem:[#allocation13 + $0xf0] sm:$0xff]   ;;  %v10028_v44 = vld [vmem:[#allocation13 + $0xb8] sm:$0xff]  }
 0x544   :  { %7952 = vmatprep.subr.bf16.mxu1 %v9701_v6  ;;  %v10023_v6 = vld [vmem:[#allocation13 + $0x30] sm:$0xff]  }
 0x545   :  { %v9881_v42 = vadd.f32 %v10652_v15, %v4722_v0 }
 0x546   :  { %7789 = vmatpush1.bf16.msra.mxu0 %v9698_v38  ;;  %v10027_v38 = vld [vmem:[#allocation13 + $0x38] sm:$0xff]  }
 0x547   :  { %7953 = vmatpush1.bf16.msra.mxu1 %v9700_v40  ;;  %7790 = vmatprep.subr.bf16.mxu0 %v9707_v45  ;;  %v7967_v40 = vmax.f32 %v9879_v63, 0.0  ;;  %v10029_v45 = vld [vmem:[#allocation13 + $0x140] sm:$0xff]  }
 0x548   :  { %7954 = vmatprep.subr.bf16.mxu1 %v9709_v46  ;;  %v7969_v46 = vmax.f32 %v9881_v42, 0.0 }
 0x549   :  { %v7975_v50 = vpack.c.bf16 %v7967_v40, %v7967_v40 }
 0x54a   :  { %7791 = vmatpush1.bf16.msra.mxu0 %v9706_v11  ;;  %v7977_v15 = vpack.c.bf16 %v7969_v46, %v7969_v46  ;;  %v10036_v11 = vld [vmem:[#allocation13 + $0x188] sm:$0xff]  }
 0x54b   :  { %7955 = vmatpush1.bf16.msra.mxu1 %v9708_v56  ;;  %7792 = vmatprep.subr.bf16.mxu0 %v9715_v27  ;;  %v10037_v56 = vld [vmem:[#allocation13 + $0x150] sm:$0xff]  }
 0x54c   :  { %7956 = vmatprep.subr.bf16.mxu1 %v9717_v59  ;;  %v10038_v27 = vld [vmem:[#allocation13 + $0x1d0] sm:$0xff]  }
 0x54d   :  { %v10039_v59 = vld [vmem:[#allocation13 + $0x110] sm:$0xff]  }
 0x54e   :  { %7793 = vmatpush1.bf16.msra.mxu0 %v9714_v58  ;;  %v10042_v58 = vld [vmem:[#allocation13 + $0x1d8] sm:$0xff]  }
 0x54f   :  { %7957 = vmatpush1.bf16.msra.mxu1 %v9716_v31  ;;  %9783 = vmatprep.subr.bf16.mxu0 %v9997_v19  ;;  %v10043_v31 = vld [vmem:[#allocation13 + $0x118] sm:$0xff]  }
 0x550   :  { %9805 = vmatprep.subr.bf16.mxu1 %v9998_v32  ;;  %v10044_v19 = vld [vmem:[#allocation13 + $0x198] sm:$0xff]   ;;  %v10045_v32 = vld [vmem:[#allocation13 + $0x160] sm:$0xff]  }
 0x551   :  { %7795 = vmatmul.mubr.bf16.vlgmr.msra.gmra.mrb[20].mxu0 %v10632_v55 }
 0x552   :  { %7959 = vmatmul.mubr.bf16.vlgmr.msra.gmra.mrb[20].mxu1 %v10632_v55  ;;  %9784 = vmatpush3.bf16.msra.mxu0 %v9999_v3  ;;  %v10011_v55 = vld [vmem:[#allocation13 + $0x18] sm:$0xff]   ;;  %v10048_v3 = vld [vmem:[#allocation13 + $0x1a0] sm:$0xff]  }
 0x553   :  { %8534 = vmatprep.mubr.bf16.mxu0 %v7976_v24  ;;  %9806 = vmatpush3.bf16.msra.mxu1 %v10000_v23  ;;  %v10049_v23 = vld [vmem:[#allocation13 + $0x168] sm:$0xff]  }
 0x554   :  { %8574 = vmatprep.mubr.bf16.mxu1 %v7978_v4  ;;  %9785 = vmatprep.subr.bf16.mxu0 %v10001_v47  ;;  %v10050_v47 = vld [vmem:[#allocation13 + $0x1e8] sm:$0xff]   ;;  %v10053_v4 = vld [vmem:[#allocation13 + $0x170] sm:$0xff]  }
 0x555   :  { %9807 = vmatprep.subr.bf16.mxu1 %v10002_v33  ;;  %v10051_v24 = vld [vmem:[#allocation13 + $0x128] sm:$0xff]  }
 0x556   :  { %9786 = vmatpush3.bf16.msra.mxu0 %v10003_v61  ;;  %v10052_v33 = vld [vmem:[#allocation13 + $0x1a8] sm:$0xff]   ;;  %v10054_v61 = vld [vmem:[#allocation13 + $0x1f0] sm:$0xff]  }
 0x557   :  { %9808 = vmatpush3.bf16.msra.mxu1 %v10004_v5  ;;  %9787 = vmatprep.subr.bf16.mxu0 %v10005_v7  ;;  %v10055_v5 = vld [vmem:[#allocation13 + $0x130] sm:$0xff]  }
 0x558   :  { %9809 = vmatprep.subr.bf16.mxu1 %v10006_v8  ;;  %v10056_v7 = vld [vmem:[#allocation13 + $0x1b0] sm:$0xff]   ;;  %v10057_v8 = vld [vmem:[#allocation13 + $0x178] sm:$0xff]  }
 0x55a   :  { %9788 = vmatpush3.bf16.msra.mxu0 %v10007_v43  ;;  %v10058_v43 = vld [vmem:[#allocation13 + $0x1f8] sm:$0xff]  }
 0x55b   :  { %9810 = vmatpush3.bf16.msra.mxu1 %v10008_v30  ;;  %9789 = vmatprep.subr.bf16.mxu0 %v10009_v62  ;;  %v10059_v30 = vld [vmem:[#allocation13 + $0x138] sm:$0xff]  }
 0x55c   :  { %9811 = vmatprep.subr.bf16.mxu1 %v10010_v9  ;;  %v10060_v62 = vld [vmem:[#allocation13 + $0x1b8] sm:$0xff]   ;;  %v4730_v9 = vrot.slane %v10658_v37, %v10525_v26 }
 0x55e   :  { %9790 = vmatpush3.bf16.msra.mxu0 %v10011_v55  ;;  %v4738_v55 = vrot.slane %v10658_v37, %v10545_v18 }
 0x55f   :  { %9812 = vmatpush3.bf16.msra.mxu1 %v10012_v10  ;;  %9791 = vmatprep.subr.bf16.mxu0 %v10013_v25  ;;  %v4734_v10 = vrot.slane %v10658_v37, %v10508_v57  ;;  %v4742_v25 = vrot.slane %v10658_v37, %v10528_v41 }
 0x560   :  { %9813 = vmatprep.subr.bf16.mxu1 %v10014_v12 }
 0x562   :  { %9792 = vmatpush3.bf16.msra.mxu0 %v10015_v13 }
 0x563   :  { %9814 = vmatpush3.bf16.msra.mxu1 %v10016_v17  ;;  %9793 = vmatprep.subr.bf16.mxu0 %v10017_v51 }
 0x564   :  { %9815 = vmatprep.subr.bf16.mxu1 %v10018_v22 }
 0x566   :  { %9794 = vmatpush3.bf16.msra.mxu0 %v10019_v39 }
 0x567   :  { %9816 = vmatpush3.bf16.msra.mxu1 %v10020_v54  ;;  %9795 = vmatprep.subr.bf16.mxu0 %v10021_v34 }
 0x568   :  { %9817 = vmatprep.subr.bf16.mxu1 %v10022_v35 }
 0x56a   :  { %9796 = vmatpush3.bf16.msra.mxu0 %v10023_v6 }
 0x56b   :  { %9818 = vmatpush3.bf16.msra.mxu1 %v10024_v28  ;;  %9797 = vmatprep.subr.bf16.mxu0 %v10025_v36 }
 0x56c   :  { %9819 = vmatprep.subr.bf16.mxu1 %v10026_v29 }
 0x56e   :  { %9798 = vmatpush3.bf16.msra.mxu0 %v10027_v38  ;;  %v9718_v38 = vld [vmem:[#allocation14] ss:$0 sm:$0xff] }
 0x56f   :  { %9820 = vmatpush3.bf16.msra.mxu1 %v10028_v44  ;;  %9827 = vmatprep.subr.bf16.mxu0 %v10029_v45 }
 0x570   :  { %9849 = vmatprep.subr.bf16.mxu1 %v10030_v20 }
 0x571   :  { %8535 = vmatmul.mubr.bf16.vlgmr.msra.gmra.mrb[24].mxu0 %v7975_v50 }
 0x572   :  { %8575 = vmatmul.mubr.bf16.vlgmr.msra.gmra.mrb[24].mxu1 %v7977_v15  ;;  %9828 = vmatpush3.bf16.msra.mxu0 %v10031_v21 }
 0x573   :  { %9850 = vmatpush3.bf16.msra.mxu1 %v10032_v48  ;;  %9829 = vmatprep.subr.bf16.mxu0 %v10033_v49 }
 0x574   :  { %9851 = vmatprep.subr.bf16.mxu1 %v10034_v52 }
 0x576   :  { %9830 = vmatpush3.bf16.msra.mxu0 %v10035_v53 }
 0x577   :  { %9852 = vmatpush3.bf16.msra.mxu1 %v10036_v11  ;;  %9831 = vmatprep.subr.bf16.mxu0 %v10037_v56 }
 0x578   :  { %9853 = vmatprep.subr.bf16.mxu1 %v10038_v27 }
 0x57a   :  { %9832 = vmatpush3.bf16.msra.mxu0 %v10039_v59 }
 0x57b   :  { %9854 = vmatpush3.bf16.msra.mxu1 %v10040_v60  ;;  %9833 = vmatprep.subr.bf16.mxu0 %v10041_v1 }
 0x57c   :  { %9855 = vmatprep.subr.bf16.mxu1 %v10042_v58 }
 0x57e   :  { %9834 = vmatpush3.bf16.msra.mxu0 %v10043_v31 }
 0x57f   :  { %9856 = vmatpush3.bf16.msra.mxu1 %v10044_v19  ;;  %9835 = vmatprep.subr.bf16.mxu0 %v10045_v32 }
 0x580   :  { %9857 = vmatprep.subr.bf16.mxu1 %v10046_v16 }
 0x582   :  { %9836 = vmatpush3.bf16.msra.mxu0 %v10047_v2 }
 0x583   :  { %9858 = vmatpush3.bf16.msra.mxu1 %v10048_v3  ;;  %9837 = vmatprep.subr.bf16.mxu0 %v10049_v23 }
 0x584   :  { %9859 = vmatprep.subr.bf16.mxu1 %v10050_v47 }
 0x586   :  { %9838 = vmatpush3.bf16.msra.mxu0 %v10051_v24 }
 0x587   :  { %9860 = vmatpush3.bf16.msra.mxu1 %v10052_v33  ;;  %9839 = vmatprep.subr.bf16.mxu0 %v10053_v4 }
 0x588   :  { %9861 = vmatprep.subr.bf16.mxu1 %v10054_v61 }
 0x58a   :  { %9840 = vmatpush3.bf16.msra.mxu0 %v10055_v5 }
 0x58b   :  { %9862 = vmatpush3.bf16.msra.mxu1 %v10056_v7  ;;  %9841 = vmatprep.subr.bf16.mxu0 %v10057_v8 }
 0x58c   :  { %9863 = vmatprep.subr.bf16.mxu1 %v10058_v43 }
 0x58e   :  { %9842 = vmatpush3.bf16.msra.mxu0 %v10059_v30 }
 0x58f   :  { %9864 = vmatpush3.bf16.msra.mxu1 %v10060_v62 }
 0x624   :  { %v7796_v12 = vpop.f32.mrb[20].mxu0 }
 0x625   :  { %v9883_v13 = vadd.f32 %v7796_v12, %v4730_v9  ;;  %v7960_v17 = vpop.f32.mrb[20].mxu1  ;;  %v7798_v51 = vpop.f32.mrb[21].mxu0 }
 0x626   :  { %v9885_v22 = vadd.f32 %v7960_v17, %v4738_v55  ;;  %v9884_v39 = vadd.f32 %v7798_v51, %v4734_v10  ;;  %v7962_v14 = vpop.f32.mrb[21].mxu1  ;;  %v7800_v54 = vpop.f32.mrb[22].mxu0 }
 0x627   :  { %v7971_v34 = vmax.f32 %v9883_v13, 0.0  ;;  %v9886_v0 = vadd.f32 %v7962_v14, %v4742_v25  ;;  %v7964_v26 = vpop.f32.mrb[22].mxu1  ;;  %v7801_v35 = vpop.f32.mrb[23].mxu0 }
 0x628   :  { %v7973_v6 = vmax.f32 %v9885_v22, 0.0  ;;  %v7972_v18 = vmax.f32 %v9884_v39, 0.0  ;;  %v7965_v63 = vpop.f32.mrb[23].mxu1 }
 0x629   :  { %v7974_v28 = vmax.f32 %v9886_v0, 0.0  ;;  %v7979_v36 = vpack.c.bf16 %v7971_v34, %v7971_v34 }
 0x62a   :  { %v7980_v57 = vpack.c.bf16 %v7972_v18, %v7972_v18  ;;  %v7981_v41 = vpack.c.bf16 %v7973_v6, %v7973_v6 }
 0x62b   :  { %v7982_v42 = vpack.c.bf16 %v7974_v28, %v7974_v28 }
 0x62c   :  { %8614 = vmatprep.mubr.bf16.mxu0 %v7980_v57 }
 0x62d   :  { %8654 = vmatprep.mubr.bf16.mxu1 %v7982_v42  ;;  %8615 = vmatmul.mubr.bf16.vlgmr.msra.gmra.mrb[28].mxu0 %v7979_v36 }
 0x62e   :  { %8655 = vmatmul.mubr.bf16.vlgmr.msra.gmra.mrb[28].mxu1 %v7981_v41 }
 0x644   :  { %v9799_v37 = vpop.f32.mrb[24].mxu0 }
 0x645   :  { %v9821_v29 = vpop.f32.mrb[24].mxu1  ;;  %v9800_v40 = vpop.f32.mrb[25].mxu0 }
 0x646   :  { %v9801_v44 = vadd.f32 %v9800_v40, %v9799_v37  ;;  %v9822_v45 = vpop.f32.mrb[25].mxu1  ;;  %v9802_v46 = vpop.f32.mrb[26].mxu0 }
 0x647   :  { %v9823_v20 = vadd.f32 %v9822_v45, %v9821_v29  ;;  %v9824_v21 = vpop.f32.mrb[26].mxu1  ;;  %v9803_v50 = vpop.f32.mrb[27].mxu0 }
 0x648   :  { %v8537_v48 = vadd.f32 %v9801_v44, %v9718_v38  ;;  %v9825_v49 = vpop.f32.mrb[27].mxu1 }
 0x64a   :  { %v8577_v15 = vadd.f32 %v9823_v20, %v8537_v48 }
 0x700   :  { %v9843_v52 = vpop.f32.mrb[28].mxu0 }
 0x701   :  { %v9865_v53 = vpop.f32.mrb[28].mxu1  ;;  %v9844_v11 = vpop.f32.mrb[29].mxu0 }
 0x702   :  { %v9845_v56 = vadd.f32 %v9844_v11, %v9843_v52  ;;  %v9866_v27 = vpop.f32.mrb[29].mxu1  ;;  %v9846_v59 = vpop.f32.mrb[30].mxu0 }
 0x703   :  { %v9867_v60 = vadd.f32 %v9866_v27, %v9865_v53  ;;  %v9868_v1 = vpop.f32.mrb[30].mxu1  ;;  %v9847_v58 = vpop.f32.mrb[31].mxu0 }
 0x704   :  { %v8617_v31 = vadd.f32 %v9845_v56, %v8577_v15  ;;  %v9869_v19 = vpop.f32.mrb[31].mxu1 }
 0x706   :  { %v8657_v32 = vadd.f32 %v9867_v60, %v8617_v31 }
 0x708   :  { %8662 = vst [vmem:[#allocation16] sm:$0xff] %v8657_v32 }
 0x709   :  { %10250 = shalt.err (!%p10247_p12)
}
 0x70a   :  { %s10251_s20 = scalar_lea.hbm %s10703_s9, 128 }
 0x70b   :  { %p10252_p13 = scmp.ne.s32.totalorder %s10703_s9, %s10251_s20  ;;  %p10255_p0 = scmp.lt.u32.totalorder %s10251_s20, %s10703_s9 }
 0x70d   :  { %p10257_p1 = pnand %p10255_p0, %p10252_p13 }
 0x70f   :  { %10260 = shalt.err (!%p10257_p1)
}
 0x710   :  { %8672 = dma.vmem_to_hbm [thread:$0]  %s8670_s8, 128, %s10703_s9, [#allocation4]  }
 0x711   :  { %10271 = dma.done.wait [#allocation4], 128  }
 0x712   :  { %10272 = vsyncadd [#allocation4], 4294967168 }
 0x713   :  { %8676 = vsyncpa [#allocation3], 1 }
 0x714   :  { %8677 = vsyncpa [#allocation6], 1 }
 0x715   :  { %8678 = vsyncpa [#allocation9], 1 }
 0x716   :  { %8679 = vsyncpa [#allocation12], 1 }
 0x717   :  { %8680 = vsyncpa [#allocation15], 1 }
 0x718   :  { %8681 = vsyncpa [#allocation4], 1 }

</bundles_post_ra>
